<compile_context>
chip_gen: v7x
topology: tpu7x:2x2x1
jax: 0.10.0
libtpu: 0.0.40
codegen_flags: <defaults>
</compile_context>

<pallas_src>
import functools

import numpy as np
import jax
import jax.numpy as jnp
from jax.experimental import pallas as pl
from jax.experimental.pallas import tpu as pltpu


def _round_up(v, m):
    return (v + m - 1) // m * m


# --------------------------- Pallas kernels ---------------------------------

def fc_deconv1_kernel(x_ref, wfc_ref, bfc_ref, w1_ref, b1_ref, o_ref):
    # x: (B, F) f32; wfc: (F, 256) bf16; w1: (256, 5*5*128) bf16 ((kh,kw,oc)-minor).
    x = x_ref[...].astype(jnp.bfloat16)
    h = jnp.dot(x, wfc_ref[...], preferred_element_type=jnp.float32) + bfc_ref[...]
    y = jnp.dot(h.astype(jnp.bfloat16), w1_ref[...],
                preferred_element_type=jnp.float32) + b1_ref[...]
    o_ref[...] = jnp.maximum(y, 0.0).astype(o_ref.dtype)   # ReLU after deconv1


def deconv_phase_kernel(xg_ref, wg_ref, b_ref, o_ref, *, RS, act):
    # One M-tile of all 4 output phases of a stride-2 ConvTranspose2d.
    #   xg_ref: (M_g, T*IC) bf16, tw'-grouped along lanes (VMEM-resident).
    #   wg_ref: (T, T*IC, L) bf16 phase-stacked weights; b_ref: (1, L) f32.
    #   o_ref : (TM, L) output tile.  Tap-row reduction done in vregs; output
    #           written once with bias + activation fused.
    TM = o_ref.shape[0]
    base = pl.program_id(0) * TM
    acc = None
    for t in range(wg_ref.shape[0]):                   # static, fully unrolled
        off = pl.multiple_of(base + t * RS, 16)        # 16-aligned (bf16 sublanes)
        contrib = jnp.dot(xg_ref[pl.ds(off, TM), :], wg_ref[t],
                          preferred_element_type=jnp.float32)
        acc = contrib if acc is None else acc + contrib
    y = acc + b_ref[...]
    y = jnp.maximum(y, 0.0) if act == "relu" else jax.nn.sigmoid(y)
    o_ref[...] = y.astype(o_ref.dtype)


# --------------------------- parameter preparation ---------------------------

def _phase_group_weight(w, oc_pad):
    """PyTorch ConvT weight (IC, OC, K, K) -> (T, T*IC, 4*oc_pad), phase-stacked.

    Lane group p = ph*2 + pw holds output phase (oh%2, ow%2) = (ph, pw); the
    leading axis is the flipped row-tap index th' used by the kernel row shifts:
      Wg[th', tw'*IC+ic, p*oc_pad+oc] = W[ic, oc, ph+2*(T-1-th'), pw+2*(T-1-tw')]
    (zero where the kernel index falls outside [0, K))."""
    IC, OC, K, _ = w.shape
    T = (K + 1) // 2
    wp = jnp.pad(w, ((0, 0), (0, oc_pad - OC), (0, 2 * T - K), (0, 2 * T - K)))
    wr = wp.reshape(IC, oc_pad, T, 2, T, 2)      # (ic, oc, mh, ph, mw, pw), kh=2*mh+ph
    wr = jnp.flip(wr, axis=(2, 4))               # mh -> th' = T-1-mh
    wt = wr.transpose(2, 4, 0, 3, 5, 1)          # (th', tw', ic, ph, pw, oc)
    return wt.reshape(T, T * IC, 4 * oc_pad)


def prepare_params(params, out_channels):
    """One-time weight preprocessing (hoisted out of the forward)."""
    oc3_pad = _round_up(max(out_channels, 1), 32)          # 4 phases * 32 = 128 lanes
    b3p = jnp.pad(params["b3"], (0, oc3_pad - out_channels))
    return {
        "wfc": params["wfc"].astype(jnp.bfloat16),
        "bfc": params["bfc"].reshape(1, -1).astype(jnp.float32),
        "w1m": params["w1"].transpose(0, 2, 3, 1).reshape(256, 5 * 5 * 128)
                           .astype(jnp.bfloat16),
        "b1m": jnp.broadcast_to(params["b1"][None, None, :], (5, 5, 128))
                  .reshape(1, -1).astype(jnp.float32),
        "w2g": _phase_group_weight(params["w2"], 64).astype(jnp.bfloat16),
        "b2g": jnp.tile(params["b2"], 4).reshape(1, -1).astype(jnp.float32),
        "w3g": _phase_group_weight(params["w3"], oc3_pad).astype(jnp.bfloat16),
        "b3g": jnp.tile(b3p, 4).reshape(1, -1).astype(jnp.float32),
    }


# --------------------------- wrappers ----------------------------------------

def pallas_fc_deconv1(x, wfc, bfc, w1m, b1m):
    """Linear(F,256) -> reshape(B,256,1,1) -> ConvT(256,128,5,2) -> ReLU (fused)."""
    B = x.shape[0]
    out = pl.pallas_call(
        fc_deconv1_kernel,
        out_shape=jax.ShapeDtypeStruct((B, 5 * 5 * 128), jnp.bfloat16),
        in_specs=[pl.BlockSpec(memory_space=pltpu.MemorySpace.VMEM)] * 5,
        out_specs=pl.BlockSpec(memory_space=pltpu.MemorySpace.VMEM),
    )(x, wfc, bfc, w1m, b1m)
    return out.reshape(B, 5, 5, 128)              # NHWC, bf16


def pallas_deconv_phase(y_nhwc, wg, b, *, K, act, out_dtype, tm):
    """Stride-2 ConvTranspose2d(padding=0) + (ReLU|Sigmoid), NHWC in/out, via the
    4-phase (sub-pixel) decomposition.  wg: (T, T*IC, 4*OCg) phase-stacked bf16
    weights; b: (1, 4*OCg) f32.  Output channels returned = OCg."""
    B, IH, IW, IC = y_nhwc.shape
    T, TIC, L = wg.shape
    assert T == (K + 1) // 2 and TIC == T * IC
    OCg = L // 4
    OH, OW = (IH - 1) * 2 + K, (IW - 1) * 2 + K
    A, Bc = (OH + 1) // 2, (OW + 1) // 2            # per-phase output grid (max)
    PH, PW = A + T - 1, Bc + T - 1                   # compact padded input extent
    RS = _round_up(PW, 16)                           # 16-aligned padded row stride

    # --- glue (bf16): place input at offset (T-1,T-1); T lane-shifted copies ---
    xp = jnp.zeros((B, PH, RS, IC), jnp.bfloat16)
    xp = xp.at[:, T - 1:T - 1 + IH, T - 1:T - 1 + IW, :].set(
        y_nhwc.astype(jnp.bfloat16))
    flat = xp.reshape(B * PH * RS, IC)

    q_max = ((B - 1) * PH + (A - 1)) * RS + (Bc - 1)
    M_rows = _round_up(q_max + 1, tm)
    M_g = (T - 1) * RS + M_rows
    need = M_g + T - 1
    if flat.shape[0] >= need:
        flat = flat[:need]
    else:
        flat = jnp.pad(flat, ((0, need - flat.shape[0]), (0, 0)))
    # TODO(synk): build these T lane-shifted copies in-kernel from the compact
    #             activation (memory_space=pl.ANY) to drop the T-x read amp.
    xg = jnp.concatenate([flat[tw:tw + M_g] for tw in range(T)], axis=1)

    out = pl.pallas_call(
        functools.partial(deconv_phase_kernel, RS=RS, act=act),
        out_shape=jax.ShapeDtypeStruct((M_rows, L), out_dtype),
        grid=(M_rows // tm,),
        in_specs=[
            pl.BlockSpec((M_g, T * IC), lambda i: (0, 0)),       # resident lhs
            pl.BlockSpec((T, T * IC, L), lambda i: (0, 0, 0)),   # resident weights
            pl.BlockSpec((1, L), lambda i: (0, 0)),
        ],
        out_specs=pl.BlockSpec((tm, L), lambda i: (i, 0)),
        compiler_params=pltpu.CompilerParams(
            dimension_semantics=("parallel",)),                  # v7x: 2 TCs split M
    )(xg, wg, b)

    # --- un-flatten, interleave the 4 phases, crop -----------------------------
    total = B * PH * RS
    if M_rows >= total:
        out = out[:total]
    else:
        out = jnp.pad(out, ((0, total - M_rows), (0, 0)))
    out = out.reshape(B, PH, RS, 2, 2, OCg)[:, :A, :Bc]          # (B,A,Bc,ph,pw,oc)
    out = out.transpose(0, 1, 3, 2, 4, 5).reshape(B, 2 * A, 2 * Bc, OCg)
    return out[:, :OH, :OW, :]


def observation_decoder_forward(x, pp, *, output_size, out_channels):
    """x: (B, feature_dim) -> (B, out_channels, *output_size), NCHW like PyTorch."""
    y = pallas_fc_deconv1(x, pp["wfc"], pp["bfc"], pp["w1m"], pp["b1m"])  # (B,5,5,128)
    y = pallas_deconv_phase(y, pp["w2g"], pp["b2g"], K=5, act="relu",
                            out_dtype=jnp.bfloat16, tm=128)               # (B,13,13,64)
    y = pallas_deconv_phase(y, pp["w3g"], pp["b3g"], K=6, act="sigmoid",
                            out_dtype=jnp.float32, tm=256)                # (B,30,30,OCp)
    y = y[..., :out_channels]

    # F.interpolate(..., size=output_size), default mode='nearest':
    # src = floor(dst * in/out).  Pure index gather -> XLA glue.
    H, W = y.shape[1], y.shape[2]
    oh, ow = output_size
    src_h = np.floor(np.arange(oh) * (H / oh)).astype(np.int32)
    src_w = np.floor(np.arange(ow) * (W / ow)).astype(np.int32)
    y = y[:, src_h][:, :, src_w]
    return jnp.transpose(y, (0, 3, 1, 2))         # NHWC -> NCHW


# --------------------------- pure-JAX reference ------------------------------

def reference_forward(x, params, output_size):
    """Straightforward JAX implementation at matched (bf16-MXU / f32-acc) precision."""
    bf = jnp.bfloat16
    h = jnp.dot(x.astype(bf), params["wfc"].astype(bf),
                preferred_element_type=jnp.float32) + params["bfc"]
    z = h.reshape(x.shape[0], 256, 1, 1)

    def convT(z, w, b, stride):
        K = w.shape[2]
        rhs = jnp.flip(w, (2, 3)).transpose(1, 0, 2, 3)   # (OC, IC, KH, KW)
        o = jax.lax.conv_general_dilated(
            z.astype(bf), rhs.astype(bf),
            window_strides=(1, 1),
            padding=[(K - 1, K - 1), (K - 1, K - 1)],
            lhs_dilation=(stride, stride),
            dimension_numbers=("NCHW", "OIHW", "NCHW"),
            preferred_element_type=jnp.float32)
        return o + b[None, :, None, None]

    z = jax.nn.relu(convT(z, params["w1"], params["b1"], 2))
    z = jax.nn.relu(convT(z, params["w2"], params["b2"], 2))
    z = jax.nn.sigmoid(convT(z, params["w3"], params["b3"], 2))
    H, W = z.shape[2], z.shape[3]
    oh, ow = output_size
    src_h = np.floor(np.arange(oh) * (H / oh)).astype(np.int32)
    src_w = np.floor(np.arange(ow) * (W / ow)).astype(np.int32)
    return z[:, :, src_h][:, :, :, src_w]


# --------------------------- main ---------------------------------------------

if __name__ == "__main__":
    B, FEAT, OUT_C = 2, 32, 3
    OUTPUT_SIZE = (16, 16)

    key = jax.random.PRNGKey(0)
    ks = jax.random.split(key, 9)
    s = 0.05
    params = {
        "wfc": jax.random.normal(ks[0], (FEAT, 256), jnp.float32) * s,
        "bfc": jax.random.normal(ks[1], (256,), jnp.float32) * s,
        "w1": jax.random.normal(ks[2], (256, 128, 5, 5), jnp.float32) * s,
        "b1": jax.random.normal(ks[3], (128,), jnp.float32) * s,
        "w2": jax.random.normal(ks[4], (128, 64, 5, 5), jnp.float32) * s,
        "b2": jax.random.normal(ks[5], (64,), jnp.float32) * s,
        "w3": jax.random.normal(ks[6], (64, OUT_C, 6, 6), jnp.float32) * s,
        "b3": jax.random.normal(ks[7], (OUT_C,), jnp.float32) * s,
    }
    x = jax.random.normal(ks[8], (B, FEAT), jnp.float32)

    pp = prepare_params(params, OUT_C)            # one-time weight prep (hoisted)
    fwd = jax.jit(observation_decoder_forward,
                  static_argnames=("output_size", "out_channels"))

    out = jax.block_until_ready(
        fwd(x, pp, output_size=OUTPUT_SIZE, out_channels=OUT_C))
    ref = jax.block_until_ready(reference_forward(x, params, OUTPUT_SIZE))

    assert out.shape == (B, OUT_C) + OUTPUT_SIZE, out.shape
    np.testing.assert_allclose(np.asarray(out), np.asarray(ref),
                               rtol=2e-3, atol=2e-3)
    print("KERNEL_OK")
</pallas_src>

<mosaic_0001>
module attributes {stable_mosaic.version = 11 : i64} {
  func.func @fc_deconv1_kernel(%arg0: memref<2x32xf32, #tpu.memory_space<vmem>>, %arg1: memref<32x256xbf16, #tpu.memory_space<vmem>>, %arg2: memref<1x256xf32, #tpu.memory_space<vmem>>, %arg3: memref<256x3200xbf16, #tpu.memory_space<vmem>>, %arg4: memref<1x3200xf32, #tpu.memory_space<vmem>>, %arg5: memref<2x3200xbf16, #tpu.memory_space<vmem>>) attributes {dimension_semantics = [], scalar_prefetch = 0 : i64, scratch_operands = 0 : i64, tpu.core_type = #tpu.core_type<tc>} {
    %c0 = arith.constant 0 : index
    %c0_0 = arith.constant 0 : index
    %0 = vector.load %arg0[%c0, %c0_0] : memref<2x32xf32, #tpu.memory_space<vmem>>, vector<2x32xf32>
    %1 = arith.truncf %0 : vector<2x32xf32> to vector<2x32xbf16>
    %c0_1 = arith.constant 0 : index
    %c0_2 = arith.constant 0 : index
    %2 = vector.load %arg1[%c0_1, %c0_2] : memref<32x256xbf16, #tpu.memory_space<vmem>>, vector<32x256xbf16>
    %cst = arith.constant dense<0.000000e+00> : vector<2x256xf32>
    %3 = tpu.matmul %1, %2, %cst {dimension_numbers = #tpu.dot_dimension_numbers<[1], [0], [0], [1], [0, 0, 1, 1], [], []>} : vector<2x32xbf16>, vector<32x256xbf16>, vector<2x256xf32> -> vector<2x256xf32>
    %c0_3 = arith.constant 0 : index
    %c0_4 = arith.constant 0 : index
    %4 = vector.load %arg2[%c0_3, %c0_4] : memref<1x256xf32, #tpu.memory_space<vmem>>, vector<1x256xf32>
    %5 = vector.broadcast %4 : vector<1x256xf32> to vector<2x256xf32>
    %6 = arith.addf %3, %5 : vector<2x256xf32>
    %7 = arith.truncf %6 : vector<2x256xf32> to vector<2x256xbf16>
    %c0_5 = arith.constant 0 : index
    %c0_6 = arith.constant 0 : index
    %8 = vector.load %arg3[%c0_5, %c0_6] : memref<256x3200xbf16, #tpu.memory_space<vmem>>, vector<256x3200xbf16>
    %cst_7 = arith.constant dense<0.000000e+00> : vector<2x3200xf32>
    %9 = tpu.matmul %7, %8, %cst_7 {dimension_numbers = #tpu.dot_dimension_numbers<[1], [0], [0], [1], [0, 0, 1, 1], [], []>} : vector<2x256xbf16>, vector<256x3200xbf16>, vector<2x3200xf32> -> vector<2x3200xf32>
    %c0_8 = arith.constant 0 : index
    %c0_9 = arith.constant 0 : index
    %10 = vector.load %arg4[%c0_8, %c0_9] : memref<1x3200xf32, #tpu.memory_space<vmem>>, vector<1x3200xf32>
    %11 = vector.broadcast %10 : vector<1x3200xf32> to vector<2x3200xf32>
    %12 = arith.addf %9, %11 : vector<2x3200xf32>
    %cst_10 = arith.constant 0.000000e+00 : f32
    %13 = vector.broadcast %cst_10 : f32 to vector<2x3200xf32>
    %14 = arith.maximumf %12, %13 : vector<2x3200xf32>
    %15 = arith.truncf %14 : vector<2x3200xf32> to vector<2x3200xbf16>
    %c0_11 = arith.constant 0 : index
    %c0_12 = arith.constant 0 : index
    %16 = vector.load %arg5[%c0_11, %c0_12] : memref<2x3200xbf16, #tpu.memory_space<vmem>>, vector<2x3200xbf16>
    tpu.vector_store %arg5[%c0_11, %c0_12], %15 {strides = array<i32>} : memref<2x3200xbf16, #tpu.memory_space<vmem>>, vector<2x3200xbf16>,
    return
  }
}

module attributes {stable_mosaic.version = 11 : i64} {
  func.func @deconv_phase_kernel(%arg0: i32, %arg1: memref<288x384xbf16, #tpu.memory_space<vmem>>, %arg2: memref<3x384x256xbf16, #tpu.memory_space<vmem>>, %arg3: memref<1x256xf32, #tpu.memory_space<vmem>>, %arg4: memref<128x256xbf16, #tpu.memory_space<vmem>>) attributes {dimension_semantics = [#tpu.dimension_semantics<parallel>], iteration_bounds = array<i64: 2>, scalar_prefetch = 0 : i64, scratch_operands = 0 : i64, tpu.core_type = #tpu.core_type<tc>, window_params = [{pipeline_mode = #tpu.pipeline_mode<synchronous>, transform_indices = @transform_0, window_bounds = array<i64: 288, 384>}, {pipeline_mode = #tpu.pipeline_mode<synchronous>, transform_indices = @transform_1, window_bounds = array<i64: 3, 384, 256>}, {pipeline_mode = #tpu.pipeline_mode<synchronous>, transform_indices = @transform_2, window_bounds = array<i64: 1, 256>}, {transform_indices = @transform_3, window_bounds = array<i64: 128, 256>}]} {
    %c128_i32 = arith.constant 128 : i32
    %0 = arith.muli %arg0, %c128_i32 : i32
    %c0_i32 = arith.constant 0 : i32
    %1 = arith.addi %0, %c0_i32 : i32
    %2 = tpu.assume_multiple %1, 16 : i32
    %3 = arith.index_cast %2 : i32 to index
    %c0 = arith.constant 0 : index
    %4 = vector.load %arg1[%3, %c0] : memref<288x384xbf16, #tpu.memory_space<vmem>>, vector<128x384xbf16>
    %c0_0 = arith.constant 0 : index
    %c0_1 = arith.constant 0 : index
    %c0_2 = arith.constant 0 : index
    %5 = vector.load %arg2[%c0_0, %c0_1, %c0_2] : memref<3x384x256xbf16, #tpu.memory_space<vmem>>, vector<1x384x256xbf16>
    %6 = vector.shape_cast %5 : vector<1x384x256xbf16> to vector<384x256xbf16>
    %cst = arith.constant dense<0.000000e+00> : vector<128x256xf32>
    %7 = tpu.matmul %4, %6, %cst {dimension_numbers = #tpu.dot_dimension_numbers<[1], [0], [0], [1], [0, 0, 1, 1], [], []>} : vector<128x384xbf16>, vector<384x256xbf16>, vector<128x256xf32> -> vector<128x256xf32>
    %c16_i32 = arith.constant 16 : i32
    %8 = arith.addi %0, %c16_i32 : i32
    %9 = tpu.assume_multiple %8, 16 : i32
    %10 = arith.index_cast %9 : i32 to index
    %c0_3 = arith.constant 0 : index
    %11 = vector.load %arg1[%10, %c0_3] : memref<288x384xbf16, #tpu.memory_space<vmem>>, vector<128x384xbf16>
    %c1 = arith.constant 1 : index
    %c0_4 = arith.constant 0 : index
    %c0_5 = arith.constant 0 : index
    %12 = vector.load %arg2[%c1, %c0_4, %c0_5] : memref<3x384x256xbf16, #tpu.memory_space<vmem>>, vector<1x384x256xbf16>
    %13 = vector.shape_cast %12 : vector<1x384x256xbf16> to vector<384x256xbf16>
    %cst_6 = arith.constant dense<0.000000e+00> : vector<128x256xf32>
    %14 = tpu.matmul %11, %13, %cst_6 {dimension_numbers = #tpu.dot_dimension_numbers<[1], [0], [0], [1], [0, 0, 1, 1], [], []>} : vector<128x384xbf16>, vector<384x256xbf16>, vector<128x256xf32> -> vector<128x256xf32>
    %15 = arith.addf %7, %14 : vector<128x256xf32>
    %c32_i32 = arith.constant 32 : i32
    %16 = arith.addi %0, %c32_i32 : i32
    %17 = tpu.assume_multiple %16, 16 : i32
    %18 = arith.index_cast %17 : i32 to index
    %c0_7 = arith.constant 0 : index
    %19 = vector.load %arg1[%18, %c0_7] : memref<288x384xbf16, #tpu.memory_space<vmem>>, vector<128x384xbf16>
    %c2 = arith.constant 2 : index
    %c0_8 = arith.constant 0 : index
    %c0_9 = arith.constant 0 : index
    %20 = vector.load %arg2[%c2, %c0_8, %c0_9] : memref<3x384x256xbf16, #tpu.memory_space<vmem>>, vector<1x384x256xbf16>
    %21 = vector.shape_cast %20 : vector<1x384x256xbf16> to vector<384x256xbf16>
    %cst_10 = arith.constant dense<0.000000e+00> : vector<128x256xf32>
    %22 = tpu.matmul %19, %21, %cst_10 {dimension_numbers = #tpu.dot_dimension_numbers<[1], [0], [0], [1], [0, 0, 1, 1], [], []>} : vector<128x384xbf16>, vector<384x256xbf16>, vector<128x256xf32> -> vector<128x256xf32>
    %23 = arith.addf %15, %22 : vector<128x256xf32>
    %c0_11 = arith.constant 0 : index
    %c0_12 = arith.constant 0 : index
    %24 = vector.load %arg3[%c0_11, %c0_12] : memref<1x256xf32, #tpu.memory_space<vmem>>, vector<1x256xf32>
    %25 = vector.broadcast %24 : vector<1x256xf32> to vector<128x256xf32>
    %26 = arith.addf %23, %25 : vector<128x256xf32>
    %cst_13 = arith.constant 0.000000e+00 : f32
    %27 = vector.broadcast %cst_13 : f32 to vector<128x256xf32>
    %28 = arith.maximumf %26, %27 : vector<128x256xf32>
    %29 = arith.truncf %28 : vector<128x256xf32> to vector<128x256xbf16>
    %c0_14 = arith.constant 0 : index
    %c0_15 = arith.constant 0 : index
    %30 = vector.load %arg4[%c0_14, %c0_15] : memref<128x256xbf16, #tpu.memory_space<vmem>>, vector<128x256xbf16>
    tpu.vector_store %arg4[%c0_14, %c0_15], %29 {strides = array<i32>} : memref<128x256xbf16, #tpu.memory_space<vmem>>, vector<128x256xbf16>,
    return
  }
  func.func @transform_0(%arg0: i32) -> (i32, i32) {
    %c0_i32 = arith.constant 0 : i32
    %c0_i32_0 = arith.constant 0 : i32
    %c0_i32_1 = arith.constant 0 : i32
    return %c0_i32, %c0_i32_0 : i32, i32
  }
  func.func @transform_1(%arg0: i32) -> (i32, i32, i32) {
    %c0_i32 = arith.constant 0 : i32
    %c0_i32_0 = arith.constant 0 : i32
    %c0_i32_1 = arith.constant 0 : i32
    %c0_i32_2 = arith.constant 0 : i32
    return %c0_i32, %c0_i32_0, %c0_i32_1 : i32, i32, i32
  }
  func.func @transform_2(%arg0: i32) -> (i32, i32) {
    %c0_i32 = arith.constant 0 : i32
    %c0_i32_0 = arith.constant 0 : i32
    %c0_i32_1 = arith.constant 0 : i32
    return %c0_i32, %c0_i32_0 : i32, i32
  }
  func.func @transform_3(%arg0: i32) -> (i32, i32) {
    %c0_i32 = arith.constant 0 : i32
    %c0_i32_0 = arith.constant 0 : i32
    return %arg0, %c0_i32 : i32, i32
  }
}

module attributes {stable_mosaic.version = 11 : i64} {
  func.func @deconv_phase_kernel(%arg0: i32, %arg1: memref<1088x192xbf16, #tpu.memory_space<vmem>>, %arg2: memref<3x192x128xbf16, #tpu.memory_space<vmem>>, %arg3: memref<1x128xf32, #tpu.memory_space<vmem>>, %arg4: memref<256x128xf32, #tpu.memory_space<vmem>>) attributes {dimension_semantics = [#tpu.dimension_semantics<parallel>], iteration_bounds = array<i64: 4>, scalar_prefetch = 0 : i64, scratch_operands = 0 : i64, tpu.core_type = #tpu.core_type<tc>, window_params = [{pipeline_mode = #tpu.pipeline_mode<synchronous>, transform_indices = @transform_0, window_bounds = array<i64: 1088, 192>}, {pipeline_mode = #tpu.pipeline_mode<synchronous>, transform_indices = @transform_1, window_bounds = array<i64: 3, 192, 128>}, {pipeline_mode = #tpu.pipeline_mode<synchronous>, transform_indices = @transform_2, window_bounds = array<i64: 1, 128>}, {transform_indices = @transform_3, window_bounds = array<i64: 256, 128>}]} {
    %c256_i32 = arith.constant 256 : i32
    %0 = arith.muli %arg0, %c256_i32 : i32
    %c0_i32 = arith.constant 0 : i32
    %1 = arith.addi %0, %c0_i32 : i32
    %2 = tpu.assume_multiple %1, 16 : i32
    %3 = arith.index_cast %2 : i32 to index
    %c0 = arith.constant 0 : index
    %4 = vector.load %arg1[%3, %c0] : memref<1088x192xbf16, #tpu.memory_space<vmem>>, vector<256x192xbf16>
    %c0_0 = arith.constant 0 : index
    %c0_1 = arith.constant 0 : index
    %c0_2 = arith.constant 0 : index
    %5 = vector.load %arg2[%c0_0, %c0_1, %c0_2] : memref<3x192x128xbf16, #tpu.memory_space<vmem>>, vector<1x192x128xbf16>
    %6 = vector.shape_cast %5 : vector<1x192x128xbf16> to vector<192x128xbf16>
    %cst = arith.constant dense<0.000000e+00> : vector<256x128xf32>
    %7 = tpu.matmul %4, %6, %cst {dimension_numbers = #tpu.dot_dimension_numbers<[1], [0], [0], [1], [0, 0, 1, 1], [], []>} : vector<256x192xbf16>, vector<192x128xbf16>, vector<256x128xf32> -> vector<256x128xf32>
    %c32_i32 = arith.constant 32 : i32
    %8 = arith.addi %0, %c32_i32 : i32
    %9 = tpu.assume_multiple %8, 16 : i32
    %10 = arith.index_cast %9 : i32 to index
    %c0_3 = arith.constant 0 : index
    %11 = vector.load %arg1[%10, %c0_3] : memref<1088x192xbf16, #tpu.memory_space<vmem>>, vector<256x192xbf16>
    %c1 = arith.constant 1 : index
    %c0_4 = arith.constant 0 : index
    %c0_5 = arith.constant 0 : index
    %12 = vector.load %arg2[%c1, %c0_4, %c0_5] : memref<3x192x128xbf16, #tpu.memory_space<vmem>>, vector<1x192x128xbf16>
    %13 = vector.shape_cast %12 : vector<1x192x128xbf16> to vector<192x128xbf16>
    %cst_6 = arith.constant dense<0.000000e+00> : vector<256x128xf32>
    %14 = tpu.matmul %11, %13, %cst_6 {dimension_numbers = #tpu.dot_dimension_numbers<[1], [0], [0], [1], [0, 0, 1, 1], [], []>} : vector<256x192xbf16>, vector<192x128xbf16>, vector<256x128xf32> -> vector<256x128xf32>
    %15 = arith.addf %7, %14 : vector<256x128xf32>
    %c64_i32 = arith.constant 64 : i32
    %16 = arith.addi %0, %c64_i32 : i32
    %17 = tpu.assume_multiple %16, 16 : i32
    %18 = arith.index_cast %17 : i32 to index
    %c0_7 = arith.constant 0 : index
    %19 = vector.load %arg1[%18, %c0_7] : memref<1088x192xbf16, #tpu.memory_space<vmem>>, vector<256x192xbf16>
    %c2 = arith.constant 2 : index
    %c0_8 = arith.constant 0 : index
    %c0_9 = arith.constant 0 : index
    %20 = vector.load %arg2[%c2, %c0_8, %c0_9] : memref<3x192x128xbf16, #tpu.memory_space<vmem>>, vector<1x192x128xbf16>
    %21 = vector.shape_cast %20 : vector<1x192x128xbf16> to vector<192x128xbf16>
    %cst_10 = arith.constant dense<0.000000e+00> : vector<256x128xf32>
    %22 = tpu.matmul %19, %21, %cst_10 {dimension_numbers = #tpu.dot_dimension_numbers<[1], [0], [0], [1], [0, 0, 1, 1], [], []>} : vector<256x192xbf16>, vector<192x128xbf16>, vector<256x128xf32> -> vector<256x128xf32>
    %23 = arith.addf %15, %22 : vector<256x128xf32>
    %c0_11 = arith.constant 0 : index
    %c0_12 = arith.constant 0 : index
    %24 = vector.load %arg3[%c0_11, %c0_12] : memref<1x128xf32, #tpu.memory_space<vmem>>, vector<1x128xf32>
    %25 = vector.broadcast %24 : vector<1x128xf32> to vector<256x128xf32>
    %26 = arith.addf %23, %25 : vector<256x128xf32>
    %27 = arith.negf %26 : vector<256x128xf32>
    %28 = math.exp %27 : vector<256x128xf32>
    %cst_13 = arith.constant 1.000000e+00 : f32
    %29 = vector.broadcast %cst_13 : f32 to vector<256x128xf32>
    %30 = arith.addf %29, %28 : vector<256x128xf32>
    %31 = arith.divf %29, %30 : vector<256x128xf32>
    %c0_14 = arith.constant 0 : index
    %c0_15 = arith.constant 0 : index
    %32 = vector.load %arg4[%c0_14, %c0_15] : memref<256x128xf32, #tpu.memory_space<vmem>>, vector<256x128xf32>
    tpu.vector_store %arg4[%c0_14, %c0_15], %31 {strides = array<i32>} : memref<256x128xf32, #tpu.memory_space<vmem>>, vector<256x128xf32>,
    return
  }
  func.func @transform_0(%arg0: i32) -> (i32, i32) {
    %c0_i32 = arith.constant 0 : i32
    %c0_i32_0 = arith.constant 0 : i32
    %c0_i32_1 = arith.constant 0 : i32
    return %c0_i32, %c0_i32_0 : i32, i32
  }
  func.func @transform_1(%arg0: i32) -> (i32, i32, i32) {
    %c0_i32 = arith.constant 0 : i32
    %c0_i32_0 = arith.constant 0 : i32
    %c0_i32_1 = arith.constant 0 : i32
    %c0_i32_2 = arith.constant 0 : i32
    return %c0_i32, %c0_i32_0, %c0_i32_1 : i32, i32, i32
  }
  func.func @transform_2(%arg0: i32) -> (i32, i32) {
    %c0_i32 = arith.constant 0 : i32
    %c0_i32_0 = arith.constant 0 : i32
    %c0_i32_1 = arith.constant 0 : i32
    return %c0_i32, %c0_i32_0 : i32, i32
  }
  func.func @transform_3(%arg0: i32) -> (i32, i32) {
    %c0_i32 = arith.constant 0 : i32
    %c0_i32_0 = arith.constant 0 : i32
    return %arg0, %c0_i32 : i32, i32
  }
}

</mosaic_0001>

<bundles_post_ra>
// kernel: observation_decoder_forward.4
= control target key start
LH: loop header
LB: loop body
LE: loop exit
PB: predicated region body
PF: predicated region fallthrough
CT: control target
= control target key end

     0   :  { %s3356_s12 = smov 0   ;;  %s4197_s0 = inlined_call_operand.vmem [shape: bf16[288,384], index: 0, kind: input, shape index: {}]   ;;  %s4198_s1 = inlined_call_operand.vmem [shape: bf16[3,384,256], index: 1, kind: input, shape index: {}]   ;;  %s4199_s2 = inlined_call_operand.vmem [shape: f32[1,256], index: 2, kind: input, shape index: {}]   ;;  %s4200_s3 = inlined_call_operand.vmem [shape: bf16[256,256], index: 3, kind: output, shape index: {}]  }
   0x1 LB: > { %s2469_s13 = sadd.s32 4294967295, %s3333_s12   ;;  %p2472_p0 = scmp.ge.s32.totalorder %s3333_s12, 1  ;;  %s3333_s12 = sphi %s3356_s12, %s13_s12  }
   0x2   : > { %p127_p1 = scmp.lt.s32.totalorder %s3333_s12, 3 }
   0x4   : > { %p128_p2 = pnand %p2472_p0, %p127_p1 }
   0x5   : > { %v3015_v0 = vld [vmem:[%s4198_s1 + $0x184] ss:$8 sps:$4 sm:$0xff] (!%p128_p2)   ;;  %v3335_v2 = vmov (!%p128_p2), 0   ;;  %v3019_v3 = vld [vmem:[%s4198_s1 + $0x180] ss:$8 sps:$4 sm:$0xff] (!%p128_p2)   ;;  %s3406_s15 = sshll.u32 (!%p128_p2), %s2469_s13, 7 }
   0x6   : > { %131 = sbr.rel (%p128_p2) target bundleno = 463 (0x1cf), region = 32  ;;  %v3017_v1 = vld [vmem:[%s4198_s1 + $0x284] ss:$8 sps:$4 sm:$0xff] (!%p128_p2)   ;;  %841 = vmatprep.mubr.bf16.mxu0 (!%p128_p2), %v3335_v2  ;;  %696 = vmatprep.subr.bf16.mxu1 (!%p128_p2), %v3015_v0  ;;  %v3020_v4 = vld [vmem:[%s4198_s1 + $0x280] ss:$8 sps:$4 sm:$0xff] (!%p128_p2)   ;;  %s241_s20 = sadd.s32 (!%p128_p2), 16, %s3406_s15 }
   0x7   : > { %809 = vmatprep.subr.bf16.mxu0 (!%p128_p2), %v3017_v1  ;;  %v3021_v5 = vld [vmem:[%s4198_s1 + $0x194] ss:$8 sps:$4 sm:$0xff] (!%p128_p2)   ;;  %697 = vmatpush1.bf16.msra.mxu1 (!%p128_p2), %v3019_v3  ;;  %v3025_v7 = vld [vmem:[%s4198_s1 + $0x190] ss:$8 sps:$4 sm:$0xff] (!%p128_p2)   ;;  %v3027_v9 = vld [vmem:[%s4198_s1 + $0x1a4] ss:$8 sps:$4 sm:$0xff] (!%p128_p2)  }
   0x8   : > { %810 = vmatpush1.bf16.msra.mxu0 (!%p128_p2), %v3020_v4  ;;  %v3023_v6 = vld [vmem:[%s4198_s1 + $0x294] ss:$8 sps:$4 sm:$0xff] (!%p128_p2)   ;;  %698 = vmatprep.subr.bf16.mxu1 (!%p128_p2), %v3021_v5  ;;  %v3026_v8 = vld [vmem:[%s4198_s1 + $0x290] ss:$8 sps:$4 sm:$0xff] (!%p128_p2)   ;;  %v3029_v10 = vld [vmem:[%s4198_s1 + $0x2a4] ss:$8 sps:$4 sm:$0xff] (!%p128_p2)  }
   0x9   : > { %811 = vmatprep.subr.bf16.mxu0 (!%p128_p2), %v3023_v6  ;;  %v3031_v11 = vld [vmem:[%s4198_s1 + $0x1a0] ss:$8 sps:$4 sm:$0xff] (!%p128_p2)   ;;  %v3033_v13 = vld [vmem:[%s4198_s1 + $0x1b4] ss:$8 sps:$4 sm:$0xff] (!%p128_p2)   ;;  %v3037_v15 = vld [vmem:[%s4198_s1 + $0x1b0] ss:$8 sps:$4 sm:$0xff] (!%p128_p2)  }
   0xa   : > { %v3032_v12 = vld [vmem:[%s4198_s1 + $0x2a0] ss:$8 sps:$4 sm:$0xff] (!%p128_p2)   ;;  %v3035_v14 = vld [vmem:[%s4198_s1 + $0x2b4] ss:$8 sps:$4 sm:$0xff] (!%p128_p2)   ;;  %v3038_v16 = vld [vmem:[%s4198_s1 + $0x2b0] ss:$8 sps:$4 sm:$0xff] (!%p128_p2)  }
   0xb   : > { %699 = vmatpush1.bf16.msra.mxu1 (!%p128_p2), %v3025_v7  ;;  %v3039_v17 = vld [vmem:[%s4198_s1 + $0x1c4] ss:$8 sps:$4 sm:$0xff] (!%p128_p2)   ;;  %s242_s27 = sshra.s32 (!%p128_p2), %s241_s20, 3  ;;  %v3043_v19 = vld [vmem:[%s4198_s1 + $0x1c0] ss:$8 sps:$4 sm:$0xff] (!%p128_p2)   ;;  %s1516_s18 = sadd.s32 (!%p128_p2), 32, %s3406_s15 }
   0xc   : > { %812 = vmatpush1.bf16.msra.mxu0 (!%p128_p2), %v3026_v8  ;;  %700 = vmatprep.subr.bf16.mxu1 (!%p128_p2), %v3027_v9  ;;  %v3041_v18 = vld [vmem:[%s4198_s1 + $0x2c4] ss:$8 sps:$4 sm:$0xff] (!%p128_p2)   ;;  %v3044_v20 = vld [vmem:[%s4198_s1 + $0x2c0] ss:$8 sps:$4 sm:$0xff] (!%p128_p2)   ;;  %v3045_v21 = vld [vmem:[%s4198_s1 + $0x1d4] ss:$8 sps:$4 sm:$0xff] (!%p128_p2)  }
   0xd   : > { %813 = vmatprep.subr.bf16.mxu0 %v3029_v10  ;;  %v3047_v22 = vld [vmem:[%s4198_s1 + $0x2d4] ss:$8 sps:$4 sm:$0xff]   ;;  %s2812_s9 = smul.u32 12, %s242_s27  ;;  %v3049_v23 = vld [vmem:[%s4198_s1 + $0x1d0] ss:$8 sps:$4 sm:$0xff]   ;;  %s156_s27 = sshra.s32 %s3406_s15, 3 }
   0xe   : > { %v3050_v24 = vld [vmem:[%s4198_s1 + $0x2d0] ss:$8 sps:$4 sm:$0xff]   ;;  %v3051_v25 = vld [vmem:[%s4198_s1 + $0x1e4] ss:$8 sps:$4 sm:$0xff]   ;;  %v3055_v27 = vld [vmem:[%s4198_s1 + $0x1e0] ss:$8 sps:$4 sm:$0xff]  }
   0xf   : > { %701 = vmatpush1.bf16.msra.mxu1 %v3031_v11  ;;  %v3053_v26 = vld [vmem:[%s4198_s1 + $0x2e4] ss:$8 sps:$4 sm:$0xff]   ;;  %s3451_s23 = scalar_lea.vmem %s4197_s0, %s2812_s9  ;;  %v3056_v28 = vld [vmem:[%s4198_s1 + $0x2e0] ss:$8 sps:$4 sm:$0xff]   ;;  %v3057_v29 = vld [vmem:[%s4198_s1 + $0x1f4] ss:$8 sps:$4 sm:$0xff]  }
  0x10   : > { %814 = vmatpush1.bf16.msra.mxu0 %v3032_v12  ;;  %702 = vmatprep.subr.bf16.mxu1 %v3033_v13  ;;  %v3059_v30 = vld [vmem:[%s4198_s1 + $0x2f4] ss:$8 sps:$4 sm:$0xff]   ;;  %v3061_v31 = vld [vmem:[%s4198_s1 + $0x1f0] ss:$8 sps:$4 sm:$0xff]   ;;  %v3063_v33 = vld [vmem:[%s4198_s1 + $0x204] ss:$8 sps:$4 sm:$0xff]  }
  0x11   : > { %815 = vmatprep.subr.bf16.mxu0 %v3035_v14  ;;  %v3062_v32 = vld [vmem:[%s4198_s1 + $0x2f0] ss:$8 sps:$4 sm:$0xff]   ;;  %v3068_v34 = vld [vmem:[%s4198_s1 + $0x104] ss:$8 sps:$4 sm:$0xff]   ;;  %v3065_v35 = vld [vmem:[%s3451_s23 + $0x8] ss:$12 sps:$4 sm:$0xff]  }
  0x12   : > { %v3066_v36 = vld [vmem:[%s4198_s1 + $0x100] ss:$8 sps:$4 sm:$0xff]   ;;  %v3070_v38 = vld [vmem:[%s4198_s1 + $0x214] ss:$8 sps:$4 sm:$0xff]   ;;  %v3072_v39 = vld [vmem:[%s4198_s1 + $0x210] ss:$8 sps:$4 sm:$0xff]  }
  0x13   : > { %703 = vmatpush1.bf16.msra.mxu1 %v3037_v15  ;;  %v3069_v37 = vld [vmem:[%s4198_s1 + $0x200] ss:$8 sps:$4 sm:$0xff]   ;;  %v3078_v40 = vld [vmem:[%s4198_s1 + $0x114] ss:$8 sps:$4 sm:$0xff]   ;;  %v3073_v41 = vld [vmem:[%s4198_s1 + $0x224] ss:$8 sps:$4 sm:$0xff]  }
  0x14   : > { %816 = vmatpush1.bf16.msra.mxu0 %v3038_v16  ;;  %704 = vmatprep.subr.bf16.mxu1 %v3039_v17  ;;  %v3076_v42 = vld [vmem:[%s4198_s1 + $0x110] ss:$8 sps:$4 sm:$0xff]   ;;  %v3088_v43 = vld [vmem:[%s4198_s1 + $0x124] ss:$8 sps:$4 sm:$0xff]   ;;  %v3079_v45 = vld [vmem:[%s4198_s1 + $0x220] ss:$8 sps:$4 sm:$0xff]  }
  0x15   : > { %817 = vmatprep.subr.bf16.mxu0 %v3041_v18  ;;  %v3075_v44 = vld [vmem:[%s3451_s23 + $0x20] ss:$12 sps:$4 sm:$0xff]   ;;  %v3080_v46 = vld [vmem:[%s4198_s1 + $0x234] ss:$8 sps:$4 sm:$0xff]   ;;  %v3105_v49 = vld [vmem:[%s3451_s23 + $0x4] ss:$12 sps:$4 sm:$0xff]  }
  0x16   : > { %v3086_v47 = vld [vmem:[%s4198_s1 + $0x120] ss:$8 sps:$4 sm:$0xff]   ;;  %v3098_v48 = vld [vmem:[%s4198_s1 + $0x134] ss:$8 sps:$4 sm:$0xff]   ;;  %v3082_v50 = vld [vmem:[%s4198_s1 + $0x230] ss:$8 sps:$4 sm:$0xff]   ;;  %728 = vmatprep.mubr.bf16.mxu1 %v3105_v49 }
  0x17   : > { %705 = vmatpush1.bf16.msra.mxu1 %v3043_v19  ;;  %v3083_v51 = vld [vmem:[%s4198_s1 + $0x244] ss:$8 sps:$4 sm:$0xff]   ;;  %v3096_v52 = vld [vmem:[%s4198_s1 + $0x130] ss:$8 sps:$4 sm:$0xff]   ;;  %v3089_v55 = vld [vmem:[%s4198_s1 + $0x240] ss:$8 sps:$4 sm:$0xff]  }
  0x18   : > { %818 = vmatpush1.bf16.msra.mxu0 %v3044_v20  ;;  %706 = vmatprep.subr.bf16.mxu1 %v3045_v21  ;;  %v3112_v53 = vld [vmem:[%s4198_s1 + $0x144] ss:$8 sps:$4 sm:$0xff]   ;;  %v3090_v56 = vld [vmem:[%s4198_s1 + $0x254] ss:$8 sps:$4 sm:$0xff]   ;;  %v3110_v57 = vld [vmem:[%s4198_s1 + $0x140] ss:$8 sps:$4 sm:$0xff]  }
  0x19   : > { %819 = vmatprep.subr.bf16.mxu0 %v3047_v22  ;;  %v3085_v54 = vld [vmem:[%s3451_s23 + $0x38] ss:$12 sps:$4 sm:$0xff]   ;;  %v3125_v59 = vld [vmem:[%s4198_s1 + $0x154] ss:$8 sps:$4 sm:$0xff]   ;;  %v3099_v63 = vld [vmem:[%s4198_s1 + $0x260] ss:$8 sps:$4 sm:$0xff]  }
  0x1a   : > { %v3092_v58 = vld [vmem:[%s4198_s1 + $0x250] ss:$8 sps:$4 sm:$0xff]   ;;  %v3093_v60 = vld [vmem:[%s4198_s1 + $0x264] ss:$8 sps:$4 sm:$0xff]   ;;  %v3100_v0 = vld [vmem:[%s4198_s1 + $0x274] ss:$8 sps:$4 sm:$0xff]  }
  0x1b   : > { %707 = vmatpush1.bf16.msra.mxu1 %v3049_v23  ;;  %v3123_v61 = vld [vmem:[%s4198_s1 + $0x150] ss:$8 sps:$4 sm:$0xff]   ;;  %v3136_v1 = vld [vmem:[%s4198_s1 + $0x160] ss:$8 sps:$4 sm:$0xff]   ;;  %v3138_v3 = vld [vmem:[%s4198_s1 + $0x164] ss:$8 sps:$4 sm:$0xff]  }
  0x1c   : > { %820 = vmatpush1.bf16.msra.mxu0 %v3050_v24  ;;  %708 = vmatprep.subr.bf16.mxu1 %v3051_v25  ;;  %v3095_v62 = vld [vmem:[%s3451_s23 + $0x50] ss:$12 sps:$4 sm:$0xff]   ;;  %v3109_v5 = vld [vmem:[%s4198_s1 + $0x4] ss:$8 sps:$4 sm:$0xff]   ;;  %v3106_v7 = vld [vmem:[%s3451_s23 + $0x68] ss:$12 sps:$4 sm:$0xff]  }
  0x1d   : > { %821 = vmatprep.subr.bf16.mxu0 %v3053_v26  ;;  %v3102_v4 = vld [vmem:[%s4198_s1 + $0x270] ss:$8 sps:$4 sm:$0xff]   ;;  %v3103_v6 = vld [vmem:[%s3451_s23] ss:$12 sps:$4 sm:$0xff]   ;;  %s2811_s5 = smul.u32 12, %s156_s27  ;;  %s1517_s26 = sshra.s32 %s1516_s18, 3 }
  0x1e   : > { %v3107_v8 = vld [vmem:[%s4198_s1] ss:$8 sps:$4 sm:$0xff]   ;;  %v3115_v10 = vld [vmem:[%s4198_s1 + $0x14] ss:$8 sps:$4 sm:$0xff]   ;;  %v3149_v12 = vld [vmem:[%s4198_s1 + $0x170] ss:$8 sps:$4 sm:$0xff]  }
  0x1f   : > { %709 = vmatpush1.bf16.msra.mxu1 %v3055_v27  ;;  %v3116_v9 = vld [vmem:[%s3451_s23 + $0x1c] ss:$12 sps:$4 sm:$0xff]   ;;  %s3592_s17 = scalar_lea.vmem %s4197_s0, %s2811_s5  ;;  %v3113_v13 = vld [vmem:[%s4198_s1 + $0x10] ss:$8 sps:$4 sm:$0xff]   ;;  %v3122_v14 = vld [vmem:[%s4198_s1 + $0x24] ss:$8 sps:$4 sm:$0xff]  }
  0x20   : > { %822 = vmatpush1.bf16.msra.mxu0 %v3056_v28  ;;  %710 = vmatprep.subr.bf16.mxu1 %v3057_v29  ;;  %v3151_v11 = vld [vmem:[%s4198_s1 + $0x174] ss:$8 sps:$4 sm:$0xff]   ;;  %v3118_v15 = vld [vmem:[%s3451_s23 + $0x18] ss:$12 sps:$4 sm:$0xff]   ;;  %v3119_v16 = vld [vmem:[%s3451_s23 + $0x80] ss:$12 sps:$4 sm:$0xff]  }
  0x21   : > { %823 = vmatprep.subr.bf16.mxu0 %v3059_v30  ;;  %v3164_v17 = vld [vmem:[%s4198_s1 + $0x304] ss:$8 sps:$4 sm:$0xff]   ;;  %v3120_v18 = vld [vmem:[%s4198_s1 + $0x20] ss:$8 sps:$4 sm:$0xff]   ;;  %v3128_v20 = vld [vmem:[%s4198_s1 + $0x34] ss:$8 sps:$4 sm:$0xff]  }
  0x22   : > { %v3129_v19 = vld [vmem:[%s3451_s23 + $0x34] ss:$12 sps:$4 sm:$0xff]   ;;  %v3126_v21 = vld [vmem:[%s4198_s1 + $0x30] ss:$8 sps:$4 sm:$0xff]   ;;  %v3135_v22 = vld [vmem:[%s4198_s1 + $0x44] ss:$8 sps:$4 sm:$0xff]  }
  0x23   : > { %711 = vmatpush1.bf16.msra.mxu1 %v3061_v31  ;;  %v3131_v23 = vld [vmem:[%s3451_s23 + $0x30] ss:$12 sps:$4 sm:$0xff]   ;;  %v3132_v24 = vld [vmem:[%s3451_s23 + $0x98] ss:$12 sps:$4 sm:$0xff]   ;;  %v3133_v25 = vld [vmem:[%s4198_s1 + $0x40] ss:$8 sps:$4 sm:$0xff]  }
  0x24   : > { %824 = vmatpush1.bf16.msra.mxu0 %v3062_v32  ;;  %712 = vmatprep.subr.bf16.mxu1 %v3063_v33  ;;  %v3142_v26 = vld [vmem:[%s3451_s23 + $0x4c] ss:$12 sps:$4 sm:$0xff]   ;;  %v3141_v27 = vld [vmem:[%s4198_s1 + $0x54] ss:$8 sps:$4 sm:$0xff]   ;;  %v3146_v32 = vld [vmem:[%s4198_s1 + $0x60] ss:$8 sps:$4 sm:$0xff]  }
  0x25   : > { %1403 = vmatprep.subr.bf16.mxu0 %v3068_v34  ;;  %v3139_v28 = vld [vmem:[%s4198_s1 + $0x50] ss:$8 sps:$4 sm:$0xff]   ;;  %v3148_v29 = vld [vmem:[%s4198_s1 + $0x64] ss:$8 sps:$4 sm:$0xff]   ;;  %v3144_v30 = vld [vmem:[%s3451_s23 + $0x48] ss:$12 sps:$4 sm:$0xff]  }
  0x26   : > { %v3145_v31 = vld [vmem:[%s3451_s23 + $0xb0] ss:$12 sps:$4 sm:$0xff]   ;;  %v3174_v49 = vld [vmem:[%s4198_s1 + $0xa0] ss:$8 sps:$4 sm:$0xff]   ;;  %s2813_s7 = smul.u32 12, %s1517_s26 }
  0x27   : > { %842 = vmatmul.mubr.bf16.vlgmr.msra.gmra.mrb[0].mxu0 %v3065_v35  ;;  %713 = vmatpush1.bf16.msra.mxu1 %v3069_v37  ;;  %v3155_v33 = vld [vmem:[%s3451_s23 + $0x64] ss:$12 sps:$4 sm:$0xff]   ;;  %v3154_v34 = vld [vmem:[%s4198_s1 + $0x74] ss:$8 sps:$4 sm:$0xff]   ;;  %v3157_v37 = vld [vmem:[%s3451_s23 + $0x60] ss:$12 sps:$4 sm:$0xff]  }
  0x28   : > { %1404 = vmatpush1.bf16.msra.mxu0 %v3066_v36  ;;  %714 = vmatprep.subr.bf16.mxu1 %v3070_v38  ;;  %v3152_v35 = vld [vmem:[%s4198_s1 + $0x70] ss:$8 sps:$4 sm:$0xff]   ;;  %v3160_v36 = vld [vmem:[%s4198_s1 + $0x84] ss:$8 sps:$4 sm:$0xff]   ;;  %v3158_v38 = vld [vmem:[%s4198_s1 + $0x80] ss:$8 sps:$4 sm:$0xff]   ;;  %s3755_s19 = scalar_lea.vmem %s4197_s0, %s2813_s7 }
  0x29   : > { %851 = vmatprep.mubr.bf16.mxu0 %v3335_v2  ;;  %1405 = vmatprep.subr.bf16.mxu0 %v3078_v40  ;;  %v3162_v40 = vld [vmem:[%s4198_s1 + $0x300] ss:$8 sps:$4 sm:$0xff]  }
  0x2b   : > { %715 = vmatpush1.bf16.msra.mxu1 %v3072_v39  ;;  %v3161_v39 = vld [vmem:[%s3592_s17 + $0x8] ss:$12 sps:$4 sm:$0xff]  }
  0x2c   : > { %1406 = vmatpush1.bf16.msra.mxu0 %v3076_v42  ;;  %716 = vmatprep.subr.bf16.mxu1 %v3073_v41  ;;  %v3167_v41 = vld [vmem:[%s4198_s1 + $0x94] ss:$8 sps:$4 sm:$0xff]  }
  0x2d   : > { %1407 = vmatprep.subr.bf16.mxu0 %v3088_v43  ;;  %v3170_v42 = vld [vmem:[%s4198_s1 + $0x314] ss:$8 sps:$4 sm:$0xff]  }
  0x2e   : > { %v3171_v43 = vld [vmem:[%s3451_s23 + $0x7c] ss:$12 sps:$4 sm:$0xff]  }
  0x2f   : > { %852 = vmatmul.mubr.bf16.gmra.mrb[4].mxu0 %v3075_v44  ;;  %717 = vmatpush1.bf16.msra.mxu1 %v3079_v45  ;;  %v3165_v44 = vld [vmem:[%s4198_s1 + $0x90] ss:$8 sps:$4 sm:$0xff]  }
  0x30   : > { %861 = vmatprep.mubr.bf16.mxu0 %v3335_v2  ;;  %718 = vmatprep.subr.bf16.mxu1 %v3080_v46  ;;  %v3168_v45 = vld [vmem:[%s4198_s1 + $0x310] ss:$8 sps:$4 sm:$0xff]   ;;  %v3176_v46 = vld [vmem:[%s4198_s1 + $0xa4] ss:$8 sps:$4 sm:$0xff]  }
  0x31   : > { %1408 = vmatpush1.bf16.msra.mxu0 %v3086_v47  ;;  %v3180_v47 = vld [vmem:[%s4198_s1 + $0x324] ss:$8 sps:$4 sm:$0xff]  }
  0x32   : > { %1409 = vmatprep.subr.bf16.mxu0 %v3098_v48  ;;  %v3173_v48 = vld [vmem:[%s3451_s23 + $0x78] ss:$12 sps:$4 sm:$0xff]  }
  0x33   : > { %719 = vmatpush1.bf16.msra.mxu1 %v3082_v50  ;;  %v3177_v50 = vld [vmem:[%s3592_s17 + $0x20] ss:$12 sps:$4 sm:$0xff]  }
  0x34   : > { %720 = vmatprep.subr.bf16.mxu1 %v3083_v51  ;;  %v3178_v51 = vld [vmem:[%s4198_s1 + $0x320] ss:$8 sps:$4 sm:$0xff]  }
  0x35   : > { %1410 = vmatpush1.bf16.msra.mxu0 %v3096_v52  ;;  %v3183_v52 = vld [vmem:[%s4198_s1 + $0xb4] ss:$8 sps:$4 sm:$0xff]  }
  0x36   : > { %1411 = vmatprep.subr.bf16.mxu0 %v3112_v53  ;;  %v3186_v53 = vld [vmem:[%s4198_s1 + $0x334] ss:$8 sps:$4 sm:$0xff]  }
  0x37   : > { %862 = vmatmul.mubr.bf16.gmra.mrb[8].mxu0 %v3085_v54  ;;  %721 = vmatpush1.bf16.msra.mxu1 %v3089_v55  ;;  %v3187_v54 = vld [vmem:[%s3451_s23 + $0x94] ss:$12 sps:$4 sm:$0xff]   ;;  %v3181_v55 = vld [vmem:[%s4198_s1 + $0xb0] ss:$8 sps:$4 sm:$0xff]  }
  0x38   : > { %871 = vmatprep.mubr.bf16.mxu0 %v3335_v2  ;;  %722 = vmatprep.subr.bf16.mxu1 %v3090_v56  ;;  %v3184_v56 = vld [vmem:[%s4198_s1 + $0x330] ss:$8 sps:$4 sm:$0xff]  }
  0x39   : > { %1412 = vmatpush1.bf16.msra.mxu0 %v3110_v57  ;;  %v3189_v57 = vld [vmem:[%s3451_s23 + $0x90] ss:$12 sps:$4 sm:$0xff]  }
  0x3a   : > { %1413 = vmatprep.subr.bf16.mxu0 %v3125_v59  ;;  %v3196_v59 = vld [vmem:[%s4198_s1 + $0x344] ss:$8 sps:$4 sm:$0xff]  }
  0x3b   : > { %723 = vmatpush1.bf16.msra.mxu1 %v3092_v58  ;;  %v3192_v58 = vld [vmem:[%s4198_s1 + $0xc4] ss:$8 sps:$4 sm:$0xff]  }
  0x3c   : > { %724 = vmatprep.subr.bf16.mxu1 %v3093_v60  ;;  %v3190_v60 = vld [vmem:[%s4198_s1 + $0xc0] ss:$8 sps:$4 sm:$0xff]  }
  0x3d   : > { %1414 = vmatpush1.bf16.msra.mxu0 %v3123_v61  ;;  %v3193_v61 = vld [vmem:[%s3592_s17 + $0x38] ss:$12 sps:$4 sm:$0xff]  }
  0x3e   : > { %1415 = vmatprep.subr.bf16.mxu0 %v3138_v3  ;;  %v3197_v3 = vld [vmem:[%s4198_s1 + $0xd0] ss:$8 sps:$4 sm:$0xff]  }
  0x3f   : > { %872 = vmatmul.mubr.bf16.gmra.mrb[12].mxu0 %v3095_v62  ;;  %725 = vmatpush1.bf16.msra.mxu1 %v3099_v63  ;;  %v3194_v62 = vld [vmem:[%s4198_s1 + $0x340] ss:$8 sps:$4 sm:$0xff]   ;;  %v3199_v63 = vld [vmem:[%s4198_s1 + $0xd4] ss:$8 sps:$4 sm:$0xff]  }
  0x40   : > { %881 = vmatprep.mubr.bf16.mxu0 %v3335_v2  ;;  %726 = vmatprep.subr.bf16.mxu1 %v3100_v0  ;;  %v3202_v0 = vld [vmem:[%s4198_s1 + $0x354] ss:$8 sps:$4 sm:$0xff]  }
  0x41   : > { %1416 = vmatpush1.bf16.msra.mxu0 %v3136_v1  ;;  %v3203_v1 = vld [vmem:[%s3451_s23 + $0xac] ss:$12 sps:$4 sm:$0xff]  }
  0x42   : > { %1417 = vmatprep.subr.bf16.mxu0 %v3151_v11  ;;  %v3215_v11 = vld [vmem:[%s4198_s1 + $0xf4] ss:$8 sps:$4 sm:$0xff]  }
  0x43   : > { %727 = vmatpush1.bf16.msra.mxu1 %v3102_v4  ;;  %v3200_v4 = vld [vmem:[%s4198_s1 + $0x350] ss:$8 sps:$4 sm:$0xff]  }
  0x44   : > { %1290 = vmatprep.subr.bf16.mxu1 %v3109_v5  ;;  %v3205_v5 = vld [vmem:[%s3451_s23 + $0xa8] ss:$12 sps:$4 sm:$0xff]  }
  0x45   : > { %1418 = vmatpush1.bf16.msra.mxu0 %v3149_v12  ;;  %v3218_v12 = vld [vmem:[%s4198_s1 + $0x374] ss:$8 sps:$4 sm:$0xff]  }
  0x46   : > { %729 = vmatmul.mubr.bf16.vlgmr.msra.gmra.mrb[0].mxu1 %v3103_v6  ;;  %1971 = vmatprep.subr.bf16.mxu0 %v3164_v17  ;;  %v3208_v6 = vld [vmem:[%s4198_s1 + $0xe4] ss:$8 sps:$4 sm:$0xff]  }
  0x47   : > { %882 = vmatmul.mubr.bf16.gmra.mrb[16].mxu0 %v3106_v7  ;;  %1291 = vmatpush1.bf16.msra.mxu1 %v3107_v8  ;;  %v3212_v7 = vld [vmem:[%s4198_s1 + $0x364] ss:$8 sps:$4 sm:$0xff]   ;;  %v3206_v8 = vld [vmem:[%s4198_s1 + $0xe0] ss:$8 sps:$4 sm:$0xff]  }
  0x48   : > { %738 = vmatprep.mubr.bf16.mxu1 %v3116_v9  ;;  %1292 = vmatprep.subr.bf16.mxu1 %v3115_v10  ;;  %v3209_v9 = vld [vmem:[%s3592_s17 + $0x50] ss:$12 sps:$4 sm:$0xff]   ;;  %v3210_v10 = vld [vmem:[%s4198_s1 + $0x360] ss:$8 sps:$4 sm:$0xff]   ;;  %v3769_v17 = vld [vmem:[%s4198_s1 + $0x404] ss:$8 sps:$4 sm:$0xff]  }
  0x49   : > { %891 = vmatprep.mubr.bf16.mxu0 %v3335_v2 }
  0x4b   : > { %1293 = vmatpush1.bf16.msra.mxu1 %v3113_v13  ;;  %v3221_v13 = vld [vmem:[%s3592_s17 + $0x4] ss:$12 sps:$4 sm:$0xff]  }
  0x4c   : > { %1294 = vmatprep.subr.bf16.mxu1 %v3122_v14  ;;  %v3213_v14 = vld [vmem:[%s4198_s1 + $0xf0] ss:$8 sps:$4 sm:$0xff]  }
  0x4e   : > { %739 = vmatmul.mubr.bf16.gmra.mrb[4].mxu1 %v3118_v15  ;;  %v3216_v15 = vld [vmem:[%s4198_s1 + $0x370] ss:$8 sps:$4 sm:$0xff]  }
  0x4f   : > { %892 = vmatmul.mubr.bf16.gmra.mrb[20].mxu0 %v3119_v16  ;;  %1295 = vmatpush1.bf16.msra.mxu1 %v3120_v18  ;;  %v3225_v16 = vld [vmem:[%s4198_s1 + $0x384] ss:$8 sps:$4 sm:$0xff]  }
  0x50   : > { %748 = vmatprep.mubr.bf16.mxu1 %v3129_v19  ;;  %1296 = vmatprep.subr.bf16.mxu1 %v3128_v20  ;;  %v3219_v18 = vld [vmem:[%s3592_s17] ss:$12 sps:$4 sm:$0xff]   ;;  %v3222_v19 = vld [vmem:[%s3592_s17 + $0x68] ss:$12 sps:$4 sm:$0xff]  }
  0x51   : > { %901 = vmatprep.mubr.bf16.mxu0 %v3335_v2  ;;  %v3223_v20 = vld [vmem:[%s4198_s1 + $0x380] ss:$8 sps:$4 sm:$0xff]  }
  0x53   : > { %1297 = vmatpush1.bf16.msra.mxu1 %v3126_v21  ;;  %v3780_v21 = vld [vmem:[%s4198_s1 + $0x400] ss:$8 sps:$4 sm:$0xff]  }
  0x54   : > { %1298 = vmatprep.subr.bf16.mxu1 %v3135_v22  ;;  %v3231_v22 = vld [vmem:[%s4198_s1 + $0x394] ss:$8 sps:$4 sm:$0xff]  }
  0x56   : > { %749 = vmatmul.mubr.bf16.gmra.mrb[8].mxu1 %v3131_v23  ;;  %v3232_v23 = vld [vmem:[%s3592_s17 + $0x1c] ss:$12 sps:$4 sm:$0xff]  }
  0x57   : > { %902 = vmatmul.mubr.bf16.gmra.mrb[24].mxu0 %v3132_v24  ;;  %1299 = vmatpush1.bf16.msra.mxu1 %v3133_v25  ;;  %v3790_v24 = vld [vmem:[%s4198_s1 + $0x414] ss:$8 sps:$4 sm:$0xff]   ;;  %v3229_v25 = vld [vmem:[%s4198_s1 + $0x390] ss:$8 sps:$4 sm:$0xff]  }
  0x58   : > { %758 = vmatprep.mubr.bf16.mxu1 %v3142_v26  ;;  %1300 = vmatprep.subr.bf16.mxu1 %v3141_v27  ;;  %v3238_v26 = vld [vmem:[%s4198_s1 + $0x3a4] ss:$8 sps:$4 sm:$0xff]   ;;  %v3802_v27 = vld [vmem:[%s4198_s1 + $0x410] ss:$8 sps:$4 sm:$0xff]  }
  0x59   : > { %911 = vmatprep.mubr.bf16.mxu0 %v3335_v2 }
  0x5b   : > { %1301 = vmatpush1.bf16.msra.mxu1 %v3139_v28  ;;  %v3807_v28 = vld [vmem:[%s4198_s1 + $0x424] ss:$8 sps:$4 sm:$0xff]  }
  0x5c   : > { %1302 = vmatprep.subr.bf16.mxu1 %v3148_v29  ;;  %v3234_v29 = vld [vmem:[%s3592_s17 + $0x18] ss:$12 sps:$4 sm:$0xff]  }
  0x5e   : > { %759 = vmatmul.mubr.bf16.gmra.mrb[12].mxu1 %v3144_v30  ;;  %v3235_v30 = vld [vmem:[%s3592_s17 + $0x80] ss:$12 sps:$4 sm:$0xff]  }
  0x5f   : > { %912 = vmatmul.mubr.bf16.gmra.mrb[28].mxu0 %v3145_v31  ;;  %1303 = vmatpush1.bf16.msra.mxu1 %v3146_v32  ;;  %v3236_v31 = vld [vmem:[%s4198_s1 + $0x3a0] ss:$8 sps:$4 sm:$0xff]  }
  0x60   : > { %768 = vmatprep.mubr.bf16.mxu1 %v3155_v33  ;;  %1304 = vmatprep.subr.bf16.mxu1 %v3154_v34  ;;  %v3245_v32 = vld [vmem:[%s3592_s17 + $0x34] ss:$12 sps:$4 sm:$0xff]  }
  0x61   : > { %1435 = vmatprep.mubr.bf16.mxu0 %v3335_v2  ;;  %v3244_v33 = vld [vmem:[%s4198_s1 + $0x3b4] ss:$8 sps:$4 sm:$0xff]   ;;  %v3825_v34 = vld [vmem:[%s4198_s1 + $0x420] ss:$8 sps:$4 sm:$0xff]  }
  0x63   : > { %1305 = vmatpush1.bf16.msra.mxu1 %v3152_v35  ;;  %v3830_v35 = vld [vmem:[%s4198_s1 + $0x434] ss:$8 sps:$4 sm:$0xff]  }
  0x64   : > { %1306 = vmatprep.subr.bf16.mxu1 %v3160_v36  ;;  %v3242_v36 = vld [vmem:[%s4198_s1 + $0x3b0] ss:$8 sps:$4 sm:$0xff]  }
  0x66   : > { %769 = vmatmul.mubr.bf16.gmra.mrb[16].mxu1 %v3157_v37  ;;  %v3247_v37 = vld [vmem:[%s3592_s17 + $0x30] ss:$12 sps:$4 sm:$0xff]  }
  0x67   : > { %1436 = vmatmul.mubr.bf16.vlgmr.msra.gmra.mrb[32].mxu0 %v3161_v39  ;;  %1307 = vmatpush1.bf16.msra.mxu1 %v3158_v38  ;;  %v3251_v38 = vld [vmem:[%s4198_s1 + $0x3c4] ss:$8 sps:$4 sm:$0xff]   ;;  %v3844_v39 = vld [vmem:[%s4198_s1 + $0x430] ss:$8 sps:$4 sm:$0xff]  }
  0x68   : > { %1972 = vmatpush1.bf16.msra.mxu0 %v3162_v40  ;;  %1308 = vmatprep.subr.bf16.mxu1 %v3167_v41  ;;  %v3248_v40 = vld [vmem:[%s3592_s17 + $0x98] ss:$12 sps:$4 sm:$0xff]   ;;  %v3249_v41 = vld [vmem:[%s4198_s1 + $0x3c0] ss:$8 sps:$4 sm:$0xff]  }
  0x69   : > { %1973 = vmatprep.subr.bf16.mxu0 %v3170_v42  ;;  %778 = vmatprep.mubr.bf16.mxu1 %v3171_v43  ;;  %v3258_v42 = vld [vmem:[%s3592_s17 + $0x4c] ss:$12 sps:$4 sm:$0xff]   ;;  %v3257_v43 = vld [vmem:[%s4198_s1 + $0x3d4] ss:$8 sps:$4 sm:$0xff]  }
  0x6a   : > { %1445 = vmatprep.mubr.bf16.mxu0 %v3335_v2 }
  0x6b   : > { %1309 = vmatpush1.bf16.msra.mxu1 %v3165_v44  ;;  %v3255_v44 = vld [vmem:[%s4198_s1 + $0x3d0] ss:$8 sps:$4 sm:$0xff]  }
  0x6c   : > { %1974 = vmatpush1.bf16.msra.mxu0 %v3168_v45  ;;  %1310 = vmatprep.subr.bf16.mxu1 %v3176_v46  ;;  %v3862_v45 = vld [vmem:[%s4198_s1 + $0x444] ss:$8 sps:$4 sm:$0xff]   ;;  %v3867_v46 = vld [vmem:[%s4198_s1 + $0x440] ss:$8 sps:$4 sm:$0xff]  }
  0x6d   : > { %1975 = vmatprep.subr.bf16.mxu0 %v3180_v47  ;;  %v3872_v47 = vld [vmem:[%s4198_s1 + $0x454] ss:$8 sps:$4 sm:$0xff]  }
  0x6e   : > { %779 = vmatmul.mubr.bf16.gmra.mrb[20].mxu1 %v3173_v48  ;;  %v3264_v48 = vld [vmem:[%s4198_s1 + $0x3e4] ss:$8 sps:$4 sm:$0xff]  }
  0x6f   : > { %1446 = vmatmul.mubr.bf16.gmra.mrb[36].mxu0 %v3177_v50  ;;  %1311 = vmatpush1.bf16.msra.mxu1 %v3174_v49  ;;  %v3260_v49 = vld [vmem:[%s3592_s17 + $0x48] ss:$12 sps:$4 sm:$0xff]   ;;  %v3261_v50 = vld [vmem:[%s3592_s17 + $0xb0] ss:$12 sps:$4 sm:$0xff]  }
  0x70   : > { %1976 = vmatpush1.bf16.msra.mxu0 %v3178_v51  ;;  %1312 = vmatprep.subr.bf16.mxu1 %v3183_v52  ;;  %v3262_v51 = vld [vmem:[%s4198_s1 + $0x3e0] ss:$8 sps:$4 sm:$0xff]   ;;  %v3271_v52 = vld [vmem:[%s3592_s17 + $0x64] ss:$12 sps:$4 sm:$0xff]  }
  0x71   : > { %1977 = vmatprep.subr.bf16.mxu0 %v3186_v53  ;;  %788 = vmatprep.mubr.bf16.mxu1 %v3187_v54  ;;  %v3270_v53 = vld [vmem:[%s4198_s1 + $0x3f4] ss:$8 sps:$4 sm:$0xff]   ;;  %v3275_v54 = vld [vmem:[%s3755_s19 + $0x4] ss:$12 sps:$4 sm:$0xff]  }
  0x72   : > { %1455 = vmatprep.mubr.bf16.mxu0 %v3335_v2 }
  0x73   : > { %1313 = vmatpush1.bf16.msra.mxu1 %v3181_v55  ;;  %v3286_v55 = vld [vmem:[%s4198_s1 + $0x450] ss:$8 sps:$4 sm:$0xff]  }
  0x74   : > { %1978 = vmatpush1.bf16.msra.mxu0 %v3184_v56  ;;  %1314 = vmatprep.subr.bf16.mxu1 %v3192_v58  ;;  %v3297_v56 = vld [vmem:[%s4198_s1 + $0x464] ss:$8 sps:$4 sm:$0xff]   ;;  %v3295_v58 = vld [vmem:[%s4198_s1 + $0x460] ss:$8 sps:$4 sm:$0xff]  }
  0x75   : > { %1979 = vmatprep.subr.bf16.mxu0 %v3196_v59  ;;  %v3273_v59 = vld [vmem:[%s3755_s19] ss:$12 sps:$4 sm:$0xff]  }
  0x76   : > { %789 = vmatmul.mubr.bf16.gmra.mrb[24].mxu1 %v3189_v57  ;;  %v3268_v57 = vld [vmem:[%s4198_s1 + $0x3f0] ss:$8 sps:$4 sm:$0xff]  }
  0x77   : > { %1456 = vmatmul.mubr.bf16.gmra.mrb[40].mxu0 %v3193_v61  ;;  %1315 = vmatpush1.bf16.msra.mxu1 %v3190_v60  ;;  %v3276_v60 = vld [vmem:[%s3592_s17 + $0x60] ss:$12 sps:$4 sm:$0xff]   ;;  %v3280_v61 = vld [vmem:[%s3592_s17 + $0x7c] ss:$12 sps:$4 sm:$0xff]  }
  0x78   : > { %1980 = vmatpush1.bf16.msra.mxu0 %v3194_v62  ;;  %1316 = vmatprep.subr.bf16.mxu1 %v3199_v63  ;;  %v3282_v62 = vld [vmem:[%s3755_s19 + $0x1c] ss:$12 sps:$4 sm:$0xff]  }
  0x79   : > { %1981 = vmatprep.subr.bf16.mxu0 %v3202_v0  ;;  %798 = vmatprep.mubr.bf16.mxu1 %v3203_v1  ;;  %v3306_v63 = vld [vmem:[%s4198_s1 + $0x474] ss:$8 sps:$4 sm:$0xff]   ;;  %v3304_v0 = vld [vmem:[%s4198_s1 + $0x470] ss:$8 sps:$4 sm:$0xff]  }
  0x7a   : > { %1465 = vmatprep.mubr.bf16.mxu0 %v3335_v2  ;;  %v3284_v1 = vld [vmem:[%s3592_s17 + $0x78] ss:$12 sps:$4 sm:$0xff]  }
  0x7b   : > { %1317 = vmatpush1.bf16.msra.mxu1 %v3197_v3  ;;  %v3285_v3 = vld [vmem:[%s3755_s19 + $0x18] ss:$12 sps:$4 sm:$0xff]  }
  0x7c   : > { %1982 = vmatpush1.bf16.msra.mxu0 %v3200_v4  ;;  %1318 = vmatprep.subr.bf16.mxu1 %v3208_v6  ;;  %v3289_v4 = vld [vmem:[%s3592_s17 + $0x94] ss:$12 sps:$4 sm:$0xff]   ;;  %v3293_v6 = vld [vmem:[%s3592_s17 + $0x90] ss:$12 sps:$4 sm:$0xff]  }
  0x7d   : > { %1983 = vmatprep.subr.bf16.mxu0 %v3212_v7  ;;  %v3294_v7 = vld [vmem:[%s3755_s19 + $0x30] ss:$12 sps:$4 sm:$0xff]  }
  0x7e   : > { %799 = vmatmul.mubr.bf16.gmra.mrb[28].mxu1 %v3205_v5  ;;  %v3291_v5 = vld [vmem:[%s3755_s19 + $0x34] ss:$12 sps:$4 sm:$0xff]  }
  0x7f   : > { %1466 = vmatmul.mubr.bf16.gmra.mrb[44].mxu0 %v3209_v9  ;;  %1319 = vmatpush1.bf16.msra.mxu1 %v3206_v8  ;;  %v3298_v8 = vld [vmem:[%s3592_s17 + $0xac] ss:$12 sps:$4 sm:$0xff]  }
  0x80   : > { %1984 = vmatpush1.bf16.msra.mxu0 %v3210_v10  ;;  %1320 = vmatprep.subr.bf16.mxu1 %v3215_v11  ;;  %v3300_v9 = vld [vmem:[%s3755_s19 + $0x4c] ss:$12 sps:$4 sm:$0xff]   ;;  %v3302_v10 = vld [vmem:[%s3592_s17 + $0xa8] ss:$12 sps:$4 sm:$0xff]   ;;  %s2473_s17 = sshll.u32 %s2469_s13, 4 }
  0x81   : > { %1985 = vmatprep.subr.bf16.mxu0 %v3218_v12  ;;  %1322 = vmatprep.mubr.bf16.mxu1 %v3221_v13  ;;  %v3303_v11 = vld [vmem:[%s3755_s19 + $0x48] ss:$12 sps:$4 sm:$0xff]   ;;  %v3307_v12 = vld [vmem:[%s3755_s19 + $0x64] ss:$12 sps:$4 sm:$0xff]   ;;  %v3309_v13 = vld [vmem:[%s3755_s19 + $0x60] ss:$12 sps:$4 sm:$0xff]  }
  0x82   : > { %1475 = vmatprep.mubr.bf16.mxu0 %v3335_v2  ;;  %p148_p3 = scmp.lt.s32.totalorder %s2473_s17, 31 }
  0x83   : > { %1321 = vmatpush1.bf16.msra.mxu1 %v3213_v14  ;;  %v3310_v14 = vld [vmem:[%s3755_s19 + $0x38] ss:$12 sps:$4 sm:$0xff]  }
  0x84   : > { %1986 = vmatpush1.bf16.msra.mxu0 %v3216_v15  ;;  %2830 = vmatprep.subr.bf16.mxu1 %v3769_v17  ;;  %v3311_v15 = vld [vmem:[%s3755_s19 + $0x7c] ss:$12 sps:$4 sm:$0xff]   ;;  %s4202_s17 = smov (!%p148_p3, %s2473_s17), 31 }
  0x85   : > { %1987 = vmatprep.subr.bf16.mxu0 %v3225_v16  ;;  %v3313_v16 = vld [vmem:[%s3755_s19 + $0x78] ss:$12 sps:$4 sm:$0xff]   ;;  %s2810_s13 = sshll.u32 %s4202_s17, 3 }
  0x86   : > { %1323 = vmatmul.mubr.bf16.vlgmr.msra.gmra.mrb[32].mxu1 %v3219_v18  ;;  %v3315_v18 = vld [vmem:[%s3755_s19 + $0x94] ss:$12 sps:$4 sm:$0xff]   ;;  %s4116_s22 = scalar_lea.vmem %s4200_s3, %s2810_s13 }
  0x87   : > { %1476 = vmatmul.mubr.bf16.gmra.mrb[48].mxu0 %v3222_v19  ;;  %2838 = vmatpush1.bf16.msra.mxu1 %v3780_v21  ;;  %v3317_v19 = vld [vmem:[%s3755_s19 + $0x90] ss:$12 sps:$4 sm:$0xff]  }
  0x88   : > { %1988 = vmatpush1.bf16.msra.mxu0 %v3223_v20  ;;  %1332 = vmatprep.mubr.bf16.mxu1 %v3232_v23  ;;  %v3318_v20 = vld [vmem:[%s3755_s19 + $0x68] ss:$12 sps:$4 sm:$0xff]   ;;  %v3322_v23 = vld [vmem:[%s3755_s19 + $0x80] ss:$12 sps:$4 sm:$0xff]  }
  0x89   : > { %1989 = vmatprep.subr.bf16.mxu0 %v3231_v22  ;;  %1485 = vmatprep.mubr.bf16.mxu0 %v3335_v2  ;;  %v3321_v22 = vld [vmem:[%s3755_s19 + $0xa8] ss:$12 sps:$4 sm:$0xff]  }
  0x8a   : > { %2831 = vmatprep.subr.bf16.mxu1 %v3790_v24 }
  0x8b   : > { %2839 = vmatpush1.bf16.msra.mxu1 %v3802_v27 }
  0x8c   : > { %1990 = vmatpush1.bf16.msra.mxu0 %v3229_v25  ;;  %2832 = vmatprep.subr.bf16.mxu1 %v3807_v28  ;;  %v3324_v25 = vld [vmem:[%s3755_s19 + $0x98] ss:$12 sps:$4 sm:$0xff]  }
  0x8d   : > { %1991 = vmatprep.subr.bf16.mxu0 %v3238_v26  ;;  %v3325_v26 = vld [vmem:[%s3755_s19 + $0x20] ss:$12 sps:$4 sm:$0xff]  }
  0x8e   : > { %1333 = vmatmul.mubr.bf16.gmra.mrb[36].mxu1 %v3234_v29 }
  0x8f   : > { %1486 = vmatmul.mubr.bf16.gmra.mrb[52].mxu0 %v3235_v30  ;;  %1342 = vmatprep.mubr.bf16.mxu1 %v3245_v32 }
  0x90   : > { %1992 = vmatpush1.bf16.msra.mxu0 %v3236_v31  ;;  %1495 = vmatprep.mubr.bf16.mxu0 %v3335_v2 }
  0x91   : > { %1993 = vmatprep.subr.bf16.mxu0 %v3244_v33  ;;  %2840 = vmatpush1.bf16.msra.mxu1 %v3825_v34 }
  0x92   : > { %2833 = vmatprep.subr.bf16.mxu1 %v3830_v35 }
  0x94   : > { %1994 = vmatpush1.bf16.msra.mxu0 %v3242_v36 }
  0x95   : > { %1995 = vmatprep.subr.bf16.mxu0 %v3251_v38  ;;  %2841 = vmatpush1.bf16.msra.mxu1 %v3844_v39 }
  0x96   : > { %1343 = vmatmul.mubr.bf16.gmra.mrb[40].mxu1 %v3247_v37  ;;  %2834 = vmatprep.subr.bf16.mxu1 %v3862_v45 }
  0x97   : > { %1496 = vmatmul.mubr.bf16.gmra.mrb[56].mxu0 %v3248_v40  ;;  %1352 = vmatprep.mubr.bf16.mxu1 %v3258_v42 }
  0x98   : > { %1996 = vmatpush1.bf16.msra.mxu0 %v3249_v41  ;;  %1505 = vmatprep.mubr.bf16.mxu0 %v3335_v2 }
  0x99   : > { %1997 = vmatprep.subr.bf16.mxu0 %v3257_v43  ;;  %2842 = vmatpush1.bf16.msra.mxu1 %v3867_v46 }
  0x9a   : > { %2835 = vmatprep.subr.bf16.mxu1 %v3872_v47 }
  0x9c   : > { %1998 = vmatpush1.bf16.msra.mxu0 %v3255_v44 }
  0x9d   : > { %1999 = vmatprep.subr.bf16.mxu0 %v3264_v48  ;;  %2843 = vmatpush1.bf16.msra.mxu1 %v3286_v55 }
  0x9e   : > { %1353 = vmatmul.mubr.bf16.gmra.mrb[44].mxu1 %v3260_v49  ;;  %2836 = vmatprep.subr.bf16.mxu1 %v3297_v56 }
  0x9f   : > { %1506 = vmatmul.mubr.bf16.gmra.mrb[60].mxu0 %v3261_v50  ;;  %1362 = vmatprep.mubr.bf16.mxu1 %v3271_v52 }
  0xa0   : > { %2000 = vmatpush1.bf16.msra.mxu0 %v3262_v51  ;;  %2003 = vmatprep.mubr.bf16.mxu0 %v3275_v54 }
  0xa1   : > { %2001 = vmatprep.subr.bf16.mxu0 %v3270_v53  ;;  %2844 = vmatpush1.bf16.msra.mxu1 %v3295_v58 }
  0xa2   : > { %2837 = vmatprep.subr.bf16.mxu1 %v3306_v63 }
  0xa4   : > { %2002 = vmatpush1.bf16.msra.mxu0 %v3268_v57 }
  0xa5   : > { %2084 = vmatprep.subr.bf16.mxu0 %v3769_v17  ;;  %2845 = vmatpush1.bf16.msra.mxu1 %v3304_v0  ;;  %v3314_v17 = vld [vmem:[%s3755_s19 + $0x50] ss:$12 sps:$4 sm:$0xff]  }
  0xa6   : > { %1363 = vmatmul.mubr.bf16.gmra.mrb[48].mxu1 %v3276_v60 }
  0xa7   : > { %2004 = vmatmul.mubr.bf16.vlgmr.msra.gmra.mrb[32].mxu0 %v3273_v59  ;;  %1372 = vmatprep.mubr.bf16.mxu1 %v3280_v61 }
  0xa8   : > { %2085 = vmatpush1.bf16.msra.mxu0 %v3780_v21  ;;  %2013 = vmatprep.mubr.bf16.mxu0 %v3282_v62  ;;  %v3319_v21 = vld [vmem:[%s3755_s19 + $0xac] ss:$12 sps:$4 sm:$0xff]  }
  0xa9   : > { %2086 = vmatprep.subr.bf16.mxu0 %v3790_v24  ;;  %v3323_v24 = vld [vmem:[%s3755_s19 + $0x8] ss:$12 sps:$4 sm:$0xff]  }
  0xac   : > { %2087 = vmatpush1.bf16.msra.mxu0 %v3802_v27  ;;  %v3326_v27 = vld [vmem:[%s3755_s19 + $0xb0] ss:$12 sps:$4 sm:$0xff]  }
  0xad   : > { %2088 = vmatprep.subr.bf16.mxu0 %v3807_v28 }
  0xae   : > { %1373 = vmatmul.mubr.bf16.gmra.mrb[52].mxu1 %v3284_v1 }
  0xaf   : > { %2014 = vmatmul.mubr.bf16.gmra.mrb[36].mxu0 %v3285_v3  ;;  %1382 = vmatprep.mubr.bf16.mxu1 %v3289_v4 }
  0xb0   : > { %2023 = vmatprep.mubr.bf16.mxu0 %v3291_v5  ;;  %2089 = vmatpush1.bf16.msra.mxu0 %v3825_v34 }
  0xb1   : > { %2090 = vmatprep.subr.bf16.mxu0 %v3830_v35 }
  0xb4   : > { %2091 = vmatpush1.bf16.msra.mxu0 %v3844_v39 }
  0xb5   : > { %2092 = vmatprep.subr.bf16.mxu0 %v3862_v45 }
  0xb6   : > { %1383 = vmatmul.mubr.bf16.gmra.mrb[56].mxu1 %v3293_v6 }
  0xb7   : > { %2024 = vmatmul.mubr.bf16.gmra.mrb[40].mxu0 %v3294_v7  ;;  %1392 = vmatprep.mubr.bf16.mxu1 %v3298_v8 }
  0xb8   : > { %2033 = vmatprep.mubr.bf16.mxu0 %v3300_v9  ;;  %2093 = vmatpush1.bf16.msra.mxu0 %v3867_v46 }
  0xb9   : > { %2094 = vmatprep.subr.bf16.mxu0 %v3872_v47 }
  0xbc   : > { %2095 = vmatpush1.bf16.msra.mxu0 %v3286_v55 }
  0xbd   : > { %2096 = vmatprep.subr.bf16.mxu0 %v3297_v56 }
  0xbe   : > { %1393 = vmatmul.mubr.bf16.gmra.mrb[60].mxu1 %v3302_v10 }
  0xbf   : > { %2034 = vmatmul.mubr.bf16.gmra.mrb[44].mxu0 %v3303_v11  ;;  %2136 = vmatprep.mubr.bf16.mxu1 %v3335_v2 }
  0xc0   : > { %2043 = vmatprep.mubr.bf16.mxu0 %v3307_v12  ;;  %2097 = vmatpush1.bf16.msra.mxu0 %v3295_v58 }
  0xc1   : > { %2098 = vmatprep.subr.bf16.mxu0 %v3306_v63 }
  0xc4   : > { %2099 = vmatpush1.bf16.msra.mxu0 %v3304_v0 }
  0xc6   : > { %2137 = vmatmul.mubr.bf16.vlgmr.msra.gmra.mrb[64].mxu1 %v3310_v14 }
  0xc7   : > { %2044 = vmatmul.mubr.bf16.gmra.mrb[48].mxu0 %v3309_v13  ;;  %2146 = vmatprep.mubr.bf16.mxu1 %v3335_v2 }
  0xc8   : > { %2053 = vmatprep.mubr.bf16.mxu0 %v3311_v15 }
  0xce   : > { %2147 = vmatmul.mubr.bf16.gmra.mrb[68].mxu1 %v3314_v17 }
  0xcf   : > { %2054 = vmatmul.mubr.bf16.gmra.mrb[52].mxu0 %v3313_v16  ;;  %2156 = vmatprep.mubr.bf16.mxu1 %v3335_v2 }
  0xd0   : > { %2063 = vmatprep.mubr.bf16.mxu0 %v3315_v18 }
  0xd6   : > { %2157 = vmatmul.mubr.bf16.gmra.mrb[72].mxu1 %v3318_v20 }
  0xd7   : > { %2064 = vmatmul.mubr.bf16.gmra.mrb[56].mxu0 %v3317_v19  ;;  %2166 = vmatprep.mubr.bf16.mxu1 %v3335_v2 }
  0xd8   : > { %2073 = vmatprep.mubr.bf16.mxu0 %v3319_v21 }
  0xde   : > { %2167 = vmatmul.mubr.bf16.gmra.mrb[76].mxu1 %v3322_v23 }
  0xdf   : > { %2074 = vmatmul.mubr.bf16.gmra.mrb[60].mxu0 %v3321_v22  ;;  %2176 = vmatprep.mubr.bf16.mxu1 %v3335_v2 }
  0xe0   : > { %2116 = vmatprep.mubr.bf16.mxu0 %v3335_v2 }
  0xe6   : > { %2177 = vmatmul.mubr.bf16.gmra.mrb[80].mxu1 %v3324_v25 }
  0xe7   : > { %2117 = vmatmul.mubr.bf16.vlgmr.msra.gmra.mrb[32].mxu0 %v3323_v24  ;;  %2186 = vmatprep.mubr.bf16.mxu1 %v3335_v2 }
  0xe8   : > { %2126 = vmatprep.mubr.bf16.mxu0 %v3335_v2 }
  0xee   : > { %2187 = vmatmul.mubr.bf16.gmra.mrb[84].mxu1 %v3326_v27 }
  0xef   : > { %2127 = vmatmul.mubr.bf16.gmra.mrb[36].mxu0 %v3325_v26 }
  0xfa   : > { %v843_v28 = vpop.f32.mrb[0].mxu0 }
  0xfb   : > { %v845_v29 = vpop.f32.mrb[1].mxu0 }
  0xfc   : > { %v847_v30 = vpop.f32.mrb[2].mxu0 }
  0xfd   : > { %v849_v31 = vpop.f32.mrb[3].mxu0 }
 0x102   : > { %v853_v32 = vpop.f32.mrb[4].mxu0 }
 0x103   : > { %v855_v33 = vpop.f32.mrb[5].mxu0 }
 0x104   : > { %v857_v34 = vpop.f32.mrb[6].mxu0 }
 0x105   : > { %v859_v35 = vpop.f32.mrb[7].mxu0 }
 0x10a   : > { %v863_v36 = vpop.f32.mrb[8].mxu0 }
 0x10b   : > { %v865_v37 = vpop.f32.mrb[9].mxu0 }
 0x10c   : > { %v867_v38 = vpop.f32.mrb[10].mxu0 }
 0x10d   : > { %v869_v39 = vpop.f32.mrb[11].mxu0 }
 0x112   : > { %v873_v40 = vpop.f32.mrb[12].mxu0 }
 0x113   : > { %v875_v41 = vpop.f32.mrb[13].mxu0 }
 0x114   : > { %v877_v42 = vpop.f32.mrb[14].mxu0 }
 0x115   : > { %v879_v2 = vpop.f32.mrb[15].mxu0 }
 0x119   : > { %v730_v43 = vpop.f32.mrb[0].mxu1 }
 0x11a   : > { %v883_v44 = vpop.f32.mrb[16].mxu0  ;;  %v3958_v45 = vadd.f32 %v843_v28, %v730_v43  ;;  %v732_v46 = vpop.f32.mrb[1].mxu1 }
 0x11b   : > { %v885_v47 = vpop.f32.mrb[17].mxu0  ;;  %v3960_v48 = vadd.f32 %v845_v29, %v732_v46  ;;  %v734_v49 = vpop.f32.mrb[2].mxu1 }
 0x11c   : > { %v887_v50 = vpop.f32.mrb[18].mxu0  ;;  %v3962_v51 = vadd.f32 %v847_v30, %v734_v49  ;;  %v736_v52 = vpop.f32.mrb[3].mxu1 }
 0x11d   : > { %v889_v53 = vpop.f32.mrb[19].mxu0  ;;  %v3964_v54 = vadd.f32 %v849_v31, %v736_v52 }
 0x121   : > { %v740_v55 = vpop.f32.mrb[4].mxu1 }
 0x122   : > { %v893_v56 = vpop.f32.mrb[20].mxu0  ;;  %v3966_v57 = vadd.f32 %v853_v32, %v740_v55  ;;  %v742_v58 = vpop.f32.mrb[5].mxu1 }
 0x123   : > { %v895_v59 = vpop.f32.mrb[21].mxu0  ;;  %v3968_v60 = vadd.f32 %v855_v33, %v742_v58  ;;  %v744_v61 = vpop.f32.mrb[6].mxu1 }
 0x124   : > { %v897_v62 = vpop.f32.mrb[22].mxu0  ;;  %v3970_v63 = vadd.f32 %v857_v34, %v744_v61  ;;  %v746_v0 = vpop.f32.mrb[7].mxu1 }
 0x125   : > { %v899_v1 = vpop.f32.mrb[23].mxu0  ;;  %v3972_v3 = vadd.f32 %v859_v35, %v746_v0 }
 0x129   : > { %v750_v4 = vpop.f32.mrb[8].mxu1 }
 0x12a   : > { %v903_v5 = vpop.f32.mrb[24].mxu0  ;;  %v3974_v6 = vadd.f32 %v863_v36, %v750_v4  ;;  %v752_v7 = vpop.f32.mrb[9].mxu1 }
 0x12b   : > { %v905_v8 = vpop.f32.mrb[25].mxu0  ;;  %v3976_v9 = vadd.f32 %v865_v37, %v752_v7  ;;  %v754_v10 = vpop.f32.mrb[10].mxu1 }
 0x12c   : > { %v907_v11 = vpop.f32.mrb[26].mxu0  ;;  %v3978_v12 = vadd.f32 %v867_v38, %v754_v10  ;;  %v756_v13 = vpop.f32.mrb[11].mxu1 }
 0x12d   : > { %v909_v14 = vpop.f32.mrb[27].mxu0  ;;  %v3980_v15 = vadd.f32 %v869_v39, %v756_v13 }
 0x131   : > { %v760_v16 = vpop.f32.mrb[12].mxu1 }
 0x132   : > { %v913_v17 = vpop.f32.mrb[28].mxu0  ;;  %v3982_v18 = vadd.f32 %v873_v40, %v760_v16  ;;  %v762_v19 = vpop.f32.mrb[13].mxu1 }
 0x133   : > { %v915_v20 = vpop.f32.mrb[29].mxu0  ;;  %v3984_v21 = vadd.f32 %v875_v41, %v762_v19  ;;  %v764_v22 = vpop.f32.mrb[14].mxu1 }
 0x134   : > { %v917_v23 = vpop.f32.mrb[30].mxu0  ;;  %v3986_v24 = vadd.f32 %v877_v42, %v764_v22  ;;  %v766_v25 = vpop.f32.mrb[15].mxu1 }
 0x135   : > { %v919_v26 = vpop.f32.mrb[31].mxu0  ;;  %v3988_v27 = vadd.f32 %v879_v2, %v766_v25 }
 0x139   : > { %v770_v28 = vpop.f32.mrb[16].mxu1 }
 0x13a   : > { %v3990_v29 = vadd.f32 %v883_v44, %v770_v28  ;;  %v772_v30 = vpop.f32.mrb[17].mxu1 }
 0x13b   : > { %v3992_v31 = vadd.f32 %v885_v47, %v772_v30  ;;  %v774_v32 = vpop.f32.mrb[18].mxu1 }
 0x13c   : > { %v3994_v33 = vadd.f32 %v887_v50, %v774_v32  ;;  %v776_v34 = vpop.f32.mrb[19].mxu1 }
 0x13d   : > { %v3996_v35 = vadd.f32 %v889_v53, %v776_v34 }
 0x141   : > { %v780_v36 = vpop.f32.mrb[20].mxu1 }
 0x142   : > { %v3998_v37 = vadd.f32 %v893_v56, %v780_v36  ;;  %v782_v38 = vpop.f32.mrb[21].mxu1 }
 0x143   : > { %v4000_v39 = vadd.f32 %v895_v59, %v782_v38  ;;  %v784_v40 = vpop.f32.mrb[22].mxu1 }
 0x144   : > { %v4002_v41 = vadd.f32 %v897_v62, %v784_v40  ;;  %v786_v42 = vpop.f32.mrb[23].mxu1 }
 0x145   : > { %v4004_v2 = vadd.f32 %v899_v1, %v786_v42 }
 0x149   : > { %v790_v43 = vpop.f32.mrb[24].mxu1 }
 0x14a   : > { %v4006_v44 = vadd.f32 %v903_v5, %v790_v43  ;;  %v792_v46 = vpop.f32.mrb[25].mxu1 }
 0x14b   : > { %v4008_v47 = vadd.f32 %v905_v8, %v792_v46  ;;  %v794_v49 = vpop.f32.mrb[26].mxu1 }
 0x14c   : > { %v4010_v50 = vadd.f32 %v907_v11, %v794_v49  ;;  %v796_v52 = vpop.f32.mrb[27].mxu1 }
 0x14d   : > { %v4012_v53 = vadd.f32 %v909_v14, %v796_v52 }
 0x151   : > { %v800_v55 = vpop.f32.mrb[28].mxu1 }
 0x152   : > { %v4014_v56 = vadd.f32 %v913_v17, %v800_v55  ;;  %v802_v58 = vpop.f32.mrb[29].mxu1 }
 0x153   : > { %v4016_v59 = vadd.f32 %v915_v20, %v802_v58  ;;  %v804_v61 = vpop.f32.mrb[30].mxu1 }
 0x154   : > { %v4018_v62 = vadd.f32 %v917_v23, %v804_v61  ;;  %v806_v0 = vpop.f32.mrb[31].mxu1 }
 0x155   : > { %v4020_v1 = vadd.f32 %v919_v26, %v806_v0 }
 0x159   : > { %v1324_v4 = vpop.f32.mrb[32].mxu1 }
 0x15a   : > { %v4023_v5 = vadd.f32 %v1324_v4, %v3958_v45  ;;  %v1326_v7 = vpop.f32.mrb[33].mxu1 }
 0x15b   : > { %v4026_v8 = vadd.f32 %v1326_v7, %v3960_v48  ;;  %v1328_v10 = vpop.f32.mrb[34].mxu1 }
 0x15c   : > { %v4029_v11 = vadd.f32 %v1328_v10, %v3962_v51  ;;  %v1330_v13 = vpop.f32.mrb[35].mxu1 }
 0x15d   : > { %v4032_v14 = vadd.f32 %v1330_v13, %v3964_v54 }
 0x161   : > { %v1334_v16 = vpop.f32.mrb[36].mxu1 }
 0x162   : > { %v4035_v17 = vadd.f32 %v1334_v16, %v3966_v57  ;;  %v1336_v19 = vpop.f32.mrb[37].mxu1 }
 0x163   : > { %v4038_v45 = vadd.f32 %v1336_v19, %v3968_v60  ;;  %v1338_v20 = vpop.f32.mrb[38].mxu1 }
 0x164   : > { %v4041_v48 = vadd.f32 %v1338_v20, %v3970_v63  ;;  %v1340_v22 = vpop.f32.mrb[39].mxu1  ;;  %v2231_v20 = vlaneseq }
 0x165   : > { %v4044_v51 = vadd.f32 %v1340_v22, %v3972_v3 }
 0x169   : > { %v1344_v23 = vpop.f32.mrb[40].mxu1 }
 0x16a   : > { %v1345_v54 = vadd.f32 %v1344_v23, %v3974_v6  ;;  %v1346_v25 = vpop.f32.mrb[41].mxu1  ;;  %v2232_v23 = vshrl.u32 %v2231_v20, 7 }
 0x16b   : > { %v1347_v26 = vadd.f32 %v1346_v25, %v3976_v9  ;;  %v1348_v57 = vpop.f32.mrb[42].mxu1 }
 0x16c   : > { %v1349_v28 = vadd.f32 %v1348_v57, %v3978_v12  ;;  %v1350_v30 = vpop.f32.mrb[43].mxu1 }
 0x16d   : > { %v1351_v60 = vadd.f32 %v1350_v30, %v3980_v15 }
 0x171   : > { %v1354_v32 = vpop.f32.mrb[44].mxu1 }
 0x172   : > { %v1355_v63 = vadd.f32 %v1354_v32, %v3982_v18  ;;  %v1356_v34 = vpop.f32.mrb[45].mxu1 }
 0x173   : > { %v1357_v36 = vadd.f32 %v1356_v34, %v3984_v21  ;;  %v1358_v3 = vpop.f32.mrb[46].mxu1 }
 0x174   : > { %v1359_v38 = vadd.f32 %v1358_v3, %v3986_v24  ;;  %v1360_v40 = vpop.f32.mrb[47].mxu1 }
 0x175   : > { %v1361_v6 = vadd.f32 %v1360_v40, %v3988_v27 }
 0x179   : > { %v1364_v42 = vpop.f32.mrb[48].mxu1 }
 0x17a   : > { %v1365_v9 = vadd.f32 %v1364_v42, %v3990_v29  ;;  %v1366_v43 = vpop.f32.mrb[49].mxu1  ;;  %v2233_v42 = vsub.s32 0, %v2232_v23 }
 0x17b   : > { %v1367_v12 = vadd.f32 %v1366_v43, %v3992_v31  ;;  %v1368_v46 = vpop.f32.mrb[50].mxu1  ;;  %v2229_v43 = vld [vmem:[%s4199_s2] sm:$0x3] }
 0x17c   : > { %v4057_v15 = vadd.f32 %v1368_v46, %v3994_v33  ;;  %v1370_v18 = vpop.f32.mrb[51].mxu1 }
 0x17d   : > { %v4060_v49 = vadd.f32 %v1370_v18, %v3996_v35 }
 0x181   : > { %v1374_v21 = vpop.f32.mrb[52].mxu1 }
 0x182   : > { %v4063_v24 = vadd.f32 %v1374_v21, %v3998_v37  ;;  %v1376_v52 = vpop.f32.mrb[53].mxu1 }
 0x183   : > { %v4066_v27 = vadd.f32 %v1376_v52, %v4000_v39  ;;  %v1378_v29 = vpop.f32.mrb[54].mxu1 }
 0x184   : > { %v4069_v55 = vadd.f32 %v1378_v29, %v4002_v41  ;;  %v1380_v31 = vpop.f32.mrb[55].mxu1 }
 0x185   : > { %v4072_v33 = vadd.f32 %v1380_v31, %v4004_v2 }
 0x189   : > { %v1384_v58 = vpop.f32.mrb[56].mxu1 }
 0x18a   : > { %v2025_v61 = vpop.f32.mrb[40].mxu0  ;;  %v4075_v35 = vadd.f32 %v1384_v58, %v4006_v44  ;;  %v1386_v37 = vpop.f32.mrb[57].mxu1 }
 0x18b   : > { %v2872_v0 = vadd.f32 %v2025_v61, %v1345_v54  ;;  %v2027_v4 = vpop.f32.mrb[41].mxu0  ;;  %v4078_v7 = vadd.f32 %v1386_v37, %v4008_v47  ;;  %v1388_v10 = vpop.f32.mrb[58].mxu1 }
 0x18c   : > { %v2876_v39 = vadd.f32 %v2027_v4, %v1347_v26  ;;  %v2029_v41 = vpop.f32.mrb[42].mxu0  ;;  %v4081_v13 = vadd.f32 %v1388_v10, %v4010_v50  ;;  %v1390_v16 = vpop.f32.mrb[59].mxu1 }
 0x18d   : > { %v2880_v2 = vadd.f32 %v2029_v41, %v1349_v28  ;;  %v2031_v19 = vpop.f32.mrb[43].mxu0  ;;  %v4084_v44 = vadd.f32 %v1390_v16, %v4012_v53 }
 0x18e   : > { %v2884_v22 = vadd.f32 %v2031_v19, %v1351_v60 }
 0x191   : > { %v1394_v54 = vpop.f32.mrb[60].mxu1 }
 0x192   : > { %v2035_v25 = vpop.f32.mrb[44].mxu0  ;;  %v4087_v47 = vadd.f32 %v1394_v54, %v4014_v56  ;;  %v1396_v57 = vpop.f32.mrb[61].mxu1 }
 0x193   : > { %v2888_v26 = vadd.f32 %v2035_v25, %v1355_v63  ;;  %v2037_v30 = vpop.f32.mrb[45].mxu0  ;;  %v4092_v50 = vadd.f32 %v1396_v57, %v4016_v59  ;;  %v1398_v32 = vpop.f32.mrb[62].mxu1  ;;  %v2237_v59 = vsub.s32 1, %v2232_v23 }
 0x194   : > { %v2892_v28 = vadd.f32 %v2037_v30, %v1357_v36  ;;  %v2039_v34 = vpop.f32.mrb[46].mxu0  ;;  %v4095_v53 = vadd.f32 %v1398_v32, %v4018_v62  ;;  %v1400_v3 = vpop.f32.mrb[63].mxu1  ;;  %v4103_v36 = vrot.slane %v2229_v43, %v2233_v42 }
 0x195   : > { %v2896_v60 = vadd.f32 %v2039_v34, %v1359_v38  ;;  %v2041_v40 = vpop.f32.mrb[47].mxu0  ;;  %v4098_v56 = vadd.f32 %v1400_v3, %v4020_v1  ;;  %v4105_v62 = vrot.slane %v2229_v43, %v2237_v59 }
 0x196   : > { %v2900_v63 = vadd.f32 %v2041_v40, %v1361_v6 }
 0x199   : > { %v2138_v18 = vpop.f32.mrb[64].mxu1 }
 0x19a   : > { %v2045_v46 = vpop.f32.mrb[48].mxu0  ;;  %v2873_v21 = vadd.f32 %v2872_v0, %v2138_v18  ;;  %v2140_v29 = vpop.f32.mrb[65].mxu1 }
 0x19b   : > { %v2904_v38 = vadd.f32 %v2045_v46, %v1365_v9  ;;  %v2047_v52 = vpop.f32.mrb[49].mxu0  ;;  %v2877_v31 = vadd.f32 %v2876_v39, %v2140_v29  ;;  %v2142_v58 = vpop.f32.mrb[66].mxu1 }
 0x19c   : > { %v2908_v1 = vadd.f32 %v2047_v52, %v1367_v12  ;;  %v2049_v6 = vpop.f32.mrb[50].mxu0  ;;  %v2249_v61 = vadd.f32 %v2873_v21, %v4103_v36  ;;  %v2881_v4 = vadd.f32 %v2880_v2, %v2142_v58  ;;  %v2144_v41 = vpop.f32.mrb[67].mxu1 }
 0x19d   : > { %v2912_v37 = vadd.f32 %v2049_v6, %v4057_v15  ;;  %v2051_v10 = vpop.f32.mrb[51].mxu0  ;;  %v2250_v16 = vadd.f32 %v2877_v31, %v4105_v62  ;;  %v2885_v9 = vadd.f32 %v2884_v22, %v2144_v41 }
 0x19e   : > { %v2916_v19 = vadd.f32 %v2051_v10, %v4060_v49  ;;  %v2281_v0 = vmax.f32 %v2249_v61, 0.0  ;;  %v2251_v20 = vadd.f32 %v2881_v4, %v4103_v36 }
 0x19f   : > { %v2282_v12 = vmax.f32 %v2250_v16, 0.0  ;;  %v2252_v39 = vadd.f32 %v2885_v9, %v4105_v62 }
 0x1a0   : > { %v2283_v15 = vmax.f32 %v2251_v20, 0.0 }
 0x1a1   : > { %v2818_v2 = vpack.c.bf16 %v2282_v12, %v2281_v0  ;;  %v2284_v23 = vmax.f32 %v2252_v39, 0.0  ;;  %v2148_v25 = vpop.f32.mrb[68].mxu1 }
 0x1a2   : > { %v2055_v54 = vpop.f32.mrb[52].mxu0  ;;  %v2889_v22 = vadd.f32 %v2888_v26, %v2148_v25  ;;  %v2150_v30 = vpop.f32.mrb[69].mxu1 }
 0x1a3   : > { %v2920_v49 = vadd.f32 %v2055_v54, %v4063_v24  ;;  %v2057_v57 = vpop.f32.mrb[53].mxu0  ;;  %2405 = vst [vmem:[%s4116_s22 + $0x20] sm:$0xff] %v2818_v2  ;;  %v2819_v32 = vpack.c.bf16 %v2284_v23, %v2283_v15  ;;  %v2893_v3 = vadd.f32 %v2892_v28, %v2150_v30  ;;  %v2152_v42 = vpop.f32.mrb[70].mxu1 }
 0x1a4   : > { %v2924_v34 = vadd.f32 %v2057_v57, %v4066_v27  ;;  %v2059_v40 = vpop.f32.mrb[54].mxu0  ;;  %v2253_v43 = vadd.f32 %v2889_v22, %v4103_v36  ;;  %v2897_v46 = vadd.f32 %v2896_v60, %v2152_v42  ;;  %v2154_v21 = vpop.f32.mrb[71].mxu1 }
 0x1a5   : > { %v2928_v59 = vadd.f32 %v2059_v40, %v4069_v55  ;;  %v2061_v18 = vpop.f32.mrb[55].mxu0  ;;  %2406 = vst [vmem:[%s4116_s22 + $0x28] sm:$0xff] %v2819_v32  ;;  %v2254_v24 = vadd.f32 %v2893_v3, %v4105_v62  ;;  %v2901_v52 = vadd.f32 %v2900_v63, %v2154_v21 }
 0x1a6   : > { %v2932_v26 = vadd.f32 %v2061_v18, %v4072_v33  ;;  %v2285_v29 = vmax.f32 %v2253_v43, 0.0  ;;  %v2255_v27 = vadd.f32 %v2897_v46, %v4103_v36 }
 0x1a7   : > { %v2286_v28 = vmax.f32 %v2254_v24, 0.0  ;;  %v2256_v31 = vadd.f32 %v2901_v52, %v4105_v62 }
 0x1a8   : > { %v2287_v6 = vmax.f32 %v2255_v27, 0.0 }
 0x1a9   : > { %v2820_v58 = vpack.c.bf16 %v2286_v28, %v2285_v29  ;;  %v2288_v61 = vmax.f32 %v2256_v31, 0.0  ;;  %v2158_v60 = vpop.f32.mrb[72].mxu1 }
 0x1aa   : > { %v2065_v55 = vpop.f32.mrb[56].mxu0  ;;  %v2905_v10 = vadd.f32 %v2904_v38, %v2158_v60  ;;  %v2160_v16 = vpop.f32.mrb[73].mxu1 }
 0x1ab   : > { %v2936_v4 = vadd.f32 %v2065_v55, %v4075_v35  ;;  %v2067_v41 = vpop.f32.mrb[57].mxu0  ;;  %2407 = vst [vmem:[%s4116_s22 + $0x30] sm:$0xff] %v2820_v58  ;;  %v2821_v33 = vpack.c.bf16 %v2288_v61, %v2287_v6  ;;  %v2909_v9 = vadd.f32 %v2908_v1, %v2160_v16  ;;  %v2162_v20 = vpop.f32.mrb[74].mxu1 }
 0x1ac   : > { %v2940_v63 = vadd.f32 %v2067_v41, %v4078_v7  ;;  %v2069_v0 = vpop.f32.mrb[58].mxu0  ;;  %v2257_v12 = vadd.f32 %v2905_v10, %v4103_v36  ;;  %v2913_v15 = vadd.f32 %v2912_v37, %v2162_v20  ;;  %v2164_v23 = vpop.f32.mrb[75].mxu1 }
 0x1ad   : > { %v2944_v39 = vadd.f32 %v2069_v0, %v4081_v13  ;;  %v2071_v2 = vpop.f32.mrb[59].mxu0  ;;  %2408 = vst [vmem:[%s4116_s22 + $0x38] sm:$0xff] %v2821_v33  ;;  %v2258_v35 = vadd.f32 %v2909_v9, %v4105_v62  ;;  %v2917_v54 = vadd.f32 %v2916_v19, %v2164_v23 }
 0x1ae   : > { %v2948_v38 = vadd.f32 %v2071_v2, %v4084_v44  ;;  %v2289_v25 = vmax.f32 %v2257_v12, 0.0  ;;  %v2259_v7 = vadd.f32 %v2913_v15, %v4103_v36 }
 0x1af   : > { %v2290_v1 = vmax.f32 %v2258_v35, 0.0  ;;  %v2260_v22 = vadd.f32 %v2917_v54, %v4105_v62 }
 0x1b0   : > { %v2291_v57 = vmax.f32 %v2259_v7, 0.0 }
 0x1b1   : > { %v2822_v30 = vpack.c.bf16 %v2290_v1, %v2289_v25  ;;  %v2292_v32 = vmax.f32 %v2260_v22, 0.0  ;;  %v2168_v37 = vpop.f32.mrb[76].mxu1 }
 0x1b2   : > { %v2075_v13 = vpop.f32.mrb[60].mxu0  ;;  %v2921_v40 = vadd.f32 %v2920_v49, %v2168_v37  ;;  %v2170_v43 = vpop.f32.mrb[77].mxu1 }
 0x1b3   : > { %v4139_v3 = vadd.f32 %v2075_v13, %v4087_v47  ;;  %v2077_v42 = vpop.f32.mrb[61].mxu0  ;;  %2409 = vst [vmem:[%s4116_s22 + $0x40] sm:$0xff] %v2822_v30  ;;  %v2823_v44 = vpack.c.bf16 %v2292_v32, %v2291_v57  ;;  %v2925_v46 = vadd.f32 %v2924_v34, %v2170_v43  ;;  %v2172_v21 = vpop.f32.mrb[78].mxu1 }
 0x1b4   : > { %v4143_v19 = vadd.f32 %v2077_v42, %v4092_v50  ;;  %v2079_v18 = vpop.f32.mrb[62].mxu0  ;;  %v2261_v24 = vadd.f32 %v2921_v40, %v4103_v36  ;;  %v2929_v29 = vadd.f32 %v2928_v59, %v2172_v21  ;;  %v2174_v47 = vpop.f32.mrb[79].mxu1 }
 0x1b5   : > { %v4147_v52 = vadd.f32 %v2079_v18, %v4095_v53  ;;  %v2081_v27 = vpop.f32.mrb[63].mxu0  ;;  %2410 = vst [vmem:[%s4116_s22 + $0x48] sm:$0xff] %v2823_v44  ;;  %v2262_v49 = vadd.f32 %v2925_v46, %v4105_v62  ;;  %v2933_v50 = vadd.f32 %v2932_v26, %v2174_v47 }
 0x1b6   : > { %v4152_v28 = vadd.f32 %v2081_v27, %v4098_v56  ;;  %v2293_v31 = vmax.f32 %v2261_v24, 0.0  ;;  %v2263_v34 = vadd.f32 %v2929_v29, %v4103_v36 }
 0x1b7   : > { %v2294_v6 = vmax.f32 %v2262_v49, 0.0  ;;  %v2264_v58 = vadd.f32 %v2933_v50, %v4105_v62 }
 0x1b8   : > { %v2295_v61 = vmax.f32 %v2263_v34, 0.0 }
 0x1b9   : > { %v2824_v53 = vpack.c.bf16 %v2294_v6, %v2293_v31  ;;  %v2296_v55 = vmax.f32 %v2264_v58, 0.0  ;;  %v2178_v60 = vpop.f32.mrb[80].mxu1 }
 0x1ba   : > { %v2118_v59 = vpop.f32.mrb[32].mxu0  ;;  %v2937_v41 = vadd.f32 %v2936_v4, %v2178_v60  ;;  %v2180_v33 = vpop.f32.mrb[81].mxu1 }
 0x1bb   : > { %v2848_v10 = vadd.f32 %v2118_v59, %v4023_v5  ;;  %v2120_v16 = vpop.f32.mrb[33].mxu0  ;;  %2411 = vst [vmem:[%s4116_s22 + $0x50] sm:$0xff] %v2824_v53  ;;  %v2825_v56 = vpack.c.bf16 %v2296_v55, %v2295_v61  ;;  %v2941_v9 = vadd.f32 %v2940_v63, %v2180_v33  ;;  %v2182_v20 = vpop.f32.mrb[82].mxu1 }
 0x1bc   : > { %v2851_v26 = vadd.f32 %v2120_v16, %v4026_v8  ;;  %v2122_v0 = vpop.f32.mrb[34].mxu0  ;;  %v2265_v15 = vadd.f32 %v2937_v41, %v4103_v36  ;;  %v2945_v23 = vadd.f32 %v2944_v39, %v2182_v20  ;;  %v2184_v5 = vpop.f32.mrb[83].mxu1 }
 0x1bd   : > { %v2241_v12 = vadd.f32 %v2848_v10, %v4103_v36  ;;  %v2854_v2 = vadd.f32 %v2122_v0, %v4029_v11  ;;  %v2124_v35 = vpop.f32.mrb[35].mxu0  ;;  %2412 = vst [vmem:[%s4116_s22 + $0x58] sm:$0xff] %v2825_v56  ;;  %v2266_v54 = vadd.f32 %v2941_v9, %v4105_v62  ;;  %v2949_v8 = vadd.f32 %v2948_v38, %v2184_v5 }
 0x1be   : > { %v2242_v4 = vadd.f32 %v2851_v26, %v4105_v62  ;;  %v2857_v25 = vadd.f32 %v2124_v35, %v4032_v14  ;;  %v2297_v7 = vmax.f32 %v2265_v15, 0.0  ;;  %v2267_v22 = vadd.f32 %v2945_v23, %v4103_v36 }
 0x1bf   : > { %v2273_v63 = vmax.f32 %v2241_v12, 0.0  ;;  %v2243_v1 = vadd.f32 %v2854_v2, %v4103_v36  ;;  %v2298_v11 = vmax.f32 %v2266_v54, 0.0  ;;  %v2268_v30 = vadd.f32 %v2949_v8, %v4105_v62 }
 0x1c0   : > { %v2274_v57 = vmax.f32 %v2242_v4, 0.0  ;;  %v2244_v39 = vadd.f32 %v2857_v25, %v4105_v62  ;;  %v2299_v13 = vmax.f32 %v2267_v22, 0.0 }
 0x1c1   : > { %v2275_v32 = vmax.f32 %v2243_v1, 0.0  ;;  %v2826_v40 = vpack.c.bf16 %v2298_v11, %v2297_v7  ;;  %v2300_v38 = vmax.f32 %v2268_v30, 0.0  ;;  %v2188_v43 = vpop.f32.mrb[84].mxu1 }
 0x1c2   : > { %v2814_v37 = vpack.c.bf16 %v2274_v57, %v2273_v63  ;;  %v2276_v14 = vmax.f32 %v2244_v39, 0.0  ;;  %v2128_v42 = vpop.f32.mrb[36].mxu0  ;;  %v2953_v46 = vadd.f32 %v4139_v3, %v2188_v43  ;;  %v2190_v21 = vpop.f32.mrb[85].mxu1 }
 0x1c3   : > { %v2860_v44 = vadd.f32 %v2128_v42, %v4035_v17  ;;  %v2130_v18 = vpop.f32.mrb[37].mxu0  ;;  %2413 = vst [vmem:[%s4116_s22 + $0x60] sm:$0xff] %v2826_v40  ;;  %v2827_v29 = vpack.c.bf16 %v2300_v38, %v2299_v13  ;;  %v2957_v47 = vadd.f32 %v4143_v19, %v2190_v21  ;;  %v2192_v50 = vpop.f32.mrb[86].mxu1 }
 0x1c4   : > { %2401 = vst [vmem:[%s4116_s22] sm:$0xff] %v2814_v37  ;;  %v2815_v24 = vpack.c.bf16 %v2276_v14, %v2275_v32  ;;  %v2863_v27 = vadd.f32 %v2130_v18, %v4038_v45  ;;  %v2132_v49 = vpop.f32.mrb[38].mxu0  ;;  %v2269_v17 = vadd.f32 %v2953_v46, %v4103_v36  ;;  %v2961_v34 = vadd.f32 %v4147_v52, %v2192_v50  ;;  %v2194_v58 = vpop.f32.mrb[87].mxu1 }
 0x1c5   : > { %v2245_v31 = vadd.f32 %v2860_v44, %v4103_v36  ;;  %v2866_v3 = vadd.f32 %v2132_v49, %v4041_v48  ;;  %v2134_v6 = vpop.f32.mrb[39].mxu0  ;;  %2414 = vst [vmem:[%s4116_s22 + $0x68] sm:$0xff] %v2827_v29  ;;  %v2270_v45 = vadd.f32 %v2957_v47, %v4105_v62  ;;  %v2965_v53 = vadd.f32 %v4152_v28, %v2194_v58 }
 0x1c6   : > { %2402 = vst [vmem:[%s4116_s22 + $0x8] sm:$0xff] %v2815_v24  ;;  %v2246_v61 = vadd.f32 %v2863_v27, %v4105_v62  ;;  %v2869_v19 = vadd.f32 %v2134_v6, %v4044_v51  ;;  %v2301_v59 = vmax.f32 %v2269_v17, 0.0  ;;  %v2271_v52 = vadd.f32 %v2961_v34, %v4103_v36 }
 0x1c7   : > { %v2277_v55 = vmax.f32 %v2245_v31, 0.0  ;;  %v2247_v48 = vadd.f32 %v2866_v3, %v4103_v36  ;;  %v2302_v10 = vmax.f32 %v2270_v45, 0.0  ;;  %v2272_v16 = vadd.f32 %v2965_v53, %v4105_v62 }
 0x1c8   : > { %v2278_v60 = vmax.f32 %v2246_v61, 0.0  ;;  %v2248_v41 = vadd.f32 %v2869_v19, %v4105_v62  ;;  %v2303_v51 = vmax.f32 %v2271_v52, 0.0 }
 0x1c9   : > { %v2279_v33 = vmax.f32 %v2247_v48, 0.0  ;;  %v2828_v26 = vpack.c.bf16 %v2302_v10, %v2301_v59  ;;  %v2304_v9 = vmax.f32 %v2272_v16, 0.0 }
 0x1ca   : > { %v2816_v56 = vpack.c.bf16 %v2278_v60, %v2277_v55  ;;  %v2280_v28 = vmax.f32 %v2248_v41, 0.0 }
 0x1cb   : > { %2415 = vst [vmem:[%s4116_s22 + $0x70] sm:$0xff] %v2828_v26  ;;  %v2829_v20 = vpack.c.bf16 %v2304_v9, %v2303_v51 }
 0x1cc   : > { %2403 = vst [vmem:[%s4116_s22 + $0x10] sm:$0xff] %v2816_v56  ;;  %v2817_v0 = vpack.c.bf16 %v2280_v28, %v2279_v33 }
 0x1cd   : > { %2416 = vst [vmem:[%s4116_s22 + $0x78] sm:$0xff] %v2829_v20 }
 0x1ce   : > { %2404 = vst [vmem:[%s4116_s22 + $0x18] sm:$0xff] %v2817_v0 }
 0x1cf PF: > { %s13_s12 = sadd.s32 1, %s3333_s12  }
 0x1d0   : > { %p10_p4 = scmp.ge.s32.totalorder %s13_s12, 4  }
 0x1d2   :  { %12 = sbr.rel (!%p10_p4) target bundleno = 1 (0x1), region = 64 }

// kernel: observation_decoder_forward.3
= control target key start
LH: loop header
LB: loop body
LE: loop exit
PB: predicated region body
PF: predicated region fallthrough
CT: control target
= control target key end

     0   :  { %10 = vsyncpa [#allocation3], 0  ;;  %s4912_s0 = inlined_call_operand.hbm [shape: f32[2,32], index: 0, kind: input, shape index: {}]   ;;  %s4913_s1 = inlined_call_operand.hbm [shape: bf16[32,256], index: 1, kind: input, shape index: {}]   ;;  %s4914_s2 = inlined_call_operand.hbm [shape: f32[1,256], index: 2, kind: input, shape index: {}]   ;;  %s4915_s3 = inlined_call_operand.hbm [shape: bf16[256,3200], index: 3, kind: input, shape index: {}]   ;;  %s4916_s4 = inlined_call_operand.hbm [shape: f32[1,3200], index: 4, kind: input, shape index: {}]   ;;  %s4917_s5 = inlined_call_operand.vmem [shape: bf16[2,3200], index: 5, kind: output, shape index: {}]  }
   0x1   :  { %11 = vsyncpa [#allocation5], 0 }
   0x2   :  { %12 = vsyncpa [#allocation8], 0  ;;  %s4682_s18 = smov [#allocation4]   ;;  %s4566_s22 = scalar_lea.hbm %s4913_s1, 512 }
   0x3   :  { %s28_s19 = sshll.u32 %s4682_s18, 4  ;;  %p4567_p0 = scmp.ne.s32.totalorder %s4913_s1, %s4566_s22  ;;  %s29_s19 = int_to_ptr.vmem [resolvable:$true] %s28_s19 }
   0x4   :  { %p4570_p1 = scmp.lt.u32.totalorder %s4566_s22, %s4913_s1 }
   0x6   :  { %p4572_p2 = pnand %p4570_p1, %p4567_p0 }
   0x8   :  { %4575 = shalt.err (!%p4572_p2)
}
   0x9   :  { %s4576_s27 = scalar_lea.vmem %s29_s19, 512  ;;  %p4581_p4 = scmp.lt.s32.totalorder %s29_s19, %s29_s19 }
   0xa   :  { %p4577_p3 = scmp.ne.s32.totalorder %s29_s19, %s4576_s27  ;;  %p4582_p5 = scmp.lt.s32.totalorder %s4576_s27, %s4576_s27 }
   0xc   :  { %p4583_p6 = por %p4582_p5, %p4581_p4 }
   0xe   :  { %p4584_p7 = pnand %p4583_p6, %p4577_p3 }
  0x10   :  { %4587 = shalt.err (!%p4584_p7)
}
  0x11   :  { %s4683_s28 = smov 128   ;;  %s4684_s29 = smov 8  }
  0x12   :  { %34 = dma.hbm_to_vmem [thread:$0]  %s4913_s1, 512, %s29_s19, [#allocation5], %s4683_s28, %s4683_s28, %s4684_s29  }
  0x13   :  { %s4685_s7 = smov [#allocation7]   ;;  %s4588_s11 = scalar_lea.hbm %s4915_s3, 51200 }
  0x14   :  { %s50_s8 = sshll.u32 %s4685_s7, 4  ;;  %p4589_p8 = scmp.ne.s32.totalorder %s4915_s3, %s4588_s11  ;;  %s51_s8 = int_to_ptr.vmem [resolvable:$true] %s50_s8 }
  0x15   :  { %p4592_p9 = scmp.lt.u32.totalorder %s4588_s11, %s4915_s3 }
  0x17   :  { %p4594_p10 = pnand %p4592_p9, %p4589_p8 }
  0x19   :  { %4597 = shalt.err (!%p4594_p10)
}
  0x1a   :  { %s4598_s16 = scalar_lea.vmem %s51_s8, 51200  ;;  %p4603_p12 = scmp.lt.s32.totalorder %s51_s8, %s51_s8 }
  0x1b   :  { %p4599_p11 = scmp.ne.s32.totalorder %s51_s8, %s4598_s16  ;;  %p4604_p13 = scmp.lt.s32.totalorder %s4598_s16, %s4598_s16 }
  0x1d   :  { %p4605_p0 = por %p4604_p13, %p4603_p12 }
  0x1f   :  { %p4606_p1 = pnand %p4605_p0, %p4599_p11 }
  0x21   :  { %4609 = shalt.err (!%p4606_p1)
}
  0x22   :  { %s4686_s1 = smov 1600   ;;  %s4687_s17 = smov 100  }
  0x23   :  { %56 = dma.hbm_to_vmem [thread:$0]  %s4915_s3, 51200, %s51_s8, [#allocation8], %s4686_s1, %s4686_s1, %s4687_s17  }
  0x24   :  { %s4688_s20 = smov [#allocation2]   ;;  %s4689_s22 = smov [#allocation6]  }
  0x25   :  { %s19_s21 = sshll.u32 %s4688_s20, 4  ;;  %s41_s23 = sshll.u32 %s4689_s22, 4  ;;  %s20_s21 = int_to_ptr.vmem [resolvable:$true] %s19_s21  ;;  %s42_s23 = int_to_ptr.vmem [resolvable:$true] %s41_s23 }
  0x26   :  { %s4610_s26 = scalar_lea.hbm %s4912_s0, 32 }
  0x27   :  { %p4611_p2 = scmp.ne.s32.totalorder %s4912_s0, %s4610_s26  ;;  %p4614_p3 = scmp.lt.u32.totalorder %s4610_s26, %s4912_s0 }
  0x29   :  { %p4616_p4 = pnand %p4614_p3, %p4611_p2 }
  0x2b   :  { %4619 = shalt.err (!%p4616_p4)
}
  0x2c   :  { %s4620_s3 = scalar_lea.vmem %s20_s21, 32  ;;  %p4625_p6 = scmp.lt.s32.totalorder %s20_s21, %s20_s21 }
  0x2d   :  { %p4621_p5 = scmp.ne.s32.totalorder %s20_s21, %s4620_s3  ;;  %p4626_p7 = scmp.lt.s32.totalorder %s4620_s3, %s4620_s3 }
  0x2f   :  { %p4627_p8 = por %p4626_p7, %p4625_p6 }
  0x31   :  { %p4628_p9 = pnand %p4627_p8, %p4621_p5 }
  0x33   :  { %4631 = shalt.err (!%p4628_p9)
}
  0x34   :  { %22 = dma.hbm_to_vmem [thread:$0]  %s4912_s0, 32, %s20_s21, [#allocation3]  }
  0x35   :  { %s4632_s10 = scalar_lea.hbm %s4914_s2, 32 }
  0x36   :  { %p4633_p10 = scmp.ne.s32.totalorder %s4914_s2, %s4632_s10  ;;  %p4636_p11 = scmp.lt.u32.totalorder %s4632_s10, %s4914_s2 }
  0x38   :  { %p4638_p12 = pnand %p4636_p11, %p4633_p10 }
  0x3a   :  { %4641 = shalt.err (!%p4638_p12)
}
  0x3b   :  { %s4642_s15 = scalar_lea.vmem %s42_s23, 32  ;;  %p4647_p0 = scmp.lt.s32.totalorder %s42_s23, %s42_s23 }
  0x3c   :  { %p4643_p13 = scmp.ne.s32.totalorder %s42_s23, %s4642_s15  ;;  %p4648_p1 = scmp.lt.s32.totalorder %s4642_s15, %s4642_s15 }
  0x3e   :  { %p4649_p2 = por %p4648_p1, %p4647_p0 }
  0x40   :  { %p4650_p3 = pnand %p4649_p2, %p4643_p13 }
  0x42   :  { %4653 = shalt.err (!%p4650_p3)
}
  0x43   :  { %44 = dma.hbm_to_vmem [thread:$0]  %s4914_s2, 32, %s42_s23, [#allocation5]  }
  0x44   :  { %s4690_s1 = smov [#allocation9]   ;;  %s4654_s20 = scalar_lea.hbm %s4916_s4, 400 }
  0x45   :  { %s63_s17 = sshll.u32 %s4690_s1, 4  ;;  %p4655_p4 = scmp.ne.s32.totalorder %s4916_s4, %s4654_s20  ;;  %s64_s17 = int_to_ptr.vmem [resolvable:$true] %s63_s17 }
  0x46   :  { %p4658_p5 = scmp.lt.u32.totalorder %s4654_s20, %s4916_s4 }
  0x48   :  { %p4660_p6 = pnand %p4658_p5, %p4655_p4 }
  0x4a   :  { %4663 = shalt.err (!%p4660_p6)
}
  0x4b   :  { %s4664_s26 = scalar_lea.vmem %s64_s17, 400  ;;  %s4668_s2 = scalar_lea.vmem %s64_s17, 416 }
  0x4c   :  { %p4665_p7 = scmp.ne.s32.totalorder %s64_s17, %s4664_s26  ;;  %p4669_p8 = scmp.lt.s32.totalorder %s64_s17, %s64_s17 }
  0x4d   :  { %p4670_p9 = scmp.lt.s32.totalorder %s4668_s2, %s4664_s26 }
  0x4f   :  { %p4671_p10 = por %p4670_p9, %p4669_p8 }
  0x51   :  { %p4672_p11 = pnand %p4671_p10, %p4665_p7 }
  0x53   :  { %4675 = shalt.err (!%p4672_p11)
}
  0x54   :  { %66 = dma.hbm_to_vmem [thread:$0]  %s4916_s4, 400, %s64_s17, [#allocation8]  }
  0x55   :  { %4676 = dma.done.wait [#allocation3], 32  }
  0x56   :  { %4677 = vsyncadd [#allocation3], 4294967264 }
  0x57   :  { %4678 = dma.done.wait [#allocation5], 544  }
  0x58   :  { %4679 = vsyncadd [#allocation5], 4294966752 }
  0x59   :  { %4680 = dma.done.wait [#allocation8], 51600  }
  0x5a   :  { %4681 = vsyncadd [#allocation8], 4294915696  ;;  %v4691_v0 = vmov 0   ;;  %v3968_v1 = vld [vmem:[#allocation4 + $0x4] ss:$8 sps:$4 sm:$0xff]   ;;  %vm121_vm0 = vcmask 261120  }
  0x5b   :  { %157 = vmatprep.mubr.bf16.mxu0 %v4691_v0  ;;  %v3970_v2 = vld [vmem:[#allocation4] ss:$8 sps:$4 sm:$0xff]   ;;  %125 = vmatprep.subr.bf16.mxu0 %v3968_v1  ;;  %v3971_v3 = vld [vmem:[#allocation4 + $0x14] ss:$8 sps:$4 sm:$0xff]   ;;  %v3973_v4 = vld [vmem:[#allocation4 + $0x10] ss:$8 sps:$4 sm:$0xff]  }
  0x5c   :  { %v83_v5 = vld [vmem:[#allocation2] sm:$0x3]  ;;  %126 = vmatpush1.bf16.msra.mxu0 %v3970_v2  ;;  %v3974_v6 = vld [vmem:[#allocation7 + $0x4] ss:$100 sps:$4 sm:$0xff]   ;;  %v3978_v7 = vld [vmem:[#allocation7 + $0xc] ss:$100 sps:$4 sm:$0xff]  }
  0x5d   :  { %127 = vmatprep.subr.bf16.mxu0 %v3971_v3  ;;  %2733 = vmatprep.subr.bf16.mxu1 %v3974_v6  ;;  %v3979_v8 = vld [vmem:[#allocation7] ss:$100 sps:$4 sm:$0xff]   ;;  %v84_v9 = vpack.c.bf16 %v83_v5, %v83_v5  ;;  %v3980_v10 = vld [vmem:[#allocation7 + $0xcc] ss:$100 sps:$4 sm:$0xff]   ;;  %v3984_v12 = vld [vmem:[#allocation7 + $0xd4] ss:$100 sps:$4 sm:$0xff]  }
  0x5e   :  { %v3976_v11 = vld [vmem:[#allocation7 + $0x8] ss:$100 sps:$4 sm:$0xff]   ;;  %2734 = vmatpush1.bf16.msra.mxu1 %v3979_v8  ;;  %v3986_v14 = vld [vmem:[#allocation7 + $0x194] ss:$100 sps:$4 sm:$0xff]   ;;  %v3990_v16 = vld [vmem:[#allocation7 + $0x19c] ss:$100 sps:$4 sm:$0xff]  }
  0x5f   :  { %2735 = vmatprep.subr.bf16.mxu1 %v3980_v10  ;;  %v3985_v13 = vld [vmem:[#allocation7 + $0xc8] ss:$100 sps:$4 sm:$0xff]   ;;  %v3982_v15 = vld [vmem:[#allocation7 + $0xd0] ss:$100 sps:$4 sm:$0xff]   ;;  %v3992_v18 = vld [vmem:[#allocation7 + $0x25c] ss:$100 sps:$4 sm:$0xff]  }
  0x60   :  { %128 = vmatpush1.bf16.msra.mxu0 %v3973_v4  ;;  %v3991_v17 = vld [vmem:[#allocation7 + $0x190] ss:$100 sps:$4 sm:$0xff]   ;;  %v3988_v19 = vld [vmem:[#allocation7 + $0x198] ss:$100 sps:$4 sm:$0xff]   ;;  %v3996_v20 = vld [vmem:[#allocation7 + $0x264] ss:$100 sps:$4 sm:$0xff]  }
  0x61   :  { %2774 = vmatprep.subr.bf16.mxu0 %v3978_v7  ;;  %v3997_v21 = vld [vmem:[#allocation7 + $0x258] ss:$100 sps:$4 sm:$0xff]   ;;  %v3998_v22 = vld [vmem:[#allocation7 + $0x324] ss:$100 sps:$4 sm:$0xff]   ;;  %v4002_v24 = vld [vmem:[#allocation7 + $0x32c] ss:$100 sps:$4 sm:$0xff]  }
  0x62   :  { %2736 = vmatpush1.bf16.msra.mxu1 %v3985_v13  ;;  %v3994_v23 = vld [vmem:[#allocation7 + $0x260] ss:$100 sps:$4 sm:$0xff]   ;;  %v4004_v26 = vld [vmem:[#allocation7 + $0x3ec] ss:$100 sps:$4 sm:$0xff]   ;;  %v4008_v28 = vld [vmem:[#allocation7 + $0x3f4] ss:$100 sps:$4 sm:$0xff]  }
  0x63   :  { %3520 = vmatmul.mubr.msk.bf16.vlgmr.msra.gmra.mrb[0].mxu0 %vm121_vm0, %v84_v9  ;;  %2737 = vmatprep.subr.bf16.mxu1 %v3986_v14  ;;  %v4003_v25 = vld [vmem:[#allocation7 + $0x320] ss:$100 sps:$4 sm:$0xff]   ;;  %v4000_v27 = vld [vmem:[#allocation7 + $0x328] ss:$100 sps:$4 sm:$0xff]   ;;  %v4010_v30 = vld [vmem:[#allocation7 + $0x4b4] ss:$100 sps:$4 sm:$0xff]   ;;  %v91_v9 = vlaneseq }
  0x64   :  { %2775 = vmatpush1.bf16.msra.mxu0 %v3976_v11  ;;  %v4009_v29 = vld [vmem:[#allocation7 + $0x3e8] ss:$100 sps:$4 sm:$0xff]   ;;  %v4006_v31 = vld [vmem:[#allocation7 + $0x3f0] ss:$100 sps:$4 sm:$0xff]   ;;  %v4014_v32 = vld [vmem:[#allocation7 + $0x4bc] ss:$100 sps:$4 sm:$0xff]  }
  0x65   :  { %2776 = vmatprep.subr.bf16.mxu0 %v3984_v12  ;;  %v4015_v33 = vld [vmem:[#allocation7 + $0x4b0] ss:$100 sps:$4 sm:$0xff]   ;;  %v4016_v34 = vld [vmem:[#allocation7 + $0x57c] ss:$100 sps:$4 sm:$0xff]   ;;  %v4020_v36 = vld [vmem:[#allocation7 + $0x584] ss:$100 sps:$4 sm:$0xff]  }
  0x66   :  { %2738 = vmatpush1.bf16.msra.mxu1 %v3991_v17  ;;  %v4012_v35 = vld [vmem:[#allocation7 + $0x4b8] ss:$100 sps:$4 sm:$0xff]   ;;  %v4022_v38 = vld [vmem:[#allocation7 + $0x644] ss:$100 sps:$4 sm:$0xff]   ;;  %v4026_v40 = vld [vmem:[#allocation7 + $0x64c] ss:$100 sps:$4 sm:$0xff]  }
  0x67   :  { %2739 = vmatprep.subr.bf16.mxu1 %v3992_v18  ;;  %v4021_v37 = vld [vmem:[#allocation7 + $0x578] ss:$100 sps:$4 sm:$0xff]   ;;  %v4018_v39 = vld [vmem:[#allocation7 + $0x580] ss:$100 sps:$4 sm:$0xff]   ;;  %v4028_v42 = vld [vmem:[#allocation7 + $0x70c] ss:$100 sps:$4 sm:$0xff]  }
  0x68   :  { %2777 = vmatpush1.bf16.msra.mxu0 %v3982_v15  ;;  %v4027_v41 = vld [vmem:[#allocation7 + $0x640] ss:$100 sps:$4 sm:$0xff]   ;;  %v4024_v43 = vld [vmem:[#allocation7 + $0x648] ss:$100 sps:$4 sm:$0xff]   ;;  %v4032_v44 = vld [vmem:[#allocation7 + $0x714] ss:$100 sps:$4 sm:$0xff]  }
  0x69   :  { %2778 = vmatprep.subr.bf16.mxu0 %v3990_v16  ;;  %v4033_v45 = vld [vmem:[#allocation7 + $0x708] ss:$100 sps:$4 sm:$0xff]   ;;  %v4034_v46 = vld [vmem:[#allocation7 + $0x7d4] ss:$100 sps:$4 sm:$0xff]   ;;  %v4038_v48 = vld [vmem:[#allocation7 + $0x7dc] ss:$100 sps:$4 sm:$0xff]  }
  0x6a   :  { %2740 = vmatpush1.bf16.msra.mxu1 %v3997_v21  ;;  %v4030_v47 = vld [vmem:[#allocation7 + $0x710] ss:$100 sps:$4 sm:$0xff]   ;;  %v4040_v50 = vld [vmem:[#allocation7 + $0x89c] ss:$100 sps:$4 sm:$0xff]   ;;  %v4044_v53 = vld [vmem:[#allocation7 + $0x8a4] ss:$100 sps:$4 sm:$0xff]  }
  0x6b   :  { %2741 = vmatprep.subr.bf16.mxu1 %v3998_v22  ;;  %v4039_v49 = vld [vmem:[#allocation7 + $0x7d0] ss:$100 sps:$4 sm:$0xff]   ;;  %v4036_v51 = vld [vmem:[#allocation7 + $0x7d8] ss:$100 sps:$4 sm:$0xff]   ;;  %v4046_v54 = vld [vmem:[#allocation7 + $0x964] ss:$100 sps:$4 sm:$0xff]  }
  0x6c   :  { %2779 = vmatpush1.bf16.msra.mxu0 %v3988_v19  ;;  %v4045_v52 = vld [vmem:[#allocation7 + $0x898] ss:$100 sps:$4 sm:$0xff]   ;;  %v4042_v55 = vld [vmem:[#allocation7 + $0x8a0] ss:$100 sps:$4 sm:$0xff]   ;;  %v4050_v57 = vld [vmem:[#allocation7 + $0x96c] ss:$100 sps:$4 sm:$0xff]  }
  0x6d   :  { %2780 = vmatprep.subr.bf16.mxu0 %v3996_v20  ;;  %v4051_v56 = vld [vmem:[#allocation7 + $0x960] ss:$100 sps:$4 sm:$0xff]   ;;  %v4052_v58 = vld [vmem:[#allocation7 + $0xa2c] ss:$100 sps:$4 sm:$0xff]   ;;  %v4056_v61 = vld [vmem:[#allocation7 + $0xa34] ss:$100 sps:$4 sm:$0xff]  }
  0x6e   :  { %2742 = vmatpush1.bf16.msra.mxu1 %v4003_v25  ;;  %v4048_v59 = vld [vmem:[#allocation7 + $0x968] ss:$100 sps:$4 sm:$0xff]   ;;  %v4058_v62 = vld [vmem:[#allocation7 + $0xaf4] ss:$100 sps:$4 sm:$0xff]   ;;  %v4062_v1 = vld [vmem:[#allocation7 + $0xafc] ss:$100 sps:$4 sm:$0xff]  }
  0x6f   :  { %2743 = vmatprep.subr.bf16.mxu1 %v4004_v26  ;;  %v4057_v60 = vld [vmem:[#allocation7 + $0xa28] ss:$100 sps:$4 sm:$0xff]   ;;  %v4054_v63 = vld [vmem:[#allocation7 + $0xa30] ss:$100 sps:$4 sm:$0xff]   ;;  %v4060_v2 = vld [vmem:[#allocation7 + $0xaf8] ss:$100 sps:$4 sm:$0xff]  }
  0x70   :  { %2781 = vmatpush1.bf16.msra.mxu0 %v3994_v23  ;;  %v4063_v0 = vld [vmem:[#allocation7 + $0xaf0] ss:$100 sps:$4 sm:$0xff]   ;;  %v4064_v3 = vld [vmem:[#allocation7 + $0xbbc] ss:$100 sps:$4 sm:$0xff]   ;;  %v4068_v4 = vld [vmem:[#allocation7 + $0xbc4] ss:$100 sps:$4 sm:$0xff]  }
  0x71   :  { %2782 = vmatprep.subr.bf16.mxu0 %v4002_v24  ;;  %v4066_v5 = vld [vmem:[#allocation7 + $0xbc0] ss:$100 sps:$4 sm:$0xff]   ;;  %v4069_v6 = vld [vmem:[#allocation7 + $0xbb8] ss:$100 sps:$4 sm:$0xff]   ;;  %v4783_v10 = vshrl.u32 %v91_v9, 7 }
  0x72   :  { %2744 = vmatpush1.bf16.msra.mxu1 %v4009_v29  ;;  %v4072_v7 = vld [vmem:[#allocation7 + $0x14] ss:$100 sps:$4 sm:$0xff]   ;;  %v4075_v8 = vld [vmem:[#allocation7 + $0x1c] ss:$100 sps:$4 sm:$0xff]  }
  0x73   :  { %2745 = vmatprep.subr.bf16.mxu1 %v4010_v30  ;;  %v4786_v11 = vsub.s32 0, %v4783_v10  ;;  %v89_v12 = vld [vmem:[#allocation6] sm:$0x3]  ;;  %v4789_v13 = vsub.s32 1, %v4783_v10  ;;  %v4070_v23 = vld [vmem:[#allocation7 + $0x10] ss:$100 sps:$4 sm:$0xff]  }
  0x74   :  { %2783 = vmatpush1.bf16.msra.mxu0 %v4000_v27  ;;  %v4073_v24 = vld [vmem:[#allocation7 + $0x18] ss:$100 sps:$4 sm:$0xff]   ;;  %v4081_v27 = vld [vmem:[#allocation7 + $0xe4] ss:$100 sps:$4 sm:$0xff]  }
  0x75   :  { %2784 = vmatprep.subr.bf16.mxu0 %v4008_v28  ;;  %v94_v14 = vrot.slane %v89_v12, %v4786_v11  ;;  %v98_v15 = vrot.slane %v89_v12, %v4789_v13  ;;  %v4078_v26 = vld [vmem:[#allocation7 + $0xdc] ss:$100 sps:$4 sm:$0xff]   ;;  %v4084_v30 = vld [vmem:[#allocation7 + $0x1a4] ss:$100 sps:$4 sm:$0xff]  }
  0x76   :  { %2746 = vmatpush1.bf16.msra.mxu1 %v4015_v33  ;;  %v4076_v28 = vld [vmem:[#allocation7 + $0xd8] ss:$100 sps:$4 sm:$0xff]   ;;  %v4079_v29 = vld [vmem:[#allocation7 + $0xe0] ss:$100 sps:$4 sm:$0xff]   ;;  %v4085_v33 = vld [vmem:[#allocation7 + $0x1a8] ss:$100 sps:$4 sm:$0xff]  }
  0x77   :  { %2747 = vmatprep.subr.bf16.mxu1 %v4016_v34  ;;  %v4090_v34 = vld [vmem:[#allocation7 + $0x26c] ss:$100 sps:$4 sm:$0xff]   ;;  %v4145_v9 = vld [vmem:[#allocation7 + $0x978] ss:$100 sps:$4 sm:$0xff]  }
  0x78   :  { %2785 = vmatpush1.bf16.msra.mxu0 %v4006_v31  ;;  %v4087_v31 = vld [vmem:[#allocation7 + $0x1ac] ss:$100 sps:$4 sm:$0xff]   ;;  %v4150_v12 = vld [vmem:[#allocation7 + $0xa3c] ss:$100 sps:$4 sm:$0xff]  }
  0x79   :  { %2786 = vmatprep.subr.bf16.mxu0 %v4014_v32  ;;  %v4082_v32 = vld [vmem:[#allocation7 + $0x1a0] ss:$100 sps:$4 sm:$0xff]  }
  0x7a   :  { %2748 = vmatpush1.bf16.msra.mxu1 %v4021_v37  ;;  %v4091_v37 = vld [vmem:[#allocation7 + $0x270] ss:$100 sps:$4 sm:$0xff]  }
  0x7b   :  { %2749 = vmatprep.subr.bf16.mxu1 %v4022_v38  ;;  %v4096_v38 = vld [vmem:[#allocation7 + $0x334] ss:$100 sps:$4 sm:$0xff]  }
  0x7c   :  { %2787 = vmatpush1.bf16.msra.mxu0 %v4012_v35  ;;  %v4093_v35 = vld [vmem:[#allocation7 + $0x274] ss:$100 sps:$4 sm:$0xff]  }
  0x7d   :  { %2788 = vmatprep.subr.bf16.mxu0 %v4020_v36  ;;  %v4088_v36 = vld [vmem:[#allocation7 + $0x268] ss:$100 sps:$4 sm:$0xff]  }
  0x7e   :  { %2750 = vmatpush1.bf16.msra.mxu1 %v4027_v41  ;;  %v4097_v41 = vld [vmem:[#allocation7 + $0x338] ss:$100 sps:$4 sm:$0xff]  }
  0x7f   :  { %2751 = vmatprep.subr.bf16.mxu1 %v4028_v42  ;;  %v4102_v42 = vld [vmem:[#allocation7 + $0x3fc] ss:$100 sps:$4 sm:$0xff]  }
  0x80   :  { %2789 = vmatpush1.bf16.msra.mxu0 %v4018_v39  ;;  %v4099_v39 = vld [vmem:[#allocation7 + $0x33c] ss:$100 sps:$4 sm:$0xff]  }
  0x81   :  { %2790 = vmatprep.subr.bf16.mxu0 %v4026_v40  ;;  %v4094_v40 = vld [vmem:[#allocation7 + $0x330] ss:$100 sps:$4 sm:$0xff]  }
  0x82   :  { %2752 = vmatpush1.bf16.msra.mxu1 %v4033_v45  ;;  %v4103_v45 = vld [vmem:[#allocation7 + $0x400] ss:$100 sps:$4 sm:$0xff]  }
  0x83   :  { %2753 = vmatprep.subr.bf16.mxu1 %v4034_v46  ;;  %v4108_v46 = vld [vmem:[#allocation7 + $0x4c4] ss:$100 sps:$4 sm:$0xff]  }
  0x84   :  { %2791 = vmatpush1.bf16.msra.mxu0 %v4024_v43  ;;  %v4105_v43 = vld [vmem:[#allocation7 + $0x404] ss:$100 sps:$4 sm:$0xff]  }
  0x85   :  { %2792 = vmatprep.subr.bf16.mxu0 %v4032_v44  ;;  %v4100_v44 = vld [vmem:[#allocation7 + $0x3f8] ss:$100 sps:$4 sm:$0xff]  }
  0x86   :  { %2754 = vmatpush1.bf16.msra.mxu1 %v4039_v49  ;;  %v4109_v49 = vld [vmem:[#allocation7 + $0x4c8] ss:$100 sps:$4 sm:$0xff]  }
  0x87   :  { %2755 = vmatprep.subr.bf16.mxu1 %v4040_v50  ;;  %v4114_v50 = vld [vmem:[#allocation7 + $0x58c] ss:$100 sps:$4 sm:$0xff]  }
  0x88   :  { %2793 = vmatpush1.bf16.msra.mxu0 %v4030_v47  ;;  %v4111_v47 = vld [vmem:[#allocation7 + $0x4cc] ss:$100 sps:$4 sm:$0xff]  }
  0x89   :  { %2794 = vmatprep.subr.bf16.mxu0 %v4038_v48  ;;  %v4106_v48 = vld [vmem:[#allocation7 + $0x4c0] ss:$100 sps:$4 sm:$0xff]  }
  0x8a   :  { %2756 = vmatpush1.bf16.msra.mxu1 %v4045_v52  ;;  %v4112_v52 = vld [vmem:[#allocation7 + $0x588] ss:$100 sps:$4 sm:$0xff]  }
  0x8b   :  { %2757 = vmatprep.subr.bf16.mxu1 %v4046_v54  ;;  %v4120_v54 = vld [vmem:[#allocation7 + $0x654] ss:$100 sps:$4 sm:$0xff]  }
  0x8c   :  { %2795 = vmatpush1.bf16.msra.mxu0 %v4036_v51  ;;  %v4117_v51 = vld [vmem:[#allocation7 + $0x594] ss:$100 sps:$4 sm:$0xff]  }
  0x8d   :  { %2796 = vmatprep.subr.bf16.mxu0 %v4044_v53  ;;  %v4115_v53 = vld [vmem:[#allocation7 + $0x590] ss:$100 sps:$4 sm:$0xff]  }
  0x8e   :  { %2758 = vmatpush1.bf16.msra.mxu1 %v4051_v56  ;;  %v4118_v56 = vld [vmem:[#allocation7 + $0x650] ss:$100 sps:$4 sm:$0xff]  }
  0x8f   :  { %2759 = vmatprep.subr.bf16.mxu1 %v4052_v58  ;;  %v4126_v58 = vld [vmem:[#allocation7 + $0x71c] ss:$100 sps:$4 sm:$0xff]  }
  0x90   :  { %2797 = vmatpush1.bf16.msra.mxu0 %v4042_v55  ;;  %v4123_v55 = vld [vmem:[#allocation7 + $0x65c] ss:$100 sps:$4 sm:$0xff]  }
  0x91   :  { %2798 = vmatprep.subr.bf16.mxu0 %v4050_v57  ;;  %v4121_v57 = vld [vmem:[#allocation7 + $0x658] ss:$100 sps:$4 sm:$0xff]  }
  0x92   :  { %2760 = vmatpush1.bf16.msra.mxu1 %v4057_v60  ;;  %v4124_v60 = vld [vmem:[#allocation7 + $0x718] ss:$100 sps:$4 sm:$0xff]  }
  0x93   :  { %2761 = vmatprep.subr.bf16.mxu1 %v4058_v62  ;;  %v4132_v62 = vld [vmem:[#allocation7 + $0x7e4] ss:$100 sps:$4 sm:$0xff]  }
  0x94   :  { %2799 = vmatpush1.bf16.msra.mxu0 %v4048_v59  ;;  %v4129_v59 = vld [vmem:[#allocation7 + $0x724] ss:$100 sps:$4 sm:$0xff]  }
  0x95   :  { %2800 = vmatprep.subr.bf16.mxu0 %v4056_v61  ;;  %v4127_v61 = vld [vmem:[#allocation7 + $0x720] ss:$100 sps:$4 sm:$0xff]  }
  0x96   :  { %2762 = vmatpush1.bf16.msra.mxu1 %v4063_v0  ;;  %v4130_v0 = vld [vmem:[#allocation7 + $0x7e0] ss:$100 sps:$4 sm:$0xff]  }
  0x97   :  { %2763 = vmatprep.subr.bf16.mxu1 %v4064_v3  ;;  %v4141_v3 = vld [vmem:[#allocation7 + $0x8b4] ss:$100 sps:$4 sm:$0xff]  }
  0x98   :  { %2801 = vmatpush1.bf16.msra.mxu0 %v4054_v63  ;;  %v4135_v63 = vld [vmem:[#allocation7 + $0x7ec] ss:$100 sps:$4 sm:$0xff]  }
  0x99   :  { %2802 = vmatprep.subr.bf16.mxu0 %v4062_v1  ;;  %v4133_v1 = vld [vmem:[#allocation7 + $0x7e8] ss:$100 sps:$4 sm:$0xff]  }
  0x9a   :  { %2764 = vmatpush1.bf16.msra.mxu1 %v4069_v6  ;;  %v4144_v6 = vld [vmem:[#allocation7 + $0x974] ss:$100 sps:$4 sm:$0xff]  }
  0x9b   :  { %2815 = vmatprep.subr.bf16.mxu1 %v4072_v7  ;;  %v4147_v7 = vld [vmem:[#allocation7 + $0x97c] ss:$100 sps:$4 sm:$0xff]  }
  0x9c   :  { %2803 = vmatpush1.bf16.msra.mxu0 %v4060_v2  ;;  %v4138_v2 = vld [vmem:[#allocation7 + $0x8ac] ss:$100 sps:$4 sm:$0xff]  }
  0x9d   :  { %2804 = vmatprep.subr.bf16.mxu0 %v4068_v4  ;;  %v4136_v4 = vld [vmem:[#allocation7 + $0x8a8] ss:$100 sps:$4 sm:$0xff]  }
  0xa0   :  { %2805 = vmatpush1.bf16.msra.mxu0 %v4066_v5  ;;  %v4139_v5 = vld [vmem:[#allocation7 + $0x8b0] ss:$100 sps:$4 sm:$0xff]  }
  0xa1   :  { %2856 = vmatprep.subr.bf16.mxu0 %v4075_v8  ;;  %v4142_v8 = vld [vmem:[#allocation7 + $0x970] ss:$100 sps:$4 sm:$0xff]  }
 0x136   :  { %v159_v16 = vpop.f32.mrb[0].mxu0 }
 0x137   :  { %v160_v17 = vadd.f32 %v159_v16, %v94_v14  ;;  %v161_v18 = vpop.f32.mrb[1].mxu0  ;;  %v4153_v14 = vld [vmem:[#allocation7 + $0xa44] ss:$100 sps:$4 sm:$0xff]  }
 0x138   :  { %v162_v19 = vadd.f32 %v161_v18, %v98_v15  ;;  %v163_v20 = vpop.f32.mrb[2].mxu0  ;;  %v4148_v15 = vld [vmem:[#allocation7 + $0xa38] ss:$100 sps:$4 sm:$0xff]   ;;  %v4151_v16 = vld [vmem:[#allocation7 + $0xa40] ss:$100 sps:$4 sm:$0xff]  }
 0x139   :  { %v164_v21 = vpop.f32.mrb[3].mxu0  ;;  %v4795_v25 = vpack.c.bf16 %v160_v17, %v160_v17  ;;  %v4156_v17 = vld [vmem:[#allocation7 + $0xb04] ss:$100 sps:$4 sm:$0xff]   ;;  %v4159_v18 = vld [vmem:[#allocation7 + $0xb0c] ss:$100 sps:$4 sm:$0xff]  }
 0x13a   :  { %v4793_v22 = vpack.c.bf16 %v162_v19, %v162_v19  ;;  %v4154_v19 = vld [vmem:[#allocation7 + $0xb00] ss:$100 sps:$4 sm:$0xff]   ;;  %v4157_v20 = vld [vmem:[#allocation7 + $0xb08] ss:$100 sps:$4 sm:$0xff]  }
 0x13b   :  { %v4162_v21 = vld [vmem:[#allocation7 + $0xbcc] ss:$100 sps:$4 sm:$0xff]  }
 0x13c   :  { %2765 = vmatprep.mubr.bf16.mxu1 %v4793_v22  ;;  %2806 = vmatprep.mubr.bf16.mxu0 %v4793_v22 }
 0x13d   :  { %2766 = vmatmul.mubr.bf16.vlgmr.msra.gmra.mrb[0].mxu1 %v4795_v25  ;;  %2807 = vmatmul.mubr.bf16.vlgmr.msra.gmra.mrb[4].mxu0 %v4795_v25 }
 0x13e   :  { %2816 = vmatpush1.bf16.msra.mxu1 %v4070_v23  ;;  %2857 = vmatpush1.bf16.msra.mxu0 %v4073_v24  ;;  %v4165_v23 = vld [vmem:[#allocation7 + $0xbd4] ss:$100 sps:$4 sm:$0xff]   ;;  %v4160_v24 = vld [vmem:[#allocation7 + $0xbc8] ss:$100 sps:$4 sm:$0xff]  }
 0x13f   :  { %2847 = vmatprep.mubr.bf16.mxu1 %v4793_v22  ;;  %2888 = vmatprep.mubr.bf16.mxu0 %v4793_v22 }
 0x140   :  { %2817 = vmatprep.subr.bf16.mxu1 %v4078_v26  ;;  %2858 = vmatprep.subr.bf16.mxu0 %v4081_v27  ;;  %v4163_v26 = vld [vmem:[#allocation7 + $0xbd0] ss:$100 sps:$4 sm:$0xff]   ;;  %v4168_v27 = vld [vmem:[#allocation7 + $0x24] ss:$100 sps:$4 sm:$0xff]  }
 0x142   :  { %2818 = vmatpush1.bf16.msra.mxu1 %v4076_v28  ;;  %2859 = vmatpush1.bf16.msra.mxu0 %v4079_v29  ;;  %v4171_v28 = vld [vmem:[#allocation7 + $0x2c] ss:$100 sps:$4 sm:$0xff]   ;;  %v4166_v29 = vld [vmem:[#allocation7 + $0x20] ss:$100 sps:$4 sm:$0xff]  }
 0x143   :  { %2819 = vmatprep.subr.bf16.mxu1 %v4084_v30  ;;  %2860 = vmatprep.subr.bf16.mxu0 %v4087_v31  ;;  %v4169_v30 = vld [vmem:[#allocation7 + $0x28] ss:$100 sps:$4 sm:$0xff]  }
 0x144   :  { %v4174_v31 = vld [vmem:[#allocation7 + $0xec] ss:$100 sps:$4 sm:$0xff]  }
 0x146   :  { %2820 = vmatpush1.bf16.msra.mxu1 %v4082_v32  ;;  %2861 = vmatpush1.bf16.msra.mxu0 %v4085_v33  ;;  %v4177_v32 = vld [vmem:[#allocation7 + $0xf4] ss:$100 sps:$4 sm:$0xff]   ;;  %v4172_v33 = vld [vmem:[#allocation7 + $0xe8] ss:$100 sps:$4 sm:$0xff]  }
 0x147   :  { %2821 = vmatprep.subr.bf16.mxu1 %v4090_v34  ;;  %2862 = vmatprep.subr.bf16.mxu0 %v4093_v35  ;;  %v4175_v34 = vld [vmem:[#allocation7 + $0xf0] ss:$100 sps:$4 sm:$0xff]  }
 0x148   :  { %v4180_v35 = vld [vmem:[#allocation7 + $0x1b4] ss:$100 sps:$4 sm:$0xff]  }
 0x14a   :  { %2822 = vmatpush1.bf16.msra.mxu1 %v4088_v36  ;;  %2863 = vmatpush1.bf16.msra.mxu0 %v4091_v37  ;;  %v4183_v36 = vld [vmem:[#allocation7 + $0x1bc] ss:$100 sps:$4 sm:$0xff]   ;;  %v4178_v37 = vld [vmem:[#allocation7 + $0x1b0] ss:$100 sps:$4 sm:$0xff]  }
 0x14b   :  { %2823 = vmatprep.subr.bf16.mxu1 %v4096_v38  ;;  %2864 = vmatprep.subr.bf16.mxu0 %v4099_v39  ;;  %v4181_v38 = vld [vmem:[#allocation7 + $0x1b8] ss:$100 sps:$4 sm:$0xff]  }
 0x14c   :  { %v4186_v39 = vld [vmem:[#allocation7 + $0x27c] ss:$100 sps:$4 sm:$0xff]  }
 0x14e   :  { %2824 = vmatpush1.bf16.msra.mxu1 %v4094_v40  ;;  %2865 = vmatpush1.bf16.msra.mxu0 %v4097_v41  ;;  %v4189_v40 = vld [vmem:[#allocation7 + $0x284] ss:$100 sps:$4 sm:$0xff]   ;;  %v4184_v41 = vld [vmem:[#allocation7 + $0x278] ss:$100 sps:$4 sm:$0xff]  }
 0x14f   :  { %2825 = vmatprep.subr.bf16.mxu1 %v4102_v42  ;;  %2866 = vmatprep.subr.bf16.mxu0 %v4105_v43  ;;  %v4187_v42 = vld [vmem:[#allocation7 + $0x280] ss:$100 sps:$4 sm:$0xff]  }
 0x150   :  { %v4192_v43 = vld [vmem:[#allocation7 + $0x344] ss:$100 sps:$4 sm:$0xff]  }
 0x152   :  { %2826 = vmatpush1.bf16.msra.mxu1 %v4100_v44  ;;  %2867 = vmatpush1.bf16.msra.mxu0 %v4103_v45  ;;  %v4195_v44 = vld [vmem:[#allocation7 + $0x34c] ss:$100 sps:$4 sm:$0xff]   ;;  %v4190_v45 = vld [vmem:[#allocation7 + $0x340] ss:$100 sps:$4 sm:$0xff]  }
 0x153   :  { %2827 = vmatprep.subr.bf16.mxu1 %v4108_v46  ;;  %2868 = vmatprep.subr.bf16.mxu0 %v4111_v47  ;;  %v4193_v46 = vld [vmem:[#allocation7 + $0x348] ss:$100 sps:$4 sm:$0xff]  }
 0x154   :  { %v4198_v47 = vld [vmem:[#allocation7 + $0x40c] ss:$100 sps:$4 sm:$0xff]  }
 0x156   :  { %2828 = vmatpush1.bf16.msra.mxu1 %v4106_v48  ;;  %2869 = vmatpush1.bf16.msra.mxu0 %v4109_v49  ;;  %v4201_v48 = vld [vmem:[#allocation7 + $0x414] ss:$100 sps:$4 sm:$0xff]   ;;  %v4196_v49 = vld [vmem:[#allocation7 + $0x408] ss:$100 sps:$4 sm:$0xff]  }
 0x157   :  { %2829 = vmatprep.subr.bf16.mxu1 %v4114_v50  ;;  %2870 = vmatprep.subr.bf16.mxu0 %v4117_v51  ;;  %v4199_v50 = vld [vmem:[#allocation7 + $0x410] ss:$100 sps:$4 sm:$0xff]  }
 0x158   :  { %v4204_v51 = vld [vmem:[#allocation7 + $0x4d4] ss:$100 sps:$4 sm:$0xff]  }
 0x15a   :  { %2830 = vmatpush1.bf16.msra.mxu1 %v4112_v52  ;;  %2871 = vmatpush1.bf16.msra.mxu0 %v4115_v53  ;;  %v4207_v52 = vld [vmem:[#allocation7 + $0x4dc] ss:$100 sps:$4 sm:$0xff]   ;;  %v4202_v53 = vld [vmem:[#allocation7 + $0x4d0] ss:$100 sps:$4 sm:$0xff]  }
 0x15b   :  { %2831 = vmatprep.subr.bf16.mxu1 %v4120_v54  ;;  %2872 = vmatprep.subr.bf16.mxu0 %v4123_v55  ;;  %v4205_v54 = vld [vmem:[#allocation7 + $0x4d8] ss:$100 sps:$4 sm:$0xff]  }
 0x15c   :  { %v4210_v55 = vld [vmem:[#allocation7 + $0x59c] ss:$100 sps:$4 sm:$0xff]  }
 0x15e   :  { %2832 = vmatpush1.bf16.msra.mxu1 %v4118_v56  ;;  %2873 = vmatpush1.bf16.msra.mxu0 %v4121_v57  ;;  %v4213_v56 = vld [vmem:[#allocation7 + $0x5a4] ss:$100 sps:$4 sm:$0xff]   ;;  %v4208_v57 = vld [vmem:[#allocation7 + $0x598] ss:$100 sps:$4 sm:$0xff]  }
 0x15f   :  { %2833 = vmatprep.subr.bf16.mxu1 %v4126_v58  ;;  %2874 = vmatprep.subr.bf16.mxu0 %v4129_v59  ;;  %v4211_v58 = vld [vmem:[#allocation7 + $0x5a0] ss:$100 sps:$4 sm:$0xff]  }
 0x160   :  { %v4216_v59 = vld [vmem:[#allocation7 + $0x664] ss:$100 sps:$4 sm:$0xff]  }
 0x162   :  { %2834 = vmatpush1.bf16.msra.mxu1 %v4124_v60  ;;  %2875 = vmatpush1.bf16.msra.mxu0 %v4127_v61  ;;  %v4219_v60 = vld [vmem:[#allocation7 + $0x66c] ss:$100 sps:$4 sm:$0xff]   ;;  %v4214_v61 = vld [vmem:[#allocation7 + $0x660] ss:$100 sps:$4 sm:$0xff]  }
 0x163   :  { %2835 = vmatprep.subr.bf16.mxu1 %v4132_v62  ;;  %2876 = vmatprep.subr.bf16.mxu0 %v4135_v63  ;;  %v4217_v62 = vld [vmem:[#allocation7 + $0x668] ss:$100 sps:$4 sm:$0xff]  }
 0x164   :  { %v4222_v63 = vld [vmem:[#allocation7 + $0x72c] ss:$100 sps:$4 sm:$0xff]  }
 0x166   :  { %2836 = vmatpush1.bf16.msra.mxu1 %v4130_v0  ;;  %2877 = vmatpush1.bf16.msra.mxu0 %v4133_v1  ;;  %v4225_v0 = vld [vmem:[#allocation7 + $0x734] ss:$100 sps:$4 sm:$0xff]   ;;  %v4220_v1 = vld [vmem:[#allocation7 + $0x728] ss:$100 sps:$4 sm:$0xff]  }
 0x167   :  { %2837 = vmatprep.subr.bf16.mxu1 %v4138_v2  ;;  %2878 = vmatprep.subr.bf16.mxu0 %v4141_v3  ;;  %v4223_v2 = vld [vmem:[#allocation7 + $0x730] ss:$100 sps:$4 sm:$0xff]  }
 0x168   :  { %v4228_v3 = vld [vmem:[#allocation7 + $0x7f4] ss:$100 sps:$4 sm:$0xff]  }
 0x16a   :  { %2838 = vmatpush1.bf16.msra.mxu1 %v4136_v4  ;;  %2879 = vmatpush1.bf16.msra.mxu0 %v4139_v5  ;;  %v4231_v4 = vld [vmem:[#allocation7 + $0x7fc] ss:$100 sps:$4 sm:$0xff]   ;;  %v4226_v5 = vld [vmem:[#allocation7 + $0x7f0] ss:$100 sps:$4 sm:$0xff]  }
 0x16b   :  { %2839 = vmatprep.subr.bf16.mxu1 %v4144_v6  ;;  %2880 = vmatprep.subr.bf16.mxu0 %v4147_v7  ;;  %v4229_v6 = vld [vmem:[#allocation7 + $0x7f8] ss:$100 sps:$4 sm:$0xff]  }
 0x16c   :  { %v4234_v7 = vld [vmem:[#allocation7 + $0x8bc] ss:$100 sps:$4 sm:$0xff]  }
 0x16e   :  { %2840 = vmatpush1.bf16.msra.mxu1 %v4142_v8  ;;  %2881 = vmatpush1.bf16.msra.mxu0 %v4145_v9  ;;  %v4237_v8 = vld [vmem:[#allocation7 + $0x8c4] ss:$100 sps:$4 sm:$0xff]   ;;  %v4232_v9 = vld [vmem:[#allocation7 + $0x8b8] ss:$100 sps:$4 sm:$0xff]  }
 0x16f   :  { %2841 = vmatprep.subr.bf16.mxu1 %v4150_v12  ;;  %2882 = vmatprep.subr.bf16.mxu0 %v4153_v14  ;;  %v4235_v12 = vld [vmem:[#allocation7 + $0x8c0] ss:$100 sps:$4 sm:$0xff]  }
 0x170   :  { %v4240_v14 = vld [vmem:[#allocation7 + $0x984] ss:$100 sps:$4 sm:$0xff]  }
 0x172   :  { %2842 = vmatpush1.bf16.msra.mxu1 %v4148_v15  ;;  %2883 = vmatpush1.bf16.msra.mxu0 %v4151_v16  ;;  %v4243_v15 = vld [vmem:[#allocation7 + $0x98c] ss:$100 sps:$4 sm:$0xff]   ;;  %v4238_v16 = vld [vmem:[#allocation7 + $0x980] ss:$100 sps:$4 sm:$0xff]  }
 0x173   :  { %2843 = vmatprep.subr.bf16.mxu1 %v4156_v17  ;;  %2884 = vmatprep.subr.bf16.mxu0 %v4159_v18  ;;  %v4241_v17 = vld [vmem:[#allocation7 + $0x988] ss:$100 sps:$4 sm:$0xff]  }
 0x174   :  { %v4246_v18 = vld [vmem:[#allocation7 + $0xa4c] ss:$100 sps:$4 sm:$0xff]  }
 0x176   :  { %2844 = vmatpush1.bf16.msra.mxu1 %v4154_v19  ;;  %2885 = vmatpush1.bf16.msra.mxu0 %v4157_v20  ;;  %v4249_v19 = vld [vmem:[#allocation7 + $0xa54] ss:$100 sps:$4 sm:$0xff]   ;;  %v4244_v20 = vld [vmem:[#allocation7 + $0xa48] ss:$100 sps:$4 sm:$0xff]  }
 0x177   :  { %2845 = vmatprep.subr.bf16.mxu1 %v4162_v21  ;;  %2886 = vmatprep.subr.bf16.mxu0 %v4165_v23  ;;  %v4247_v21 = vld [vmem:[#allocation7 + $0xa50] ss:$100 sps:$4 sm:$0xff]  }
 0x178   :  { %v4252_v23 = vld [vmem:[#allocation7 + $0xb14] ss:$100 sps:$4 sm:$0xff]  }
 0x17a   :  { %2846 = vmatpush1.bf16.msra.mxu1 %v4160_v24  ;;  %2887 = vmatpush1.bf16.msra.mxu0 %v4163_v26  ;;  %v4255_v24 = vld [vmem:[#allocation7 + $0xb1c] ss:$100 sps:$4 sm:$0xff]   ;;  %v4250_v26 = vld [vmem:[#allocation7 + $0xb10] ss:$100 sps:$4 sm:$0xff]  }
 0x17b   :  { %2897 = vmatprep.subr.bf16.mxu1 %v4168_v27  ;;  %2938 = vmatprep.subr.bf16.mxu0 %v4171_v28  ;;  %v4253_v27 = vld [vmem:[#allocation7 + $0xb18] ss:$100 sps:$4 sm:$0xff]  }
 0x17c   :  { %v4258_v28 = vld [vmem:[#allocation7 + $0xbdc] ss:$100 sps:$4 sm:$0xff]  }
 0x17d   :  { %2848 = vmatmul.mubr.bf16.vlgmr.msra.gmra.mrb[4].mxu1 %v4795_v25  ;;  %2889 = vmatmul.mubr.bf16.vlgmr.msra.gmra.mrb[8].mxu0 %v4795_v25 }
 0x17e   :  { %2898 = vmatpush1.bf16.msra.mxu1 %v4166_v29  ;;  %2929 = vmatprep.mubr.bf16.mxu1 %v4793_v22  ;;  %v4261_v29 = vld [vmem:[#allocation7 + $0xbe4] ss:$100 sps:$4 sm:$0xff]  }
 0x17f   :  { %2939 = vmatpush1.bf16.msra.mxu0 %v4169_v30  ;;  %2970 = vmatprep.mubr.bf16.mxu0 %v4793_v22  ;;  %v4256_v30 = vld [vmem:[#allocation7 + $0xbd8] ss:$100 sps:$4 sm:$0xff]  }
 0x180   :  { %2899 = vmatprep.subr.bf16.mxu1 %v4174_v31  ;;  %2940 = vmatprep.subr.bf16.mxu0 %v4177_v32  ;;  %v4259_v31 = vld [vmem:[#allocation7 + $0xbe0] ss:$100 sps:$4 sm:$0xff]   ;;  %v4264_v32 = vld [vmem:[#allocation7 + $0x34] ss:$100 sps:$4 sm:$0xff]  }
 0x182   :  { %2900 = vmatpush1.bf16.msra.mxu1 %v4172_v33  ;;  %v4267_v33 = vld [vmem:[#allocation7 + $0x3c] ss:$100 sps:$4 sm:$0xff]  }
 0x183   :  { %2941 = vmatpush1.bf16.msra.mxu0 %v4175_v34  ;;  %2901 = vmatprep.subr.bf16.mxu1 %v4180_v35  ;;  %v4262_v34 = vld [vmem:[#allocation7 + $0x30] ss:$100 sps:$4 sm:$0xff]   ;;  %v4265_v35 = vld [vmem:[#allocation7 + $0x38] ss:$100 sps:$4 sm:$0xff]  }
 0x184   :  { %2942 = vmatprep.subr.bf16.mxu0 %v4183_v36  ;;  %v4270_v36 = vld [vmem:[#allocation7 + $0xfc] ss:$100 sps:$4 sm:$0xff]  }
 0x186   :  { %2902 = vmatpush1.bf16.msra.mxu1 %v4178_v37  ;;  %v4273_v37 = vld [vmem:[#allocation7 + $0x104] ss:$100 sps:$4 sm:$0xff]  }
 0x187   :  { %2943 = vmatpush1.bf16.msra.mxu0 %v4181_v38  ;;  %2903 = vmatprep.subr.bf16.mxu1 %v4186_v39  ;;  %v4268_v38 = vld [vmem:[#allocation7 + $0xf8] ss:$100 sps:$4 sm:$0xff]   ;;  %v4271_v39 = vld [vmem:[#allocation7 + $0x100] ss:$100 sps:$4 sm:$0xff]  }
 0x188   :  { %2944 = vmatprep.subr.bf16.mxu0 %v4189_v40  ;;  %v4276_v40 = vld [vmem:[#allocation7 + $0x1c4] ss:$100 sps:$4 sm:$0xff]  }
 0x18a   :  { %2904 = vmatpush1.bf16.msra.mxu1 %v4184_v41  ;;  %v4279_v41 = vld [vmem:[#allocation7 + $0x1cc] ss:$100 sps:$4 sm:$0xff]  }
 0x18b   :  { %2945 = vmatpush1.bf16.msra.mxu0 %v4187_v42  ;;  %2905 = vmatprep.subr.bf16.mxu1 %v4192_v43  ;;  %v4274_v42 = vld [vmem:[#allocation7 + $0x1c0] ss:$100 sps:$4 sm:$0xff]   ;;  %v4277_v43 = vld [vmem:[#allocation7 + $0x1c8] ss:$100 sps:$4 sm:$0xff]  }
 0x18c   :  { %2946 = vmatprep.subr.bf16.mxu0 %v4195_v44  ;;  %v4282_v44 = vld [vmem:[#allocation7 + $0x28c] ss:$100 sps:$4 sm:$0xff]  }
 0x18e   :  { %2906 = vmatpush1.bf16.msra.mxu1 %v4190_v45  ;;  %v4285_v45 = vld [vmem:[#allocation7 + $0x294] ss:$100 sps:$4 sm:$0xff]  }
 0x18f   :  { %2947 = vmatpush1.bf16.msra.mxu0 %v4193_v46  ;;  %2907 = vmatprep.subr.bf16.mxu1 %v4198_v47  ;;  %v4280_v46 = vld [vmem:[#allocation7 + $0x288] ss:$100 sps:$4 sm:$0xff]   ;;  %v4283_v47 = vld [vmem:[#allocation7 + $0x290] ss:$100 sps:$4 sm:$0xff]  }
 0x190   :  { %2948 = vmatprep.subr.bf16.mxu0 %v4201_v48  ;;  %v4288_v48 = vld [vmem:[#allocation7 + $0x354] ss:$100 sps:$4 sm:$0xff]  }
 0x192   :  { %2908 = vmatpush1.bf16.msra.mxu1 %v4196_v49  ;;  %v4291_v49 = vld [vmem:[#allocation7 + $0x35c] ss:$100 sps:$4 sm:$0xff]  }
 0x193   :  { %2949 = vmatpush1.bf16.msra.mxu0 %v4199_v50  ;;  %2909 = vmatprep.subr.bf16.mxu1 %v4204_v51  ;;  %v4286_v50 = vld [vmem:[#allocation7 + $0x350] ss:$100 sps:$4 sm:$0xff]   ;;  %v4289_v51 = vld [vmem:[#allocation7 + $0x358] ss:$100 sps:$4 sm:$0xff]  }
 0x194   :  { %2950 = vmatprep.subr.bf16.mxu0 %v4207_v52  ;;  %v4294_v52 = vld [vmem:[#allocation7 + $0x41c] ss:$100 sps:$4 sm:$0xff]  }
 0x196   :  { %2910 = vmatpush1.bf16.msra.mxu1 %v4202_v53  ;;  %v4297_v53 = vld [vmem:[#allocation7 + $0x424] ss:$100 sps:$4 sm:$0xff]  }
 0x197   :  { %2951 = vmatpush1.bf16.msra.mxu0 %v4205_v54  ;;  %2911 = vmatprep.subr.bf16.mxu1 %v4210_v55  ;;  %v4292_v54 = vld [vmem:[#allocation7 + $0x418] ss:$100 sps:$4 sm:$0xff]   ;;  %v4295_v55 = vld [vmem:[#allocation7 + $0x420] ss:$100 sps:$4 sm:$0xff]  }
 0x198   :  { %2952 = vmatprep.subr.bf16.mxu0 %v4213_v56  ;;  %v4300_v56 = vld [vmem:[#allocation7 + $0x4e4] ss:$100 sps:$4 sm:$0xff]  }
 0x19a   :  { %2912 = vmatpush1.bf16.msra.mxu1 %v4208_v57  ;;  %v4303_v57 = vld [vmem:[#allocation7 + $0x4ec] ss:$100 sps:$4 sm:$0xff]  }
 0x19b   :  { %2953 = vmatpush1.bf16.msra.mxu0 %v4211_v58  ;;  %2913 = vmatprep.subr.bf16.mxu1 %v4216_v59  ;;  %v4298_v58 = vld [vmem:[#allocation7 + $0x4e0] ss:$100 sps:$4 sm:$0xff]   ;;  %v4301_v59 = vld [vmem:[#allocation7 + $0x4e8] ss:$100 sps:$4 sm:$0xff]  }
 0x19c   :  { %2954 = vmatprep.subr.bf16.mxu0 %v4219_v60  ;;  %v4306_v60 = vld [vmem:[#allocation7 + $0x5ac] ss:$100 sps:$4 sm:$0xff]  }
 0x19e   :  { %2914 = vmatpush1.bf16.msra.mxu1 %v4214_v61  ;;  %v4309_v61 = vld [vmem:[#allocation7 + $0x5b4] ss:$100 sps:$4 sm:$0xff]  }
 0x19f   :  { %2955 = vmatpush1.bf16.msra.mxu0 %v4217_v62  ;;  %2915 = vmatprep.subr.bf16.mxu1 %v4222_v63  ;;  %v4304_v62 = vld [vmem:[#allocation7 + $0x5a8] ss:$100 sps:$4 sm:$0xff]   ;;  %v4307_v63 = vld [vmem:[#allocation7 + $0x5b0] ss:$100 sps:$4 sm:$0xff]  }
 0x1a0   :  { %2956 = vmatprep.subr.bf16.mxu0 %v4225_v0  ;;  %v4312_v0 = vld [vmem:[#allocation7 + $0x674] ss:$100 sps:$4 sm:$0xff]  }
 0x1a2   :  { %2916 = vmatpush1.bf16.msra.mxu1 %v4220_v1  ;;  %v4315_v1 = vld [vmem:[#allocation7 + $0x67c] ss:$100 sps:$4 sm:$0xff]  }
 0x1a3   :  { %2957 = vmatpush1.bf16.msra.mxu0 %v4223_v2  ;;  %2917 = vmatprep.subr.bf16.mxu1 %v4228_v3  ;;  %v4310_v2 = vld [vmem:[#allocation7 + $0x670] ss:$100 sps:$4 sm:$0xff]   ;;  %v4313_v3 = vld [vmem:[#allocation7 + $0x678] ss:$100 sps:$4 sm:$0xff]  }
 0x1a4   :  { %2958 = vmatprep.subr.bf16.mxu0 %v4231_v4  ;;  %v4318_v4 = vld [vmem:[#allocation7 + $0x73c] ss:$100 sps:$4 sm:$0xff]  }
 0x1a6   :  { %2918 = vmatpush1.bf16.msra.mxu1 %v4226_v5  ;;  %v4321_v5 = vld [vmem:[#allocation7 + $0x744] ss:$100 sps:$4 sm:$0xff]  }
 0x1a7   :  { %2959 = vmatpush1.bf16.msra.mxu0 %v4229_v6  ;;  %2919 = vmatprep.subr.bf16.mxu1 %v4234_v7  ;;  %v4316_v6 = vld [vmem:[#allocation7 + $0x738] ss:$100 sps:$4 sm:$0xff]   ;;  %v4319_v7 = vld [vmem:[#allocation7 + $0x740] ss:$100 sps:$4 sm:$0xff]  }
 0x1a8   :  { %2960 = vmatprep.subr.bf16.mxu0 %v4237_v8  ;;  %v4324_v8 = vld [vmem:[#allocation7 + $0x804] ss:$100 sps:$4 sm:$0xff]  }
 0x1aa   :  { %2920 = vmatpush1.bf16.msra.mxu1 %v4232_v9  ;;  %v4327_v9 = vld [vmem:[#allocation7 + $0x80c] ss:$100 sps:$4 sm:$0xff]  }
 0x1ab   :  { %2961 = vmatpush1.bf16.msra.mxu0 %v4235_v12  ;;  %2921 = vmatprep.subr.bf16.mxu1 %v4240_v14  ;;  %v4322_v12 = vld [vmem:[#allocation7 + $0x800] ss:$100 sps:$4 sm:$0xff]   ;;  %v4325_v14 = vld [vmem:[#allocation7 + $0x808] ss:$100 sps:$4 sm:$0xff]  }
 0x1ac   :  { %2962 = vmatprep.subr.bf16.mxu0 %v4243_v15  ;;  %v4330_v15 = vld [vmem:[#allocation7 + $0x8cc] ss:$100 sps:$4 sm:$0xff]  }
 0x1ae   :  { %2922 = vmatpush1.bf16.msra.mxu1 %v4238_v16  ;;  %v4333_v16 = vld [vmem:[#allocation7 + $0x8d4] ss:$100 sps:$4 sm:$0xff]  }
 0x1af   :  { %2963 = vmatpush1.bf16.msra.mxu0 %v4241_v17  ;;  %2923 = vmatprep.subr.bf16.mxu1 %v4246_v18  ;;  %v4328_v17 = vld [vmem:[#allocation7 + $0x8c8] ss:$100 sps:$4 sm:$0xff]   ;;  %v4331_v18 = vld [vmem:[#allocation7 + $0x8d0] ss:$100 sps:$4 sm:$0xff]  }
 0x1b0   :  { %2964 = vmatprep.subr.bf16.mxu0 %v4249_v19  ;;  %v4336_v19 = vld [vmem:[#allocation7 + $0x994] ss:$100 sps:$4 sm:$0xff]  }
 0x1b2   :  { %2924 = vmatpush1.bf16.msra.mxu1 %v4244_v20  ;;  %v4339_v20 = vld [vmem:[#allocation7 + $0x99c] ss:$100 sps:$4 sm:$0xff]  }
 0x1b3   :  { %2965 = vmatpush1.bf16.msra.mxu0 %v4247_v21  ;;  %2925 = vmatprep.subr.bf16.mxu1 %v4252_v23  ;;  %v4334_v21 = vld [vmem:[#allocation7 + $0x990] ss:$100 sps:$4 sm:$0xff]   ;;  %v4337_v23 = vld [vmem:[#allocation7 + $0x998] ss:$100 sps:$4 sm:$0xff]  }
 0x1b4   :  { %2966 = vmatprep.subr.bf16.mxu0 %v4255_v24  ;;  %v4342_v24 = vld [vmem:[#allocation7 + $0xa5c] ss:$100 sps:$4 sm:$0xff]  }
 0x1b6   :  { %2926 = vmatpush1.bf16.msra.mxu1 %v4250_v26  ;;  %v4345_v26 = vld [vmem:[#allocation7 + $0xa64] ss:$100 sps:$4 sm:$0xff]  }
 0x1b7   :  { %2967 = vmatpush1.bf16.msra.mxu0 %v4253_v27  ;;  %2927 = vmatprep.subr.bf16.mxu1 %v4258_v28  ;;  %v4340_v27 = vld [vmem:[#allocation7 + $0xa58] ss:$100 sps:$4 sm:$0xff]   ;;  %v4343_v28 = vld [vmem:[#allocation7 + $0xa60] ss:$100 sps:$4 sm:$0xff]  }
 0x1b8   :  { %2968 = vmatprep.subr.bf16.mxu0 %v4261_v29  ;;  %v4348_v29 = vld [vmem:[#allocation7 + $0xb24] ss:$100 sps:$4 sm:$0xff]  }
 0x1ba   :  { %2928 = vmatpush1.bf16.msra.mxu1 %v4256_v30  ;;  %v4351_v30 = vld [vmem:[#allocation7 + $0xb2c] ss:$100 sps:$4 sm:$0xff]  }
 0x1bb   :  { %2969 = vmatpush1.bf16.msra.mxu0 %v4259_v31  ;;  %2979 = vmatprep.subr.bf16.mxu1 %v4264_v32  ;;  %v4346_v31 = vld [vmem:[#allocation7 + $0xb20] ss:$100 sps:$4 sm:$0xff]   ;;  %v4349_v32 = vld [vmem:[#allocation7 + $0xb28] ss:$100 sps:$4 sm:$0xff]  }
 0x1bc   :  { %3020 = vmatprep.subr.bf16.mxu0 %v4267_v33  ;;  %v4354_v33 = vld [vmem:[#allocation7 + $0xbec] ss:$100 sps:$4 sm:$0xff]  }
 0x1bd   :  { %2930 = vmatmul.mubr.bf16.vlgmr.msra.gmra.mrb[8].mxu1 %v4795_v25 }
 0x1be   :  { %2971 = vmatmul.mubr.bf16.vlgmr.msra.gmra.mrb[12].mxu0 %v4795_v25  ;;  %2980 = vmatpush1.bf16.msra.mxu1 %v4262_v34  ;;  %v4357_v34 = vld [vmem:[#allocation7 + $0xbf4] ss:$100 sps:$4 sm:$0xff]  }
 0x1bf   :  { %3011 = vmatprep.mubr.bf16.mxu1 %v4793_v22  ;;  %3021 = vmatpush1.bf16.msra.mxu0 %v4265_v35  ;;  %v4352_v35 = vld [vmem:[#allocation7 + $0xbe8] ss:$100 sps:$4 sm:$0xff]  }
 0x1c0   :  { %3052 = vmatprep.mubr.bf16.mxu0 %v4793_v22  ;;  %2981 = vmatprep.subr.bf16.mxu1 %v4270_v36  ;;  %v4355_v36 = vld [vmem:[#allocation7 + $0xbf0] ss:$100 sps:$4 sm:$0xff]  }
 0x1c1   :  { %3022 = vmatprep.subr.bf16.mxu0 %v4273_v37  ;;  %v4360_v37 = vld [vmem:[#allocation7 + $0x44] ss:$100 sps:$4 sm:$0xff]  }
 0x1c2   :  { %2982 = vmatpush1.bf16.msra.mxu1 %v4268_v38  ;;  %v4363_v38 = vld [vmem:[#allocation7 + $0x4c] ss:$100 sps:$4 sm:$0xff]  }
 0x1c3   :  { %3023 = vmatpush1.bf16.msra.mxu0 %v4271_v39  ;;  %2983 = vmatprep.subr.bf16.mxu1 %v4276_v40  ;;  %v4358_v39 = vld [vmem:[#allocation7 + $0x40] ss:$100 sps:$4 sm:$0xff]   ;;  %v4361_v40 = vld [vmem:[#allocation7 + $0x48] ss:$100 sps:$4 sm:$0xff]  }
 0x1c4   :  { %3024 = vmatprep.subr.bf16.mxu0 %v4279_v41  ;;  %v4366_v41 = vld [vmem:[#allocation7 + $0x10c] ss:$100 sps:$4 sm:$0xff]  }
 0x1c6   :  { %2984 = vmatpush1.bf16.msra.mxu1 %v4274_v42  ;;  %v4369_v42 = vld [vmem:[#allocation7 + $0x114] ss:$100 sps:$4 sm:$0xff]  }
 0x1c7   :  { %3025 = vmatpush1.bf16.msra.mxu0 %v4277_v43  ;;  %2985 = vmatprep.subr.bf16.mxu1 %v4282_v44  ;;  %v4364_v43 = vld [vmem:[#allocation7 + $0x108] ss:$100 sps:$4 sm:$0xff]   ;;  %v4367_v44 = vld [vmem:[#allocation7 + $0x110] ss:$100 sps:$4 sm:$0xff]  }
 0x1c8   :  { %3026 = vmatprep.subr.bf16.mxu0 %v4285_v45  ;;  %v4372_v45 = vld [vmem:[#allocation7 + $0x1d4] ss:$100 sps:$4 sm:$0xff]  }
 0x1ca   :  { %2986 = vmatpush1.bf16.msra.mxu1 %v4280_v46  ;;  %v4375_v46 = vld [vmem:[#allocation7 + $0x1dc] ss:$100 sps:$4 sm:$0xff]  }
 0x1cb   :  { %3027 = vmatpush1.bf16.msra.mxu0 %v4283_v47  ;;  %2987 = vmatprep.subr.bf16.mxu1 %v4288_v48  ;;  %v4370_v47 = vld [vmem:[#allocation7 + $0x1d0] ss:$100 sps:$4 sm:$0xff]   ;;  %v4373_v48 = vld [vmem:[#allocation7 + $0x1d8] ss:$100 sps:$4 sm:$0xff]  }
 0x1cc   :  { %3028 = vmatprep.subr.bf16.mxu0 %v4291_v49  ;;  %v4378_v49 = vld [vmem:[#allocation7 + $0x29c] ss:$100 sps:$4 sm:$0xff]  }
 0x1ce   :  { %2988 = vmatpush1.bf16.msra.mxu1 %v4286_v50  ;;  %v4381_v50 = vld [vmem:[#allocation7 + $0x2a4] ss:$100 sps:$4 sm:$0xff]  }
 0x1cf   :  { %3029 = vmatpush1.bf16.msra.mxu0 %v4289_v51  ;;  %2989 = vmatprep.subr.bf16.mxu1 %v4294_v52  ;;  %v4376_v51 = vld [vmem:[#allocation7 + $0x298] ss:$100 sps:$4 sm:$0xff]   ;;  %v4379_v52 = vld [vmem:[#allocation7 + $0x2a0] ss:$100 sps:$4 sm:$0xff]  }
 0x1d0   :  { %3030 = vmatprep.subr.bf16.mxu0 %v4297_v53  ;;  %v4384_v53 = vld [vmem:[#allocation7 + $0x364] ss:$100 sps:$4 sm:$0xff]  }
 0x1d2   :  { %2990 = vmatpush1.bf16.msra.mxu1 %v4292_v54  ;;  %v4387_v54 = vld [vmem:[#allocation7 + $0x36c] ss:$100 sps:$4 sm:$0xff]  }
 0x1d3   :  { %3031 = vmatpush1.bf16.msra.mxu0 %v4295_v55  ;;  %2991 = vmatprep.subr.bf16.mxu1 %v4300_v56  ;;  %v4816_v55 = vsub.s32 2, %v4783_v10  ;;  %v4382_v56 = vld [vmem:[#allocation7 + $0x360] ss:$100 sps:$4 sm:$0xff]  }
 0x1d4   :  { %3032 = vmatprep.subr.bf16.mxu0 %v4303_v57  ;;  %v4818_v57 = vld [vmem:[#allocation9] sm:$0xff] }
 0x1d6   :  { %2992 = vmatpush1.bf16.msra.mxu1 %v4298_v58  ;;  %v4821_v58 = vsub.s32 3, %v4783_v10 }
 0x1d7   :  { %3033 = vmatpush1.bf16.msra.mxu0 %v4301_v59  ;;  %2993 = vmatprep.subr.bf16.mxu1 %v4306_v60  ;;  %v4385_v59 = vld [vmem:[#allocation7 + $0x368] ss:$100 sps:$4 sm:$0xff]  }
 0x1d8   :  { %3034 = vmatprep.subr.bf16.mxu0 %v4309_v61  ;;  %v4390_v60 = vld [vmem:[#allocation7 + $0x42c] ss:$100 sps:$4 sm:$0xff]   ;;  %v4393_v61 = vld [vmem:[#allocation7 + $0x434] ss:$100 sps:$4 sm:$0xff]  }
 0x1da   :  { %2994 = vmatpush1.bf16.msra.mxu1 %v4304_v62  ;;  %v4692_v62 = vmov 1966171168  }
 0x1db   :  { %3035 = vmatpush1.bf16.msra.mxu0 %v4307_v63  ;;  %2995 = vmatprep.subr.bf16.mxu1 %v4312_v0  ;;  %v3345_v63 = vunpack.c.l.s4 %v4692_v62  ;;  %v595_v0 = vrot.slane %v4818_v57, %v4786_v11  ;;  %v4435_v62 = vld [vmem:[#allocation7 + $0x9ac] ss:$100 sps:$4 sm:$0xff]  }
 0x1dc   :  { %3036 = vmatprep.subr.bf16.mxu0 %v4315_v1  ;;  %v603_v1 = vrot.slane %v4818_v57, %v4816_v55 }
 0x1de   :  { %2996 = vmatpush1.bf16.msra.mxu1 %v4310_v2  ;;  %v4388_v2 = vld [vmem:[#allocation7 + $0x428] ss:$100 sps:$4 sm:$0xff]  }
 0x1df   :  { %3037 = vmatpush1.bf16.msra.mxu0 %v4313_v3  ;;  %2997 = vmatprep.subr.bf16.mxu1 %v4318_v4  ;;  %v599_v3 = vrot.slane %v4818_v57, %v4789_v13  ;;  %v607_v4 = vrot.slane %v4818_v57, %v4821_v58 }
 0x1e0   :  { %3038 = vmatprep.subr.bf16.mxu0 %v4321_v5  ;;  %v4391_v5 = vld [vmem:[#allocation7 + $0x430] ss:$100 sps:$4 sm:$0xff]  }
 0x1e2   :  { %2998 = vmatpush1.bf16.msra.mxu1 %v4316_v6  ;;  %v4396_v6 = vld [vmem:[#allocation7 + $0x4f4] ss:$100 sps:$4 sm:$0xff]  }
 0x1e3   :  { %3039 = vmatpush1.bf16.msra.mxu0 %v4319_v7  ;;  %2999 = vmatprep.subr.bf16.mxu1 %v4324_v8 }
 0x1e4   :  { %3040 = vmatprep.subr.bf16.mxu0 %v4327_v9  ;;  %v3346_v9 = vunpack.c.0.s8 %v3345_v63  ;;  %v4430_v63 = vld [vmem:[#allocation7 + $0x9a0] ss:$100 sps:$4 sm:$0xff]  }
 0x1e6   :  { %3000 = vmatpush1.bf16.msra.mxu1 %v4322_v12  ;;  %v4399_v12 = vld [vmem:[#allocation7 + $0x4fc] ss:$100 sps:$4 sm:$0xff]  }
 0x1e7   :  { %3041 = vmatpush1.bf16.msra.mxu0 %v4325_v14  ;;  %3001 = vmatprep.subr.bf16.mxu1 %v4330_v15 }
 0x1e8   :  { %3042 = vmatprep.subr.bf16.mxu0 %v4333_v16 }
 0x1ea   :  { %3002 = vmatpush1.bf16.msra.mxu1 %v4328_v17 }
 0x1eb   :  { %3043 = vmatpush1.bf16.msra.mxu0 %v4331_v18  ;;  %3003 = vmatprep.subr.bf16.mxu1 %v4336_v19 }
 0x1ec   :  { %3044 = vmatprep.subr.bf16.mxu0 %v4339_v20 }
 0x1ee   :  { %3004 = vmatpush1.bf16.msra.mxu1 %v4334_v21 }
 0x1ef   :  { %3045 = vmatpush1.bf16.msra.mxu0 %v4337_v23  ;;  %3005 = vmatprep.subr.bf16.mxu1 %v4342_v24  ;;  %v4394_v23 = vld [vmem:[#allocation7 + $0x4f0] ss:$100 sps:$4 sm:$0xff]   ;;  %v4397_v24 = vld [vmem:[#allocation7 + $0x4f8] ss:$100 sps:$4 sm:$0xff]  }
 0x1f0   :  { %3046 = vmatprep.subr.bf16.mxu0 %v4345_v26 }
 0x1f2   :  { %3006 = vmatpush1.bf16.msra.mxu1 %v4340_v27 }
 0x1f3   :  { %3047 = vmatpush1.bf16.msra.mxu0 %v4343_v28  ;;  %3007 = vmatprep.subr.bf16.mxu1 %v4348_v29 }
 0x1f4   :  { %3048 = vmatprep.subr.bf16.mxu0 %v4351_v30  ;;  %v4402_v30 = vld [vmem:[#allocation7 + $0x5bc] ss:$100 sps:$4 sm:$0xff]  }
 0x1f6   :  { %3008 = vmatpush1.bf16.msra.mxu1 %v4346_v31 }
 0x1f7   :  { %3049 = vmatpush1.bf16.msra.mxu0 %v4349_v32  ;;  %3009 = vmatprep.subr.bf16.mxu1 %v4354_v33  ;;  %v4832_v32 = vsub.s32 %v3346_v9, %v4783_v10  ;;  %v4450_v9 = vld [vmem:[#allocation7 + $0xbfc] ss:$100 sps:$4 sm:$0xff]  }
 0x1f8   :  { %3050 = vmatprep.subr.bf16.mxu0 %v4357_v34  ;;  %v4405_v34 = vld [vmem:[#allocation7 + $0x5c4] ss:$100 sps:$4 sm:$0xff]  }
 0x1fa   :  { %3010 = vmatpush1.bf16.msra.mxu1 %v4352_v35 }
 0x1fb   :  { %3051 = vmatpush1.bf16.msra.mxu0 %v4355_v36  ;;  %3061 = vmatprep.subr.bf16.mxu1 %v4360_v37  ;;  %v4400_v37 = vld [vmem:[#allocation7 + $0x5b8] ss:$100 sps:$4 sm:$0xff]  }
 0x1fc   :  { %3102 = vmatprep.subr.bf16.mxu0 %v4363_v38  ;;  %v4403_v38 = vld [vmem:[#allocation7 + $0x5c0] ss:$100 sps:$4 sm:$0xff]  }
 0x1fd   :  { %3012 = vmatmul.mubr.bf16.vlgmr.msra.gmra.mrb[12].mxu1 %v4795_v25 }
 0x1fe   :  { %3053 = vmatmul.mubr.bf16.vlgmr.msra.gmra.mrb[16].mxu0 %v4795_v25  ;;  %3062 = vmatpush1.bf16.msra.mxu1 %v4358_v39  ;;  %v4408_v39 = vld [vmem:[#allocation7 + $0x684] ss:$100 sps:$4 sm:$0xff]  }
 0x1ff   :  { %3093 = vmatprep.mubr.bf16.mxu1 %v4793_v22  ;;  %3103 = vmatpush1.bf16.msra.mxu0 %v4361_v40 }
 0x200   :  { %3134 = vmatprep.mubr.bf16.mxu0 %v4793_v22  ;;  %3063 = vmatprep.subr.bf16.mxu1 %v4366_v41 }
 0x201   :  { %3104 = vmatprep.subr.bf16.mxu0 %v4369_v42  ;;  %v4411_v42 = vld [vmem:[#allocation7 + $0x68c] ss:$100 sps:$4 sm:$0xff]  }
 0x202   :  { %3064 = vmatpush1.bf16.msra.mxu1 %v4364_v43 }
 0x203   :  { %3105 = vmatpush1.bf16.msra.mxu0 %v4367_v44  ;;  %3065 = vmatprep.subr.bf16.mxu1 %v4372_v45  ;;  %v4406_v44 = vld [vmem:[#allocation7 + $0x680] ss:$100 sps:$4 sm:$0xff]   ;;  %v4409_v45 = vld [vmem:[#allocation7 + $0x688] ss:$100 sps:$4 sm:$0xff]  }
 0x204   :  { %3106 = vmatprep.subr.bf16.mxu0 %v4375_v46  ;;  %v4414_v46 = vld [vmem:[#allocation7 + $0x74c] ss:$100 sps:$4 sm:$0xff]  }
 0x206   :  { %3066 = vmatpush1.bf16.msra.mxu1 %v4370_v47  ;;  %v4417_v47 = vld [vmem:[#allocation7 + $0x754] ss:$100 sps:$4 sm:$0xff]  }
 0x207   :  { %3107 = vmatpush1.bf16.msra.mxu0 %v4373_v48  ;;  %3067 = vmatprep.subr.bf16.mxu1 %v4378_v49  ;;  %v4412_v48 = vld [vmem:[#allocation7 + $0x748] ss:$100 sps:$4 sm:$0xff]   ;;  %v4415_v49 = vld [vmem:[#allocation7 + $0x750] ss:$100 sps:$4 sm:$0xff]  }
 0x208   :  { %3108 = vmatprep.subr.bf16.mxu0 %v4381_v50  ;;  %v4420_v50 = vld [vmem:[#allocation7 + $0x814] ss:$100 sps:$4 sm:$0xff]  }
 0x20a   :  { %3068 = vmatpush1.bf16.msra.mxu1 %v4376_v51  ;;  %v4423_v51 = vld [vmem:[#allocation7 + $0x81c] ss:$100 sps:$4 sm:$0xff]  }
 0x20b   :  { %3109 = vmatpush1.bf16.msra.mxu0 %v4379_v52  ;;  %3069 = vmatprep.subr.bf16.mxu1 %v4384_v53  ;;  %v4418_v52 = vld [vmem:[#allocation7 + $0x810] ss:$100 sps:$4 sm:$0xff]   ;;  %v4421_v53 = vld [vmem:[#allocation7 + $0x818] ss:$100 sps:$4 sm:$0xff]  }
 0x20c   :  { %3110 = vmatprep.subr.bf16.mxu0 %v4387_v54  ;;  %v4426_v54 = vld [vmem:[#allocation7 + $0x8dc] ss:$100 sps:$4 sm:$0xff]  }
 0x20e   :  { %3070 = vmatpush1.bf16.msra.mxu1 %v4382_v56  ;;  %v4429_v56 = vld [vmem:[#allocation7 + $0x8e4] ss:$100 sps:$4 sm:$0xff]  }
 0x20f   :  { %3111 = vmatpush1.bf16.msra.mxu0 %v4385_v59  ;;  %3071 = vmatprep.subr.bf16.mxu1 %v4390_v60  ;;  %v4424_v59 = vld [vmem:[#allocation7 + $0x8d8] ss:$100 sps:$4 sm:$0xff]   ;;  %v4427_v60 = vld [vmem:[#allocation7 + $0x8e0] ss:$100 sps:$4 sm:$0xff]  }
 0x210   :  { %v2767_v7 = vpop.f32.mrb[0].mxu1  ;;  %v2808_v8 = vpop.f32.mrb[4].mxu0  ;;  %3112 = vmatprep.subr.bf16.mxu0 %v4393_v61  ;;  %v4432_v61 = vld [vmem:[#allocation7 + $0x9a4] ss:$100 sps:$4 sm:$0xff]  }
 0x211   :  { %v2768_v14 = vadd.f32 %v2767_v7, %v595_v0  ;;  %v2809_v15 = vadd.f32 %v2808_v8, %v603_v1  ;;  %v2769_v16 = vpop.f32.mrb[1].mxu1  ;;  %v2810_v17 = vpop.f32.mrb[5].mxu0  ;;  %v4433_v0 = vld [vmem:[#allocation7 + $0x9a8] ss:$100 sps:$4 sm:$0xff]   ;;  %v4442_v7 = vld [vmem:[#allocation7 + $0xb30] ss:$100 sps:$4 sm:$0xff]  }
 0x212   :  { %v2770_v18 = vadd.f32 %v2769_v16, %v599_v3  ;;  %v2811_v19 = vadd.f32 %v2810_v17, %v607_v4  ;;  %3072 = vmatpush1.bf16.msra.mxu1 %v4388_v2  ;;  %v2771_v20 = vpop.f32.mrb[2].mxu1  ;;  %v2812_v21 = vpop.f32.mrb[6].mxu0  ;;  %v4438_v1 = vld [vmem:[#allocation7 + $0xa6c] ss:$100 sps:$4 sm:$0xff]   ;;  %v4441_v2 = vld [vmem:[#allocation7 + $0xa74] ss:$100 sps:$4 sm:$0xff]  }
 0x213   :  { %v3265_v26 = vmax.f32 %v2768_v14, 0.0  ;;  %v3267_v27 = vmax.f32 %v2809_v15, 0.0  ;;  %3113 = vmatpush1.bf16.msra.mxu0 %v4391_v5  ;;  %v2772_v28 = vpop.f32.mrb[3].mxu1  ;;  %v2813_v29 = vpop.f32.mrb[7].mxu0  ;;  %3073 = vmatprep.subr.bf16.mxu1 %v4396_v6  ;;  %v4436_v3 = vld [vmem:[#allocation7 + $0xa68] ss:$100 sps:$4 sm:$0xff]  }
 0x214   :  { %v3266_v31 = vmax.f32 %v2770_v18, 0.0  ;;  %v3268_v33 = vmax.f32 %v2811_v19, 0.0  ;;  %3114 = vmatprep.subr.bf16.mxu0 %v4399_v12  ;;  %v4439_v4 = vld [vmem:[#allocation7 + $0xa70] ss:$100 sps:$4 sm:$0xff]   ;;  %v4447_v6 = vld [vmem:[#allocation7 + $0xb3c] ss:$100 sps:$4 sm:$0xff]  }
 0x215   :  { %v4444_v5 = vld [vmem:[#allocation7 + $0xb34] ss:$100 sps:$4 sm:$0xff]   ;;  %v4453_v12 = vld [vmem:[#allocation7 + $0xc04] ss:$100 sps:$4 sm:$0xff]   ;;  %v4459_v17 = vld [vmem:[#allocation7 + $0x5c] ss:$100 sps:$4 sm:$0xff]  }
 0x216   :  { %v3922_v35 = vpack.c.bf16 %v3266_v31, %v3265_v26  ;;  %v3923_v36 = vpack.c.bf16 %v3268_v33, %v3267_v27  ;;  %3074 = vmatpush1.bf16.msra.mxu1 %v4394_v23  ;;  %v4445_v8 = vld [vmem:[#allocation7 + $0xb38] ss:$100 sps:$4 sm:$0xff]   ;;  %v4451_v15 = vld [vmem:[#allocation7 + $0xc00] ss:$100 sps:$4 sm:$0xff]   ;;  %v4454_v18 = vld [vmem:[#allocation7 + $0x50] ss:$100 sps:$4 sm:$0xff]  }
 0x217   :  { %3115 = vmatpush1.bf16.msra.mxu0 %v4397_v24  ;;  %3075 = vmatprep.subr.bf16.mxu1 %v4402_v30  ;;  %v4448_v14 = vld [vmem:[#allocation7 + $0xbf8] ss:$100 sps:$4 sm:$0xff]   ;;  %v4465_v21 = vld [vmem:[#allocation7 + $0x124] ss:$100 sps:$4 sm:$0xff]   ;;  %v4471_v27 = vld [vmem:[#allocation7 + $0x1ec] ss:$100 sps:$4 sm:$0xff]  }
 0x218   :  { %v3350_v40 = vrot.slane %v3922_v35, %v4832_v32  ;;  %v3357_v41 = vrot.slane %v3923_v36, %v4832_v32  ;;  %3116 = vmatprep.subr.bf16.mxu0 %v4405_v34  ;;  %v4456_v16 = vld [vmem:[#allocation7 + $0x54] ss:$100 sps:$4 sm:$0xff]   ;;  %v4462_v20 = vld [vmem:[#allocation7 + $0x11c] ss:$100 sps:$4 sm:$0xff]   ;;  %v4468_v26 = vld [vmem:[#allocation7 + $0x1e4] ss:$100 sps:$4 sm:$0xff]  }
 0x219   :  { %v4457_v19 = vld [vmem:[#allocation7 + $0x58] ss:$100 sps:$4 sm:$0xff]   ;;  %v4463_v24 = vld [vmem:[#allocation7 + $0x120] ss:$100 sps:$4 sm:$0xff]   ;;  %v4469_v29 = vld [vmem:[#allocation7 + $0x1e8] ss:$100 sps:$4 sm:$0xff]  }
 0x21a   :  { %v4836_v43 = vcombine.low %v3350_v40, %v3357_v41  ;;  %3076 = vmatpush1.bf16.msra.mxu1 %v4400_v37  ;;  %v4460_v23 = vld [vmem:[#allocation7 + $0x118] ss:$100 sps:$4 sm:$0xff]   ;;  %v4466_v28 = vld [vmem:[#allocation7 + $0x1e0] ss:$100 sps:$4 sm:$0xff]   ;;  %v4474_v30 = vld [vmem:[#allocation7 + $0x2ac] ss:$100 sps:$4 sm:$0xff]  }
 0x21b   :  { %3117 = vmatpush1.bf16.msra.mxu0 %v4403_v38  ;;  %3077 = vmatprep.subr.bf16.mxu1 %v4408_v39  ;;  %v4477_v31 = vld [vmem:[#allocation7 + $0x2b4] ss:$100 sps:$4 sm:$0xff]   ;;  %v4472_v33 = vld [vmem:[#allocation7 + $0x2a8] ss:$100 sps:$4 sm:$0xff]   ;;  %v4483_v36 = vld [vmem:[#allocation7 + $0x37c] ss:$100 sps:$4 sm:$0xff]  }
 0x21c   :  { %3118 = vmatprep.subr.bf16.mxu0 %v4411_v42  ;;  %v4475_v34 = vld [vmem:[#allocation7 + $0x2b0] ss:$100 sps:$4 sm:$0xff]   ;;  %v4843_v37 = vsub.s32 4, %v4783_v10  ;;  %v4846_v38 = vsub.s32 6, %v4783_v10  ;;  %v4849_v40 = vsub.s32 5, %v4783_v10  ;;  %v4852_v41 = vsub.s32 7, %v4783_v10 }
 0x21d   :  { %v4480_v35 = vld [vmem:[#allocation7 + $0x374] ss:$100 sps:$4 sm:$0xff]  }
 0x21e   :  { %3078 = vmatpush1.bf16.msra.mxu1 %v4406_v44  ;;  %v4478_v39 = vld [vmem:[#allocation7 + $0x370] ss:$100 sps:$4 sm:$0xff]   ;;  %v4481_v42 = vld [vmem:[#allocation7 + $0x378] ss:$100 sps:$4 sm:$0xff]   ;;  %v623_v10 = vrot.slane %v4818_v57, %v4852_v41 }
 0x21f   :  { %3119 = vmatpush1.bf16.msra.mxu0 %v4409_v45  ;;  %3079 = vmatprep.subr.bf16.mxu1 %v4414_v46  ;;  %v4486_v44 = vld [vmem:[#allocation7 + $0x43c] ss:$100 sps:$4 sm:$0xff]   ;;  %v4489_v45 = vld [vmem:[#allocation7 + $0x444] ss:$100 sps:$4 sm:$0xff]   ;;  %v611_v46 = vrot.slane %v4818_v57, %v4843_v37 }
 0x220   :  { %3120 = vmatprep.subr.bf16.mxu0 %v4417_v47  ;;  %v619_v47 = vrot.slane %v4818_v57, %v4846_v38 }
 0x222   :  { %3080 = vmatpush1.bf16.msra.mxu1 %v4412_v48  ;;  %v615_v48 = vrot.slane %v4818_v57, %v4849_v40  ;;  %v4493_v57 = vld [vmem:[#allocation7 + $0x508] ss:$100 sps:$4 sm:$0xff]  }
 0x223   :  { %3121 = vmatpush1.bf16.msra.mxu0 %v4415_v49  ;;  %3081 = vmatprep.subr.bf16.mxu1 %v4420_v50  ;;  %v4484_v49 = vld [vmem:[#allocation7 + $0x438] ss:$100 sps:$4 sm:$0xff]   ;;  %v4487_v50 = vld [vmem:[#allocation7 + $0x440] ss:$100 sps:$4 sm:$0xff]  }
 0x224   :  { %3122 = vmatprep.subr.bf16.mxu0 %v4423_v51  ;;  %v4492_v51 = vld [vmem:[#allocation7 + $0x504] ss:$100 sps:$4 sm:$0xff]  }
 0x226   :  { %3082 = vmatpush1.bf16.msra.mxu1 %v4418_v52 }
 0x227   :  { %3123 = vmatpush1.bf16.msra.mxu0 %v4421_v53  ;;  %3083 = vmatprep.subr.bf16.mxu1 %v4426_v54  ;;  %v4495_v54 = vld [vmem:[#allocation7 + $0x50c] ss:$100 sps:$4 sm:$0xff]  }
 0x228   :  { %3124 = vmatprep.subr.bf16.mxu0 %v4429_v56 }
 0x22a   :  { %3084 = vmatpush1.bf16.msra.mxu1 %v4424_v59 }
 0x22b   :  { %3125 = vmatpush1.bf16.msra.mxu0 %v4427_v60  ;;  %3085 = vmatprep.subr.bf16.mxu1 %v4432_v61 }
 0x22c   :  { %3126 = vmatprep.subr.bf16.mxu0 %v4435_v62 }
 0x22e   :  { %3086 = vmatpush1.bf16.msra.mxu1 %v4430_v63 }
 0x22f   :  { %3127 = vmatpush1.bf16.msra.mxu0 %v4433_v0  ;;  %3087 = vmatprep.subr.bf16.mxu1 %v4438_v1 }
 0x230   :  { %3128 = vmatprep.subr.bf16.mxu0 %v4441_v2  ;;  %v4490_v2 = vld [vmem:[#allocation7 + $0x500] ss:$100 sps:$4 sm:$0xff]  }
 0x232   :  { %3088 = vmatpush1.bf16.msra.mxu1 %v4436_v3 }
 0x233   :  { %3129 = vmatpush1.bf16.msra.mxu0 %v4439_v4  ;;  %3089 = vmatprep.subr.bf16.mxu1 %v4444_v5 }
 0x234   :  { %3130 = vmatprep.subr.bf16.mxu0 %v4447_v6 }
 0x236   :  { %3090 = vmatpush1.bf16.msra.mxu1 %v4442_v7  ;;  %v4498_v7 = vld [vmem:[#allocation7 + $0x5cc] ss:$100 sps:$4 sm:$0xff]  }
 0x237   :  { %3131 = vmatpush1.bf16.msra.mxu0 %v4445_v8  ;;  %3091 = vmatprep.subr.bf16.mxu1 %v4450_v9 }
 0x238   :  { %3132 = vmatprep.subr.bf16.mxu0 %v4453_v12  ;;  %v4501_v12 = vld [vmem:[#allocation7 + $0x5d4] ss:$100 sps:$4 sm:$0xff]  }
 0x23a   :  { %3092 = vmatpush1.bf16.msra.mxu1 %v4448_v14 }
 0x23b   :  { %3133 = vmatpush1.bf16.msra.mxu0 %v4451_v15  ;;  %3143 = vmatprep.subr.bf16.mxu1 %v4456_v16  ;;  %v4496_v16 = vld [vmem:[#allocation7 + $0x5c8] ss:$100 sps:$4 sm:$0xff]  }
 0x23c   :  { %3184 = vmatprep.subr.bf16.mxu0 %v4459_v17  ;;  %v4499_v17 = vld [vmem:[#allocation7 + $0x5d0] ss:$100 sps:$4 sm:$0xff]  }
 0x23d   :  { %3094 = vmatmul.mubr.bf16.vlgmr.msra.gmra.mrb[16].mxu1 %v4795_v25 }
 0x23e   :  { %3135 = vmatmul.mubr.bf16.vlgmr.msra.gmra.mrb[20].mxu0 %v4795_v25  ;;  %3144 = vmatpush1.bf16.msra.mxu1 %v4454_v18  ;;  %v4504_v18 = vld [vmem:[#allocation7 + $0x694] ss:$100 sps:$4 sm:$0xff]  }
 0x23f   :  { %3175 = vmatprep.mubr.bf16.mxu1 %v4793_v22  ;;  %3185 = vmatpush1.bf16.msra.mxu0 %v4457_v19 }
 0x240   :  { %3216 = vmatprep.mubr.bf16.mxu0 %v4793_v22  ;;  %3145 = vmatprep.subr.bf16.mxu1 %v4462_v20 }
 0x241   :  { %3186 = vmatprep.subr.bf16.mxu0 %v4465_v21  ;;  %v4507_v21 = vld [vmem:[#allocation7 + $0x69c] ss:$100 sps:$4 sm:$0xff]  }
 0x242   :  { %3146 = vmatpush1.bf16.msra.mxu1 %v4460_v23 }
 0x243   :  { %3187 = vmatpush1.bf16.msra.mxu0 %v4463_v24  ;;  %3147 = vmatprep.subr.bf16.mxu1 %v4468_v26  ;;  %v4502_v24 = vld [vmem:[#allocation7 + $0x690] ss:$100 sps:$4 sm:$0xff]   ;;  %v4505_v26 = vld [vmem:[#allocation7 + $0x698] ss:$100 sps:$4 sm:$0xff]  }
 0x244   :  { %3188 = vmatprep.subr.bf16.mxu0 %v4471_v27  ;;  %v4510_v27 = vld [vmem:[#allocation7 + $0x75c] ss:$100 sps:$4 sm:$0xff]  }
 0x246   :  { %3148 = vmatpush1.bf16.msra.mxu1 %v4466_v28  ;;  %v3380_v28 = vrot.slane %v4836_v43, %v4832_v32  ;;  %v4517_v43 = vld [vmem:[#allocation7 + $0x828] ss:$100 sps:$4 sm:$0xff]  }
 0x247   :  { %3189 = vmatpush1.bf16.msra.mxu0 %v4469_v29  ;;  %3149 = vmatprep.subr.bf16.mxu1 %v4474_v30  ;;  %v4513_v30 = vld [vmem:[#allocation7 + $0x764] ss:$100 sps:$4 sm:$0xff]  }
 0x248   :  { %3190 = vmatprep.subr.bf16.mxu0 %v4477_v31 }
 0x24a   :  { %3150 = vmatpush1.bf16.msra.mxu1 %v4472_v33  ;;  %v4508_v33 = vld [vmem:[#allocation7 + $0x758] ss:$100 sps:$4 sm:$0xff]  }
 0x24b   :  { %3191 = vmatpush1.bf16.msra.mxu0 %v4475_v34  ;;  %3151 = vmatprep.subr.bf16.mxu1 %v4480_v35  ;;  %v4511_v34 = vld [vmem:[#allocation7 + $0x760] ss:$100 sps:$4 sm:$0xff]  }
 0x24c   :  { %3192 = vmatprep.subr.bf16.mxu0 %v4483_v36  ;;  %v4516_v35 = vld [vmem:[#allocation7 + $0x824] ss:$100 sps:$4 sm:$0xff]   ;;  %v4519_v36 = vld [vmem:[#allocation7 + $0x82c] ss:$100 sps:$4 sm:$0xff]  }
 0x24e   :  { %3152 = vmatpush1.bf16.msra.mxu1 %v4478_v39  ;;  %v4514_v39 = vld [vmem:[#allocation7 + $0x820] ss:$100 sps:$4 sm:$0xff]  }
 0x24f   :  { %3193 = vmatpush1.bf16.msra.mxu0 %v4481_v42  ;;  %3153 = vmatprep.subr.bf16.mxu1 %v4486_v44  ;;  %v4522_v42 = vld [vmem:[#allocation7 + $0x8ec] ss:$100 sps:$4 sm:$0xff]   ;;  %v4525_v44 = vld [vmem:[#allocation7 + $0x8f4] ss:$100 sps:$4 sm:$0xff]  }
 0x250   :  { %v2849_v52 = vpop.f32.mrb[4].mxu1  ;;  %v2890_v53 = vpop.f32.mrb[8].mxu0  ;;  %3194 = vmatprep.subr.bf16.mxu0 %v4489_v45  ;;  %v4520_v45 = vld [vmem:[#allocation7 + $0x8e8] ss:$100 sps:$4 sm:$0xff]  }
 0x251   :  { %v2850_v56 = vadd.f32 %v2849_v52, %v611_v46  ;;  %v2891_v59 = vadd.f32 %v2890_v53, %v619_v47  ;;  %v2851_v60 = vpop.f32.mrb[5].mxu1  ;;  %v2892_v61 = vpop.f32.mrb[9].mxu0  ;;  %v4523_v46 = vld [vmem:[#allocation7 + $0x8f0] ss:$100 sps:$4 sm:$0xff]   ;;  %v4532_v52 = vld [vmem:[#allocation7 + $0xa78] ss:$100 sps:$4 sm:$0xff]  }
 0x252   :  { %v2852_v62 = vadd.f32 %v2851_v60, %v615_v48  ;;  %v2893_v63 = vadd.f32 %v2892_v61, %v623_v10  ;;  %v2853_v0 = vpop.f32.mrb[6].mxu1  ;;  %v2894_v1 = vpop.f32.mrb[10].mxu0  ;;  %3154 = vmatpush1.bf16.msra.mxu1 %v4484_v49  ;;  %v4528_v47 = vld [vmem:[#allocation7 + $0x9b4] ss:$100 sps:$4 sm:$0xff]   ;;  %v4531_v48 = vld [vmem:[#allocation7 + $0x9bc] ss:$100 sps:$4 sm:$0xff]  }
 0x253   :  { %v3269_v3 = vmax.f32 %v2850_v56, 0.0  ;;  %v3271_v4 = vmax.f32 %v2891_v59, 0.0  ;;  %3195 = vmatpush1.bf16.msra.mxu0 %v4487_v50  ;;  %v2854_v5 = vpop.f32.mrb[7].mxu1  ;;  %v2895_v6 = vpop.f32.mrb[11].mxu0  ;;  %3155 = vmatprep.subr.bf16.mxu1 %v4492_v51  ;;  %v4526_v10 = vld [vmem:[#allocation7 + $0x9b0] ss:$100 sps:$4 sm:$0xff]  }
 0x254   :  { %v3270_v8 = vmax.f32 %v2852_v62, 0.0  ;;  %v3272_v9 = vmax.f32 %v2893_v63, 0.0  ;;  %3196 = vmatprep.subr.bf16.mxu0 %v4495_v54  ;;  %v4529_v49 = vld [vmem:[#allocation7 + $0x9b8] ss:$100 sps:$4 sm:$0xff]   ;;  %v4537_v51 = vld [vmem:[#allocation7 + $0xa84] ss:$100 sps:$4 sm:$0xff]  }
 0x255   :  { %v4534_v50 = vld [vmem:[#allocation7 + $0xa7c] ss:$100 sps:$4 sm:$0xff]   ;;  %v4540_v54 = vld [vmem:[#allocation7 + $0xb44] ss:$100 sps:$4 sm:$0xff]   ;;  %v4543_v56 = vld [vmem:[#allocation7 + $0xb4c] ss:$100 sps:$4 sm:$0xff]  }
 0x256   :  { %v3924_v14 = vpack.c.bf16 %v3270_v8, %v3269_v3  ;;  %v3925_v15 = vpack.c.bf16 %v3272_v9, %v3271_v4  ;;  %3156 = vmatpush1.bf16.msra.mxu1 %v4490_v2  ;;  %v4535_v53 = vld [vmem:[#allocation7 + $0xa80] ss:$100 sps:$4 sm:$0xff]   ;;  %v4541_v60 = vld [vmem:[#allocation7 + $0xb48] ss:$100 sps:$4 sm:$0xff]   ;;  %v4549_v62 = vld [vmem:[#allocation7 + $0xc14] ss:$100 sps:$4 sm:$0xff]  }
 0x257   :  { %3197 = vmatpush1.bf16.msra.mxu0 %v4493_v57  ;;  %3157 = vmatprep.subr.bf16.mxu1 %v4498_v7  ;;  %v4538_v59 = vld [vmem:[#allocation7 + $0xb40] ss:$100 sps:$4 sm:$0xff]   ;;  %v4546_v61 = vld [vmem:[#allocation7 + $0xc0c] ss:$100 sps:$4 sm:$0xff]   ;;  %v4556_v6 = vld [vmem:[#allocation7 + $0x8f8] ss:$100 sps:$4 sm:$0xff]  }
 0x258   :  { %v3364_v19 = vrot.slane %v3924_v14, %v4832_v32  ;;  %v3371_v20 = vrot.slane %v3925_v15, %v4832_v32  ;;  %3198 = vmatprep.subr.bf16.mxu0 %v4501_v12  ;;  %v4544_v63 = vld [vmem:[#allocation7 + $0xc08] ss:$100 sps:$4 sm:$0xff]   ;;  %v4547_v0 = vld [vmem:[#allocation7 + $0xc10] ss:$100 sps:$4 sm:$0xff]   ;;  %v4550_v1 = vld [vmem:[#allocation7 + $0x6a0] ss:$100 sps:$4 sm:$0xff]  }
 0x259   :  { %v4551_v2 = vld [vmem:[#allocation7 + $0x60] ss:$100 sps:$4 sm:$0xff]   ;;  %v4552_v57 = vld [vmem:[#allocation7 + $0x768] ss:$100 sps:$4 sm:$0xff]   ;;  %v4554_v4 = vld [vmem:[#allocation7 + $0x830] ss:$100 sps:$4 sm:$0xff]  }
 0x25a   :  { %v3373_v23 = vcombine.low %v3364_v19, %v3371_v20  ;;  %3158 = vmatpush1.bf16.msra.mxu1 %v4496_v16  ;;  %v4553_v3 = vld [vmem:[#allocation7 + $0x128] ss:$100 sps:$4 sm:$0xff]   ;;  %v4555_v5 = vld [vmem:[#allocation7 + $0x1f0] ss:$100 sps:$4 sm:$0xff]   ;;  %v4557_v7 = vld [vmem:[#allocation7 + $0x2b8] ss:$100 sps:$4 sm:$0xff]  }
 0x25b   :  { %3199 = vmatpush1.bf16.msra.mxu0 %v4499_v17  ;;  %3159 = vmatprep.subr.bf16.mxu1 %v4504_v18  ;;  %v4558_v8 = vld [vmem:[#allocation7 + $0x9c0] ss:$100 sps:$4 sm:$0xff]   ;;  %v585_v12 = vld [vmem:[#allocation9 + $0x8] sm:$0xff]  ;;  %v4562_v19 = vld [vmem:[#allocation7 + $0xb50] ss:$100 sps:$4 sm:$0xff]  }
 0x25c   :  { %v3387_v29 = vrot.slane %v3373_v23, %v4832_v32  ;;  %3200 = vmatprep.subr.bf16.mxu0 %v4507_v21  ;;  %v4559_v9 = vld [vmem:[#allocation7 + $0x380] ss:$100 sps:$4 sm:$0xff]   ;;  %v4560_v14 = vld [vmem:[#allocation7 + $0xa88] ss:$100 sps:$4 sm:$0xff]   ;;  %v627_v15 = vrot.slane %v585_v12, %v4786_v11  ;;  %v631_v16 = vrot.slane %v585_v12, %v4789_v13  ;;  %v639_v18 = vrot.slane %v585_v12, %v4821_v58 }
 0x25d   :  { %v4561_v17 = vld [vmem:[#allocation7 + $0x448] ss:$100 sps:$4 sm:$0xff]  }
 0x25e   :  { %v3388_v31 = vcombine.low %v3380_v28, %v3387_v29  ;;  %3160 = vmatpush1.bf16.msra.mxu1 %v4502_v24 }
 0x25f   :  { %3201 = vmatpush1.bf16.msra.mxu0 %v4505_v26  ;;  %3161 = vmatprep.subr.bf16.mxu1 %v4510_v27 }
 0x260   :  { %3505 = vst [vmem:[%s4917_s5] sm:$0xff] %v3388_v31  ;;  %3202 = vmatprep.subr.bf16.mxu0 %v4513_v30  ;;  %v4563_v30 = vld [vmem:[#allocation7 + $0x510] ss:$100 sps:$4 sm:$0xff]  }
 0x262   :  { %3162 = vmatpush1.bf16.msra.mxu1 %v4508_v33 }
 0x263   :  { %3203 = vmatpush1.bf16.msra.mxu0 %v4511_v34  ;;  %3163 = vmatprep.subr.bf16.mxu1 %v4516_v35 }
 0x264   :  { %3204 = vmatprep.subr.bf16.mxu0 %v4519_v36  ;;  %v4564_v36 = vld [vmem:[#allocation7 + $0xc18] ss:$100 sps:$4 sm:$0xff]  }
 0x266   :  { %3164 = vmatpush1.bf16.msra.mxu1 %v4514_v39 }
 0x267   :  { %3205 = vmatpush1.bf16.msra.mxu0 %v4517_v43  ;;  %3165 = vmatprep.subr.bf16.mxu1 %v4522_v42 }
 0x268   :  { %3206 = vmatprep.subr.bf16.mxu0 %v4525_v44 }
 0x26a   :  { %3166 = vmatpush1.bf16.msra.mxu1 %v4520_v45 }
 0x26b   :  { %3207 = vmatpush1.bf16.msra.mxu0 %v4523_v46  ;;  %3167 = vmatprep.subr.bf16.mxu1 %v4528_v47  ;;  %v4565_v46 = vld [vmem:[#allocation7 + $0x5d8] ss:$100 sps:$4 sm:$0xff]  }
 0x26c   :  { %3208 = vmatprep.subr.bf16.mxu0 %v4531_v48 }
 0x26e   :  { %3168 = vmatpush1.bf16.msra.mxu1 %v4526_v10 }
 0x26f   :  { %3209 = vmatpush1.bf16.msra.mxu0 %v4529_v49  ;;  %3169 = vmatprep.subr.bf16.mxu1 %v4534_v50  ;;  %v643_v50 = vrot.slane %v585_v12, %v4843_v37 }
 0x270   :  { %3210 = vmatprep.subr.bf16.mxu0 %v4537_v51  ;;  %v651_v51 = vrot.slane %v585_v12, %v4846_v38 }
 0x272   :  { %3170 = vmatpush1.bf16.msra.mxu1 %v4532_v52  ;;  %v647_v52 = vrot.slane %v585_v12, %v4849_v40 }
 0x273   :  { %3211 = vmatpush1.bf16.msra.mxu0 %v4535_v53  ;;  %3171 = vmatprep.subr.bf16.mxu1 %v4540_v54  ;;  %v655_v53 = vrot.slane %v585_v12, %v4852_v41 }
 0x274   :  { %3212 = vmatprep.subr.bf16.mxu0 %v4543_v56 }
 0x276   :  { %3172 = vmatpush1.bf16.msra.mxu1 %v4538_v59 }
 0x277   :  { %3213 = vmatpush1.bf16.msra.mxu0 %v4541_v60  ;;  %3173 = vmatprep.subr.bf16.mxu1 %v4546_v61 }
 0x278   :  { %3214 = vmatprep.subr.bf16.mxu0 %v4549_v62 }
 0x27a   :  { %3174 = vmatpush1.bf16.msra.mxu1 %v4544_v63 }
 0x27b   :  { %3215 = vmatpush1.bf16.msra.mxu0 %v4547_v0  ;;  %3935 = vmatprep.subr.bf16.mxu1 %v4550_v1 }
 0x27d   :  { %3176 = vmatmul.mubr.bf16.vlgmr.msra.gmra.mrb[20].mxu1 %v4795_v25 }
 0x27e   :  { %3217 = vmatmul.mubr.bf16.vlgmr.msra.gmra.mrb[24].mxu0 %v4795_v25  ;;  %3936 = vmatpush3.bf16.msra.mxu1 %v4551_v2 }
 0x27f   :  { %3257 = vmatprep.mubr.bf16.mxu1 %v4793_v22  ;;  %3937 = vmatprep.subr.bf16.mxu1 %v4552_v57  ;;  %v635_v22 = vrot.slane %v585_v12, %v4816_v55 }
 0x282   :  { %3938 = vmatpush3.bf16.msra.mxu1 %v4553_v3 }
 0x283   :  { %3939 = vmatprep.subr.bf16.mxu1 %v4554_v4 }
 0x286   :  { %3940 = vmatpush3.bf16.msra.mxu1 %v4555_v5 }
 0x287   :  { %3941 = vmatprep.subr.bf16.mxu1 %v4556_v6 }
 0x28a   :  { %3942 = vmatpush3.bf16.msra.mxu1 %v4557_v7 }
 0x28b   :  { %3943 = vmatprep.subr.bf16.mxu1 %v4558_v8 }
 0x28e   :  { %3944 = vmatpush3.bf16.msra.mxu1 %v4559_v9 }
 0x28f   :  { %3945 = vmatprep.subr.bf16.mxu1 %v4560_v14 }
 0x290   :  { %v2931_v20 = vpop.f32.mrb[8].mxu1 }
 0x291   :  { %v2932_v21 = vadd.f32 %v2931_v20, %v627_v15  ;;  %v2972_v23 = vpop.f32.mrb[12].mxu0  ;;  %v2933_v24 = vpop.f32.mrb[9].mxu1 }
 0x292   :  { %v2973_v26 = vadd.f32 %v2972_v23, %v635_v22  ;;  %v2934_v27 = vadd.f32 %v2933_v24, %v631_v16  ;;  %v2974_v28 = vpop.f32.mrb[13].mxu0  ;;  %v2935_v29 = vpop.f32.mrb[10].mxu1  ;;  %3946 = vmatpush3.bf16.msra.mxu1 %v4561_v17  ;;  %v586_v17 = vld [vmem:[#allocation9 + $0x10] sm:$0xff] }
 0x293   :  { %v3273_v31 = vmax.f32 %v2932_v21, 0.0  ;;  %v2975_v33 = vadd.f32 %v2974_v28, %v639_v18  ;;  %v2976_v34 = vpop.f32.mrb[14].mxu0  ;;  %v2936_v35 = vpop.f32.mrb[11].mxu1  ;;  %3947 = vmatprep.subr.bf16.mxu1 %v4562_v19  ;;  %v659_v18 = vrot.slane %v586_v17, %v4786_v11  ;;  %v667_v19 = vrot.slane %v586_v17, %v4816_v55 }
 0x294   :  { %v3275_v39 = vmax.f32 %v2973_v26, 0.0  ;;  %v3274_v43 = vmax.f32 %v2934_v27, 0.0  ;;  %v2977_v42 = vpop.f32.mrb[15].mxu0  ;;  %v663_v20 = vrot.slane %v586_v17, %v4789_v13  ;;  %v671_v21 = vrot.slane %v586_v17, %v4821_v58 }
 0x295   :  { %v3276_v44 = vmax.f32 %v2975_v33, 0.0 }
 0x296   :  { %v3926_v45 = vpack.c.bf16 %v3274_v43, %v3273_v31  ;;  %3948 = vmatpush3.bf16.msra.mxu1 %v4563_v30 }
 0x297   :  { %v3927_v47 = vpack.c.bf16 %v3276_v44, %v3275_v39  ;;  %3949 = vmatprep.subr.bf16.mxu1 %v4564_v36 }
 0x298   :  { %v3399_v48 = vrot.slane %v3926_v45, %v4832_v32 }
 0x299   :  { %v3406_v10 = vrot.slane %v3927_v47, %v4832_v32  ;;  %v683_v47 = vrot.slane %v586_v17, %v4846_v38 }
 0x29a   :  { %3950 = vmatpush3.bf16.msra.mxu1 %v4565_v46  ;;  %v675_v46 = vrot.slane %v586_v17, %v4843_v37 }
 0x29b   :  { %v3421_v49 = vcombine.low %v3399_v48, %v3406_v10  ;;  %v679_v48 = vrot.slane %v586_v17, %v4849_v40  ;;  %v687_v10 = vrot.slane %v586_v17, %v4852_v41 }
 0x29d   :  { %3258 = vmatmul.mubr.bf16.vlgmr.msra.gmra.mrb[24].mxu1 %v4795_v25  ;;  %v3429_v15 = vrot.slane %v3421_v49, %v4832_v32 }
 0x2d0   :  { %v3013_v54 = vpop.f32.mrb[12].mxu1 }
 0x2d1   :  { %v3014_v56 = vadd.f32 %v3013_v54, %v643_v50  ;;  %v3054_v59 = vpop.f32.mrb[16].mxu0  ;;  %v3015_v60 = vpop.f32.mrb[13].mxu1 }
 0x2d2   :  { %v3055_v61 = vadd.f32 %v3054_v59, %v651_v51  ;;  %v3016_v62 = vadd.f32 %v3015_v60, %v647_v52  ;;  %v3056_v63 = vpop.f32.mrb[17].mxu0  ;;  %v3017_v0 = vpop.f32.mrb[14].mxu1 }
 0x2d3   :  { %v3277_v1 = vmax.f32 %v3014_v56, 0.0  ;;  %v3057_v2 = vadd.f32 %v3056_v63, %v655_v53  ;;  %v3058_v57 = vpop.f32.mrb[18].mxu0  ;;  %v3018_v25 = vpop.f32.mrb[15].mxu1 }
 0x2d4   :  { %v3279_v3 = vmax.f32 %v3055_v61, 0.0  ;;  %v3278_v4 = vmax.f32 %v3016_v62, 0.0  ;;  %v3059_v5 = vpop.f32.mrb[19].mxu0 }
 0x2d5   :  { %v3280_v6 = vmax.f32 %v3057_v2, 0.0 }
 0x2d6   :  { %v3928_v7 = vpack.c.bf16 %v3278_v4, %v3277_v1 }
 0x2d7   :  { %v3929_v8 = vpack.c.bf16 %v3280_v6, %v3279_v3 }
 0x2d8   :  { %v3413_v9 = vrot.slane %v3928_v7, %v4832_v32  ;;  %v3521_v7 = vld [vmem:[#allocation9 + $0x18] ss:$0 sm:$0xff] }
 0x2d9   :  { %v3420_v12 = vrot.slane %v3929_v8, %v4832_v32 }
 0x2db   :  { %v3422_v14 = vcombine.low %v3413_v9, %v3420_v12 }
 0x2dd   :  { %v3436_v22 = vrot.slane %v3422_v14, %v4832_v32 }
 0x2df   :  { %v3437_v16 = vcombine.low %v3429_v15, %v3436_v22 }
 0x2e1   :  { %3506 = vst [vmem:[%s4917_s5 + $0x8] sm:$0xff] %v3437_v16 }
 0x310   :  { %v3095_v23 = vpop.f32.mrb[16].mxu1 }
 0x311   :  { %v3096_v24 = vadd.f32 %v3095_v23, %v659_v18  ;;  %v3136_v26 = vpop.f32.mrb[20].mxu0  ;;  %v3097_v27 = vpop.f32.mrb[17].mxu1 }
 0x312   :  { %v3137_v28 = vadd.f32 %v3136_v26, %v667_v19  ;;  %v3098_v29 = vadd.f32 %v3097_v27, %v663_v20  ;;  %v3138_v30 = vpop.f32.mrb[21].mxu0  ;;  %v3099_v31 = vpop.f32.mrb[18].mxu1 }
 0x313   :  { %v3281_v33 = vmax.f32 %v3096_v24, 0.0  ;;  %v3139_v34 = vadd.f32 %v3138_v30, %v671_v21  ;;  %v3140_v35 = vpop.f32.mrb[22].mxu0  ;;  %v3100_v36 = vpop.f32.mrb[19].mxu1 }
 0x314   :  { %v3283_v39 = vmax.f32 %v3137_v28, 0.0  ;;  %v3282_v11 = vmax.f32 %v3098_v29, 0.0  ;;  %v3141_v43 = vpop.f32.mrb[23].mxu0 }
 0x315   :  { %v3284_v55 = vmax.f32 %v3139_v34, 0.0 }
 0x316   :  { %v3930_v42 = vpack.c.bf16 %v3282_v11, %v3281_v33 }
 0x317   :  { %v3931_v13 = vpack.c.bf16 %v3284_v55, %v3283_v39 }
 0x318   :  { %v3448_v58 = vrot.slane %v3930_v42, %v4832_v32 }
 0x319   :  { %v3455_v44 = vrot.slane %v3931_v13, %v4832_v32 }
 0x31b   :  { %v3470_v45 = vcombine.low %v3448_v58, %v3455_v44 }
 0x31d   :  { %v3478_v3 = vrot.slane %v3470_v45, %v4832_v32 }
 0x350   :  { %v3177_v49 = vpop.f32.mrb[20].mxu1 }
 0x351   :  { %v3178_v50 = vadd.f32 %v3177_v49, %v675_v46  ;;  %v3218_v51 = vpop.f32.mrb[24].mxu0  ;;  %v3179_v52 = vpop.f32.mrb[21].mxu1 }
 0x352   :  { %v3219_v53 = vadd.f32 %v3218_v51, %v683_v47  ;;  %v3180_v54 = vadd.f32 %v3179_v52, %v679_v48  ;;  %v3220_v56 = vpop.f32.mrb[25].mxu0  ;;  %v3181_v59 = vpop.f32.mrb[22].mxu1 }
 0x353   :  { %v3285_v60 = vmax.f32 %v3178_v50, 0.0  ;;  %v3221_v61 = vadd.f32 %v3220_v56, %v687_v10  ;;  %v3222_v62 = vpop.f32.mrb[26].mxu0  ;;  %v3182_v63 = vpop.f32.mrb[23].mxu1 }
 0x354   :  { %v3287_v0 = vmax.f32 %v3219_v53, 0.0  ;;  %v3286_v37 = vmax.f32 %v3180_v54, 0.0  ;;  %v3223_v1 = vpop.f32.mrb[27].mxu0 }
 0x355   :  { %v3288_v38 = vmax.f32 %v3221_v61, 0.0 }
 0x356   :  { %v3932_v2 = vpack.c.bf16 %v3286_v37, %v3285_v60 }
 0x357   :  { %v3933_v40 = vpack.c.bf16 %v3288_v38, %v3287_v0 }
 0x358   :  { %v3462_v41 = vrot.slane %v3932_v2, %v4832_v32 }
 0x359   :  { %v3469_v57 = vrot.slane %v3933_v40, %v4832_v32 }
 0x35b   :  { %v3471_v25 = vcombine.low %v3462_v41, %v3469_v57 }
 0x35d   :  { %v3485_v4 = vrot.slane %v3471_v25, %v4832_v32 }
 0x35f   :  { %v3486_v5 = vcombine.low %v3478_v3, %v3485_v4 }
 0x361   :  { %3507 = vst [vmem:[%s4917_s5 + $0x10] sm:$0xff] %v3486_v5 }
 0x370   :  { %v3951_v6 = vpop.f32.mrb[24].mxu1 }
 0x371   :  { %v3952_v8 = vpop.f32.mrb[25].mxu1 }
 0x372   :  { %v3953_v9 = vadd.f32 %v3952_v8, %v3951_v6  ;;  %v3954_v12 = vpop.f32.mrb[26].mxu1 }
 0x373   :  { %v3955_v14 = vpop.f32.mrb[27].mxu1 }
 0x374   :  { %v3260_v15 = vadd.f32 %v3953_v9, %v3521_v7 }
 0x376   :  { %v3289_v22 = vmax.f32 %v3260_v15, 0.0 }
 0x378   :  { %v3314_v16 = vpack.c.bf16 %v3289_v22, %v3289_v22 }
 0x37a   :  { %v3493_v17 = vrot.slane %v3314_v16, %v4832_v32 }
 0x37c   :  { %3934 = vst.sshfl [vmem:[%s4917_s5 + $0x18] sm:$0x1 pattern:$0x73625140] %v3493_v17 }
 0x37d   :  { %3513 = vsyncpa [#allocation3], 1 }
 0x37e   :  { %3514 = vsyncpa [#allocation5], 1 }
 0x37f   :  { %3515 = vsyncpa [#allocation8], 1 }

// kernel: observation_decoder_forward.5
= control target key start
LH: loop header
LB: loop body
LE: loop exit
PB: predicated region body
PF: predicated region fallthrough
CT: control target
= control target key end

     0   :  { %s2611_s12 = smov 0   ;;  %s3116_s0 = inlined_call_operand.vmem [shape: bf16[1088,192], index: 0, kind: input, shape index: {}]   ;;  %s3117_s1 = inlined_call_operand.vmem [shape: bf16[3,192,128], index: 1, kind: input, shape index: {}]   ;;  %s3118_s2 = inlined_call_operand.vmem [shape: f32[1,128], index: 2, kind: input, shape index: {}]   ;;  %s3119_s3 = inlined_call_operand.vmem [shape: f32[1024,128], index: 3, kind: output, shape index: {}]  }
   0x1 LB: > { %s1962_s13 = sadd.s32 4294967295, %s2588_s12   ;;  %p1965_p0 = scmp.ge.s32.totalorder %s2588_s12, 1  ;;  %s2588_s12 = sphi %s2611_s12, %s13_s12  }
   0x2   : > { %p127_p1 = scmp.lt.s32.totalorder %s2588_s12, 5 }
   0x4   : > { %p128_p2 = pnand %p1965_p0, %p127_p1 }
   0x5   : > { %v2274_v0 = vld [vmem:[%s3117_s1 + $0x60] sm:$0xff] (!%p128_p2)   ;;  %v2590_v1 = vmov (!%p128_p2), 0   ;;  %s2626_s16 = sshll.u32 (!%p128_p2), %s1962_s13, 8  ;;  %v2275_v2 = vld [vmem:[%s3117_s1 + $0x68] sm:$0xff] (!%p128_p2)   ;;  %v2276_v3 = vld [vmem:[%s3117_s1 + $0x70] sm:$0xff] (!%p128_p2)   ;;  %vm494_vm0 = vcmask (!%p128_p2), 523264  }
   0x6   : > { %131 = sbr.rel (%p128_p2) target bundleno = 486 (0x1e6), region = 32  ;;  %543 = vmatprep.subr.bf16.mxu0 (!%p128_p2), %v2590_v1  ;;  %2241 = vmatprep.subr.bf16.mxu1 (!%p128_p2), %v2590_v1  ;;  %s215_s19 = sadd.s32 (!%p128_p2), 32, %s2626_s16  ;;  %v2277_v4 = vld [vmem:[%s3117_s1 + $0x78] sm:$0xff] (!%p128_p2)   ;;  %v2278_v6 = vld [vmem:[%s3117_s1 + $0x80] sm:$0xff] (!%p128_p2)   ;;  %v2279_v8 = vld [vmem:[%s3117_s1 + $0x88] sm:$0xff] (!%p128_p2)  }
   0x7   : > { %544 = vmatpush1.bf16.msra.mxu0 (!%p128_p2), %v2274_v0  ;;  %2253 = vmatpush1.bf16.msra.mxu1 (!%p128_p2), %v2274_v0  ;;  %s216_s20 = sshra.s32 (!%p128_p2), %s215_s19, 3  ;;  %v2280_v9 = vld [vmem:[%s3117_s1 + $0x90] sm:$0xff] (!%p128_p2)   ;;  %v2281_v10 = vld [vmem:[%s3117_s1 + $0x98] sm:$0xff] (!%p128_p2)   ;;  %v2282_v11 = vld [vmem:[%s3117_s1 + $0xa0] sm:$0xff] (!%p128_p2)   ;;  %s1129_s25 = sadd.s32 (!%p128_p2), 64, %s2626_s16 }
   0x8   : > { %545 = vmatprep.subr.bf16.mxu0 (!%p128_p2), %v2590_v1  ;;  %2242 = vmatprep.subr.bf16.mxu1 (!%p128_p2), %v2590_v1  ;;  %s2239_s23 = sshll.u32 (!%p128_p2), %s216_s20, 3  ;;  %v2283_v12 = vld [vmem:[%s3117_s1 + $0xa8] sm:$0xff] (!%p128_p2)   ;;  %v2284_v13 = vld [vmem:[%s3117_s1 + $0xb0] sm:$0xff] (!%p128_p2)   ;;  %v2285_v14 = vld [vmem:[%s3117_s1 + $0xb8] sm:$0xff] (!%p128_p2)   ;;  %s1130_s29 = sshra.s32 (!%p128_p2), %s1129_s25, 3 }
   0x9   : > { %s2645_s28 = scalar_lea.vmem (!%p128_p2), %s3116_s0, %s2239_s23  ;;  %v2292_v17 = vld [vmem:[%s3117_s1] sm:$0xff] (!%p128_p2)   ;;  %v2298_v21 = vld [vmem:[%s3117_s1 + $0x8] sm:$0xff] (!%p128_p2)   ;;  %s2240_s5 = sshll.u32 (!%p128_p2), %s1130_s29, 3  ;;  %v2302_v25 = vld [vmem:[%s3117_s1 + $0x10] sm:$0xff] (!%p128_p2)  }
   0xa   : > { %v2288_v5 = vld [vmem:[%s2645_s28 + $0x4] ss:$8 sps:$4 sm:$0xff] (!%p128_p2)   ;;  %v2286_v15 = vld [vmem:[%s2645_s28] ss:$8 sps:$4 sm:$0xff] (!%p128_p2)   ;;  %v2294_v19 = vld [vmem:[%s2645_s28 + $0x14] ss:$8 sps:$4 sm:$0xff] (!%p128_p2)   ;;  %s2732_s14 = scalar_lea.vmem (!%p128_p2), %s3116_s0, %s2626_s16  ;;  %s2737_s18 = scalar_lea.vmem (!%p128_p2), %s3116_s0, %s2240_s5 }
   0xb   : > { %546 = vmatpush1.bf16.msra.mxu0 (!%p128_p2), %v2275_v2  ;;  %2254 = vmatpush1.bf16.msra.mxu1 (!%p128_p2), %v2275_v2  ;;  %v2291_v7 = vld [vmem:[%s2645_s28 + $0x84] ss:$8 sps:$4 sm:$0xff] (!%p128_p2)   ;;  %v2289_v16 = vld [vmem:[%s2645_s28 + $0x80] ss:$8 sps:$4 sm:$0xff] (!%p128_p2)   ;;  %v2296_v20 = vld [vmem:[%s2645_s28 + $0x94] ss:$8 sps:$4 sm:$0xff] (!%p128_p2)  }
   0xc   : > { %547 = vmatprep.subr.bf16.mxu0 (!%p128_p2), %v2590_v1  ;;  %2243 = vmatprep.subr.bf16.mxu1 (!%p128_p2), %v2590_v1  ;;  %v2293_v18 = vld [vmem:[%s3117_s1 + $0xc0] sm:$0xff] (!%p128_p2)   ;;  %v2301_v22 = vld [vmem:[%s3117_s1 + $0xc8] sm:$0xff] (!%p128_p2)   ;;  %v2299_v23 = vld [vmem:[%s2645_s28 + $0x10] ss:$8 sps:$4 sm:$0xff] (!%p128_p2)  }
   0xd   : > { %2041 = vmatprep.mubr.msk.bf16.mxu0 %vm494_vm0, %v2288_v5  ;;  %2049 = vmatprep.mubr.msk.bf16.mxu1 %vm494_vm0, %v2291_v7  ;;  %v2300_v24 = vld [vmem:[%s2645_s28 + $0x90] ss:$8 sps:$4 sm:$0xff]   ;;  %v2304_v27 = vld [vmem:[%s2645_s28 + $0x24] ss:$8 sps:$4 sm:$0xff]   ;;  %v2308_v31 = vld [vmem:[%s2645_s28 + $0x20] ss:$8 sps:$4 sm:$0xff]  }
   0xe   : > { %v2303_v26 = vld [vmem:[%s3117_s1 + $0xd0] sm:$0xff]   ;;  %v2306_v28 = vld [vmem:[%s2645_s28 + $0xa4] ss:$8 sps:$4 sm:$0xff]   ;;  %v2310_v29 = vld [vmem:[%s3117_s1 + $0x18] sm:$0xff]  }
   0xf   : > { %548 = vmatpush1.bf16.msra.mxu0 %v2276_v3  ;;  %2255 = vmatpush1.bf16.msra.mxu1 %v2276_v3  ;;  %v2311_v30 = vld [vmem:[%s3117_s1 + $0xd8] sm:$0xff]   ;;  %v2309_v32 = vld [vmem:[%s2645_s28 + $0xa0] ss:$8 sps:$4 sm:$0xff]   ;;  %v2322_v41 = vld [vmem:[%s2645_s28 + $0x44] ss:$8 sps:$4 sm:$0xff]  }
  0x10   : > { %549 = vmatprep.subr.bf16.mxu0 %v2590_v1  ;;  %2244 = vmatprep.subr.bf16.mxu1 %v2590_v1  ;;  %v2312_v33 = vld [vmem:[%s2645_s28 + $0x34] ss:$8 sps:$4 sm:$0xff]   ;;  %v2316_v35 = vld [vmem:[%s3117_s1 + $0x20] sm:$0xff]   ;;  %v2317_v37 = vld [vmem:[%s2645_s28 + $0x30] ss:$8 sps:$4 sm:$0xff]  }
  0x11   : > { %v2314_v34 = vld [vmem:[%s2645_s28 + $0xb4] ss:$8 sps:$4 sm:$0xff]   ;;  %v2319_v36 = vld [vmem:[%s3117_s1 + $0xe0] sm:$0xff]   ;;  %v2320_v38 = vld [vmem:[%s3117_s1 + $0x28] sm:$0xff]  }
  0x12   : > { %v2321_v39 = vld [vmem:[%s3117_s1 + $0xe8] sm:$0xff]   ;;  %v2318_v40 = vld [vmem:[%s2645_s28 + $0xb0] ss:$8 sps:$4 sm:$0xff]   ;;  %v2330_v49 = vld [vmem:[%s2645_s28 + $0x54] ss:$8 sps:$4 sm:$0xff]  }
  0x13   : > { %550 = vmatpush1.bf16.msra.mxu0 %v2277_v4  ;;  %2256 = vmatpush1.bf16.msra.mxu1 %v2277_v4  ;;  %v2324_v42 = vld [vmem:[%s2645_s28 + $0xc4] ss:$8 sps:$4 sm:$0xff]   ;;  %v2328_v43 = vld [vmem:[%s3117_s1 + $0x30] sm:$0xff]   ;;  %v2326_v45 = vld [vmem:[%s2645_s28 + $0x40] ss:$8 sps:$4 sm:$0xff]  }
  0x14   : > { %551 = vmatprep.subr.bf16.mxu0 %v2590_v1  ;;  %2245 = vmatprep.subr.bf16.mxu1 %v2590_v1  ;;  %v2329_v44 = vld [vmem:[%s3117_s1 + $0xf0] sm:$0xff]   ;;  %v2334_v46 = vld [vmem:[%s3117_s1 + $0x38] sm:$0xff]   ;;  %v2327_v48 = vld [vmem:[%s2645_s28 + $0xc0] ss:$8 sps:$4 sm:$0xff]  }
  0x15   : > { %v2337_v47 = vld [vmem:[%s3117_s1 + $0xf8] sm:$0xff]   ;;  %v2338_v51 = vld [vmem:[%s3117_s1 + $0x40] sm:$0xff]   ;;  %v2346_v54 = vld [vmem:[%s3117_s1 + $0x48] sm:$0xff]  }
  0x16   : > { %v2332_v50 = vld [vmem:[%s2645_s28 + $0xd4] ss:$8 sps:$4 sm:$0xff]   ;;  %v2339_v52 = vld [vmem:[%s3117_s1 + $0x100] sm:$0xff]   ;;  %v2335_v53 = vld [vmem:[%s2645_s28 + $0x50] ss:$8 sps:$4 sm:$0xff]  }
  0x17   : > { %552 = vmatpush1.bf16.msra.mxu0 %v2278_v6  ;;  %2257 = vmatpush1.bf16.msra.mxu1 %v2278_v6  ;;  %v2347_v55 = vld [vmem:[%s3117_s1 + $0x108] sm:$0xff]   ;;  %v2336_v56 = vld [vmem:[%s2645_s28 + $0xd0] ss:$8 sps:$4 sm:$0xff]   ;;  %v2348_v2 = vld [vmem:[%s2645_s28 + $0x74] ss:$8 sps:$4 sm:$0xff]  }
  0x18   : > { %553 = vmatprep.subr.bf16.mxu0 %v2590_v1  ;;  %2246 = vmatprep.subr.bf16.mxu1 %v2590_v1  ;;  %v2340_v57 = vld [vmem:[%s2645_s28 + $0x64] ss:$8 sps:$4 sm:$0xff]   ;;  %v2352_v59 = vld [vmem:[%s3117_s1 + $0x50] sm:$0xff]   ;;  %v2356_v61 = vld [vmem:[%s3117_s1 + $0x58] sm:$0xff]  }
  0x19   : > { %v2342_v58 = vld [vmem:[%s2645_s28 + $0xe4] ss:$8 sps:$4 sm:$0xff]   ;;  %v2355_v60 = vld [vmem:[%s3117_s1 + $0x110] sm:$0xff]   ;;  %v2357_v62 = vld [vmem:[%s3117_s1 + $0x118] sm:$0xff]  }
  0x1a   : > { %v2344_v63 = vld [vmem:[%s2645_s28 + $0x60] ss:$8 sps:$4 sm:$0xff]   ;;  %v2350_v3 = vld [vmem:[%s2645_s28 + $0xf4] ss:$8 sps:$4 sm:$0xff]   ;;  %v2353_v4 = vld [vmem:[%s2645_s28 + $0x70] ss:$8 sps:$4 sm:$0xff]  }
  0x1b   : > { %554 = vmatpush1.bf16.msra.mxu0 %v2279_v8  ;;  %2258 = vmatpush1.bf16.msra.mxu1 %v2279_v8  ;;  %v2345_v0 = vld [vmem:[%s2645_s28 + $0xe0] ss:$8 sps:$4 sm:$0xff]   ;;  %v2354_v5 = vld [vmem:[%s2645_s28 + $0xf0] ss:$8 sps:$4 sm:$0xff]   ;;  %v2363_v6 = vld [vmem:[%s2737_s18 + $0x4] ss:$8 sps:$4 sm:$0xff]  }
  0x1c   : > { %555 = vmatprep.subr.bf16.mxu0 %v2590_v1  ;;  %2247 = vmatprep.subr.bf16.mxu1 %v2590_v1  ;;  %v2358_v7 = vld [vmem:[%s2732_s14] ss:$8 sps:$4 sm:$0xff]  }
  0x1d   : > { %v2361_v8 = vld [vmem:[%s2737_s18] ss:$8 sps:$4 sm:$0xff]  }
  0x1f   : > { %556 = vmatpush1.bf16.msra.mxu0 %v2280_v9  ;;  %2259 = vmatpush1.bf16.msra.mxu1 %v2280_v9  ;;  %v2364_v9 = vld [vmem:[%s2732_s14 + $0x14] ss:$8 sps:$4 sm:$0xff]  }
  0x20   : > { %557 = vmatprep.subr.bf16.mxu0 %v2590_v1  ;;  %2248 = vmatprep.subr.bf16.mxu1 %v2590_v1 }
  0x23   : > { %558 = vmatpush1.bf16.msra.mxu0 %v2281_v10  ;;  %2260 = vmatpush1.bf16.msra.mxu1 %v2281_v10  ;;  %v2366_v10 = vld [vmem:[%s2737_s18 + $0x14] ss:$8 sps:$4 sm:$0xff]  }
  0x24   : > { %559 = vmatprep.subr.bf16.mxu0 %v2590_v1  ;;  %2249 = vmatprep.subr.bf16.mxu1 %v2590_v1 }
  0x27   : > { %560 = vmatpush1.bf16.msra.mxu0 %v2282_v11  ;;  %2261 = vmatpush1.bf16.msra.mxu1 %v2282_v11  ;;  %v2368_v11 = vld [vmem:[%s2732_s14 + $0x10] ss:$8 sps:$4 sm:$0xff]  }
  0x28   : > { %561 = vmatprep.subr.bf16.mxu0 %v2590_v1  ;;  %2250 = vmatprep.subr.bf16.mxu1 %v2590_v1 }
  0x2b   : > { %562 = vmatpush1.bf16.msra.mxu0 %v2283_v12  ;;  %2262 = vmatpush1.bf16.msra.mxu1 %v2283_v12  ;;  %v2369_v12 = vld [vmem:[%s2737_s18 + $0x10] ss:$8 sps:$4 sm:$0xff]  }
  0x2c   : > { %563 = vmatprep.subr.bf16.mxu0 %v2590_v1  ;;  %2251 = vmatprep.subr.bf16.mxu1 %v2590_v1 }
  0x2f   : > { %564 = vmatpush1.bf16.msra.mxu0 %v2284_v13  ;;  %2263 = vmatpush1.bf16.msra.mxu1 %v2284_v13  ;;  %v2370_v13 = vld [vmem:[%s2732_s14 + $0x24] ss:$8 sps:$4 sm:$0xff]  }
  0x30   : > { %565 = vmatprep.subr.bf16.mxu0 %v2590_v1  ;;  %2252 = vmatprep.subr.bf16.mxu1 %v2590_v1 }
  0x33   : > { %566 = vmatpush1.bf16.msra.mxu0 %v2285_v14  ;;  %2264 = vmatpush1.bf16.msra.mxu1 %v2285_v14  ;;  %v2372_v14 = vld [vmem:[%s2737_s18 + $0x24] ss:$8 sps:$4 sm:$0xff]  }
  0x34   : > { %968 = vmatprep.subr.bf16.mxu1 %v2590_v1  ;;  %1456 = vmatprep.subr.bf16.mxu0 %v2590_v1 }
  0x36   : > { %576 = vmatmul.mubr.bf16.vlgmr.msra.gmra.mrb[0].mxu0 %v2286_v15  ;;  %640 = vmatmul.mubr.bf16.vlgmr.msra.gmra.mrb[0].mxu1 %v2289_v16  ;;  %v2374_v15 = vld [vmem:[%s2732_s14 + $0x20] ss:$8 sps:$4 sm:$0xff]  }
  0x37   : > { %969 = vmatpush1.bf16.msra.mxu1 %v2292_v17  ;;  %1457 = vmatpush1.bf16.msra.mxu0 %v2293_v18  ;;  %v2375_v16 = vld [vmem:[%s2737_s18 + $0x20] ss:$8 sps:$4 sm:$0xff]   ;;  %v2376_v17 = vld [vmem:[%s2732_s14 + $0x34] ss:$8 sps:$4 sm:$0xff]  }
  0x38   : > { %970 = vmatprep.subr.bf16.mxu1 %v2590_v1  ;;  %2042 = vmatprep.mubr.msk.bf16.mxu0 %vm494_vm0, %v2294_v19  ;;  %v2378_v18 = vld [vmem:[%s2737_s18 + $0x34] ss:$8 sps:$4 sm:$0xff]   ;;  %v2380_v19 = vld [vmem:[%s2732_s14 + $0x30] ss:$8 sps:$4 sm:$0xff]  }
  0x39   : > { %2050 = vmatprep.mubr.msk.bf16.mxu1 %vm494_vm0, %v2296_v20  ;;  %1458 = vmatprep.subr.bf16.mxu0 %v2590_v1  ;;  %v2381_v20 = vld [vmem:[%s2737_s18 + $0x30] ss:$8 sps:$4 sm:$0xff]  }
  0x3b   : > { %971 = vmatpush1.bf16.msra.mxu1 %v2298_v21  ;;  %1459 = vmatpush1.bf16.msra.mxu0 %v2301_v22  ;;  %v2382_v21 = vld [vmem:[%s2732_s14 + $0x44] ss:$8 sps:$4 sm:$0xff]  }
  0x3c   : > { %972 = vmatprep.subr.bf16.mxu1 %v2590_v1  ;;  %1460 = vmatprep.subr.bf16.mxu0 %v2590_v1  ;;  %v2384_v22 = vld [vmem:[%s2737_s18 + $0x44] ss:$8 sps:$4 sm:$0xff]  }
  0x3e   : > { %584 = vmatmul.mubr.bf16.gmra.mrb[4].mxu0 %v2299_v23  ;;  %648 = vmatmul.mubr.bf16.gmra.mrb[4].mxu1 %v2300_v24  ;;  %v2386_v23 = vld [vmem:[%s2732_s14 + $0x40] ss:$8 sps:$4 sm:$0xff]  }
  0x3f   : > { %973 = vmatpush1.bf16.msra.mxu1 %v2302_v25  ;;  %1461 = vmatpush1.bf16.msra.mxu0 %v2303_v26  ;;  %v2387_v24 = vld [vmem:[%s2737_s18 + $0x40] ss:$8 sps:$4 sm:$0xff]   ;;  %v2388_v25 = vld [vmem:[%s2732_s14 + $0x54] ss:$8 sps:$4 sm:$0xff]  }
  0x40   : > { %2043 = vmatprep.mubr.msk.bf16.mxu0 %vm494_vm0, %v2304_v27  ;;  %2051 = vmatprep.mubr.msk.bf16.mxu1 %vm494_vm0, %v2306_v28  ;;  %v2390_v26 = vld [vmem:[%s2737_s18 + $0x54] ss:$8 sps:$4 sm:$0xff]   ;;  %v2392_v27 = vld [vmem:[%s2732_s14 + $0x50] ss:$8 sps:$4 sm:$0xff]  }
  0x41   : > { %974 = vmatprep.subr.bf16.mxu1 %v2590_v1  ;;  %1462 = vmatprep.subr.bf16.mxu0 %v2590_v1  ;;  %v2393_v28 = vld [vmem:[%s2737_s18 + $0x50] ss:$8 sps:$4 sm:$0xff]  }
  0x43   : > { %975 = vmatpush1.bf16.msra.mxu1 %v2310_v29  ;;  %1463 = vmatpush1.bf16.msra.mxu0 %v2311_v30  ;;  %v2394_v29 = vld [vmem:[%s2732_s14 + $0x64] ss:$8 sps:$4 sm:$0xff]  }
  0x44   : > { %976 = vmatprep.subr.bf16.mxu1 %v2590_v1  ;;  %1464 = vmatprep.subr.bf16.mxu0 %v2590_v1  ;;  %v2396_v30 = vld [vmem:[%s2737_s18 + $0x64] ss:$8 sps:$4 sm:$0xff]  }
  0x46   : > { %592 = vmatmul.mubr.bf16.gmra.mrb[8].mxu0 %v2308_v31  ;;  %656 = vmatmul.mubr.bf16.gmra.mrb[8].mxu1 %v2309_v32  ;;  %v2398_v31 = vld [vmem:[%s2732_s14 + $0x60] ss:$8 sps:$4 sm:$0xff]  }
  0x47   : > { %2044 = vmatprep.mubr.msk.bf16.mxu0 %vm494_vm0, %v2312_v33  ;;  %2052 = vmatprep.mubr.msk.bf16.mxu1 %vm494_vm0, %v2314_v34  ;;  %v2399_v32 = vld [vmem:[%s2737_s18 + $0x60] ss:$8 sps:$4 sm:$0xff]   ;;  %v2400_v33 = vld [vmem:[%s2732_s14 + $0x74] ss:$8 sps:$4 sm:$0xff]  }
  0x48   : > { %977 = vmatpush1.bf16.msra.mxu1 %v2316_v35  ;;  %1465 = vmatpush1.bf16.msra.mxu0 %v2319_v36  ;;  %v2402_v34 = vld [vmem:[%s2737_s18 + $0x74] ss:$8 sps:$4 sm:$0xff]   ;;  %v2404_v35 = vld [vmem:[%s2732_s14 + $0x70] ss:$8 sps:$4 sm:$0xff]  }
  0x49   : > { %978 = vmatprep.subr.bf16.mxu1 %v2590_v1  ;;  %1466 = vmatprep.subr.bf16.mxu0 %v2590_v1  ;;  %v2405_v36 = vld [vmem:[%s2737_s18 + $0x70] ss:$8 sps:$4 sm:$0xff]  }
  0x4c   : > { %979 = vmatpush1.bf16.msra.mxu1 %v2320_v38  ;;  %1467 = vmatpush1.bf16.msra.mxu0 %v2321_v39  ;;  %v2408_v38 = vld [vmem:[%s2737_s18 + $0x84] ss:$8 sps:$4 sm:$0xff]   ;;  %v2410_v39 = vld [vmem:[%s2732_s14 + $0x80] ss:$8 sps:$4 sm:$0xff]  }
  0x4d   : > { %980 = vmatprep.subr.bf16.mxu1 %v2590_v1  ;;  %1468 = vmatprep.subr.bf16.mxu0 %v2590_v1 }
  0x4e   : > { %600 = vmatmul.mubr.bf16.gmra.mrb[12].mxu0 %v2317_v37  ;;  %664 = vmatmul.mubr.bf16.gmra.mrb[12].mxu1 %v2318_v40  ;;  %v2406_v37 = vld [vmem:[%s2732_s14 + $0x84] ss:$8 sps:$4 sm:$0xff]   ;;  %v2411_v40 = vld [vmem:[%s2737_s18 + $0x80] ss:$8 sps:$4 sm:$0xff]  }
  0x4f   : > { %2045 = vmatprep.mubr.msk.bf16.mxu0 %vm494_vm0, %v2322_v41  ;;  %2053 = vmatprep.mubr.msk.bf16.mxu1 %vm494_vm0, %v2324_v42  ;;  %v2412_v41 = vld [vmem:[%s2732_s14 + $0x94] ss:$8 sps:$4 sm:$0xff]  }
  0x50   : > { %981 = vmatpush1.bf16.msra.mxu1 %v2328_v43  ;;  %1469 = vmatpush1.bf16.msra.mxu0 %v2329_v44  ;;  %v2414_v42 = vld [vmem:[%s2737_s18 + $0x94] ss:$8 sps:$4 sm:$0xff]   ;;  %v2416_v43 = vld [vmem:[%s2732_s14 + $0x90] ss:$8 sps:$4 sm:$0xff]  }
  0x51   : > { %982 = vmatprep.subr.bf16.mxu1 %v2590_v1  ;;  %1470 = vmatprep.subr.bf16.mxu0 %v2590_v1  ;;  %v2417_v44 = vld [vmem:[%s2737_s18 + $0x90] ss:$8 sps:$4 sm:$0xff]  }
  0x54   : > { %983 = vmatpush1.bf16.msra.mxu1 %v2334_v46  ;;  %1471 = vmatpush1.bf16.msra.mxu0 %v2337_v47  ;;  %v2420_v46 = vld [vmem:[%s2737_s18 + $0xa4] ss:$8 sps:$4 sm:$0xff]   ;;  %v2422_v47 = vld [vmem:[%s2732_s14 + $0xa0] ss:$8 sps:$4 sm:$0xff]  }
  0x55   : > { %984 = vmatprep.subr.bf16.mxu1 %v2590_v1  ;;  %1472 = vmatprep.subr.bf16.mxu0 %v2590_v1 }
  0x56   : > { %608 = vmatmul.mubr.bf16.gmra.mrb[16].mxu0 %v2326_v45  ;;  %672 = vmatmul.mubr.bf16.gmra.mrb[16].mxu1 %v2327_v48  ;;  %v2418_v45 = vld [vmem:[%s2732_s14 + $0xa4] ss:$8 sps:$4 sm:$0xff]   ;;  %v2423_v48 = vld [vmem:[%s2737_s18 + $0xa0] ss:$8 sps:$4 sm:$0xff]  }
  0x57   : > { %2046 = vmatprep.mubr.msk.bf16.mxu0 %vm494_vm0, %v2330_v49  ;;  %2054 = vmatprep.mubr.msk.bf16.mxu1 %vm494_vm0, %v2332_v50  ;;  %v2424_v49 = vld [vmem:[%s2732_s14 + $0xb4] ss:$8 sps:$4 sm:$0xff]  }
  0x58   : > { %985 = vmatpush1.bf16.msra.mxu1 %v2338_v51  ;;  %1473 = vmatpush1.bf16.msra.mxu0 %v2339_v52  ;;  %v2426_v50 = vld [vmem:[%s2737_s18 + $0xb4] ss:$8 sps:$4 sm:$0xff]   ;;  %v2428_v51 = vld [vmem:[%s2732_s14 + $0xb0] ss:$8 sps:$4 sm:$0xff]  }
  0x59   : > { %986 = vmatprep.subr.bf16.mxu1 %v2590_v1  ;;  %1474 = vmatprep.subr.bf16.mxu0 %v2590_v1  ;;  %v2429_v52 = vld [vmem:[%s2737_s18 + $0xb0] ss:$8 sps:$4 sm:$0xff]  }
  0x5c   : > { %987 = vmatpush1.bf16.msra.mxu1 %v2346_v54  ;;  %1475 = vmatpush1.bf16.msra.mxu0 %v2347_v55  ;;  %v2432_v54 = vld [vmem:[%s2737_s18 + $0xc4] ss:$8 sps:$4 sm:$0xff]   ;;  %v2434_v55 = vld [vmem:[%s2732_s14 + $0xc0] ss:$8 sps:$4 sm:$0xff]  }
  0x5d   : > { %988 = vmatprep.subr.bf16.mxu1 %v2590_v1  ;;  %1476 = vmatprep.subr.bf16.mxu0 %v2590_v1 }
  0x5e   : > { %616 = vmatmul.mubr.bf16.gmra.mrb[20].mxu0 %v2335_v53  ;;  %680 = vmatmul.mubr.bf16.gmra.mrb[20].mxu1 %v2336_v56  ;;  %v2430_v53 = vld [vmem:[%s2732_s14 + $0xc4] ss:$8 sps:$4 sm:$0xff]   ;;  %v2435_v56 = vld [vmem:[%s2737_s18 + $0xc0] ss:$8 sps:$4 sm:$0xff]  }
  0x5f   : > { %2047 = vmatprep.mubr.msk.bf16.mxu0 %vm494_vm0, %v2340_v57  ;;  %2055 = vmatprep.mubr.msk.bf16.mxu1 %vm494_vm0, %v2342_v58  ;;  %v2436_v57 = vld [vmem:[%s2732_s14 + $0xd4] ss:$8 sps:$4 sm:$0xff]  }
  0x60   : > { %989 = vmatpush1.bf16.msra.mxu1 %v2352_v59  ;;  %1477 = vmatpush1.bf16.msra.mxu0 %v2355_v60  ;;  %v2438_v58 = vld [vmem:[%s2737_s18 + $0xd4] ss:$8 sps:$4 sm:$0xff]   ;;  %v2440_v59 = vld [vmem:[%s2732_s14 + $0xd0] ss:$8 sps:$4 sm:$0xff]  }
  0x61   : > { %990 = vmatprep.subr.bf16.mxu1 %v2590_v1  ;;  %1478 = vmatprep.subr.bf16.mxu0 %v2590_v1  ;;  %v2360_v1 = vld [vmem:[%s2732_s14 + $0x4] ss:$8 sps:$4 sm:$0xff]   ;;  %v2441_v60 = vld [vmem:[%s2737_s18 + $0xd0] ss:$8 sps:$4 sm:$0xff]  }
  0x64   : > { %991 = vmatpush1.bf16.msra.mxu1 %v2356_v61  ;;  %1479 = vmatpush1.bf16.msra.mxu0 %v2357_v62  ;;  %v2442_v61 = vld [vmem:[%s2732_s14 + $0xe4] ss:$8 sps:$4 sm:$0xff]  }
  0x65   : > { %v2444_v62 = vld [vmem:[%s2737_s18 + $0xe4] ss:$8 sps:$4 sm:$0xff]  }
  0x66   : > { %624 = vmatmul.mubr.bf16.gmra.mrb[24].mxu0 %v2344_v63  ;;  %688 = vmatmul.mubr.bf16.gmra.mrb[24].mxu1 %v2345_v0  ;;  %v2446_v63 = vld [vmem:[%s2732_s14 + $0xe0] ss:$8 sps:$4 sm:$0xff]  }
  0x67   : > { %2048 = vmatprep.mubr.msk.bf16.mxu0 %vm494_vm0, %v2348_v2  ;;  %2056 = vmatprep.mubr.msk.bf16.mxu1 %vm494_vm0, %v2350_v3  ;;  %v2447_v0 = vld [vmem:[%s2737_s18 + $0xe0] ss:$8 sps:$4 sm:$0xff]   ;;  %v2448_v2 = vld [vmem:[%s2732_s14 + $0xf4] ss:$8 sps:$4 sm:$0xff]  }
  0x68   : > { %v2450_v3 = vld [vmem:[%s2737_s18 + $0xf4] ss:$8 sps:$4 sm:$0xff]  }
  0x6e   : > { %632 = vmatmul.mubr.bf16.gmra.mrb[28].mxu0 %v2353_v4  ;;  %696 = vmatmul.mubr.bf16.gmra.mrb[28].mxu1 %v2354_v5  ;;  %v2452_v4 = vld [vmem:[%s2732_s14 + $0xf0] ss:$8 sps:$4 sm:$0xff]  }
  0x6f   : > { %2101 = vmatprep.mubr.msk.bf16.mxu1 %vm494_vm0, %v2360_v1  ;;  %2187 = vmatprep.mubr.msk.bf16.mxu0 %vm494_vm0, %v2363_v6  ;;  %v2453_v5 = vld [vmem:[%s2737_s18 + $0xf0] ss:$8 sps:$4 sm:$0xff]   ;;  %s1966_s18 = sshll.u32 %s1962_s13, 5 }
  0x70   : > { %p147_p3 = scmp.lt.s32.totalorder %s1966_s18, 127 }
  0x72   : > { %s3121_s18 = smov (!%p147_p3, %s1966_s18), 127 }
  0x73   : > { %s1967_s13 = sshll.u32 %s3121_s18, 3 }
  0x74   : > { %s3030_s8 = scalar_lea.vmem %s3119_s3, %s1967_s13 }
  0x76   : > { %1001 = vmatmul.mubr.bf16.vlgmr.msra.gmra.mrb[32].mxu1 %v2358_v7  ;;  %1489 = vmatmul.mubr.bf16.vlgmr.msra.gmra.mrb[32].mxu0 %v2361_v8 }
  0x77   : > { %2102 = vmatprep.mubr.msk.bf16.mxu1 %vm494_vm0, %v2364_v9  ;;  %2188 = vmatprep.mubr.msk.bf16.mxu0 %vm494_vm0, %v2366_v10 }
  0x7e   : > { %1009 = vmatmul.mubr.bf16.gmra.mrb[36].mxu1 %v2368_v11  ;;  %1497 = vmatmul.mubr.bf16.gmra.mrb[36].mxu0 %v2369_v12 }
  0x7f   : > { %2103 = vmatprep.mubr.msk.bf16.mxu1 %vm494_vm0, %v2370_v13  ;;  %2189 = vmatprep.mubr.msk.bf16.mxu0 %vm494_vm0, %v2372_v14 }
  0x86   : > { %1017 = vmatmul.mubr.bf16.gmra.mrb[40].mxu1 %v2374_v15  ;;  %1505 = vmatmul.mubr.bf16.gmra.mrb[40].mxu0 %v2375_v16 }
  0x87   : > { %2104 = vmatprep.mubr.msk.bf16.mxu1 %vm494_vm0, %v2376_v17  ;;  %2190 = vmatprep.mubr.msk.bf16.mxu0 %vm494_vm0, %v2378_v18 }
  0x8e   : > { %1025 = vmatmul.mubr.bf16.gmra.mrb[44].mxu1 %v2380_v19  ;;  %1513 = vmatmul.mubr.bf16.gmra.mrb[44].mxu0 %v2381_v20 }
  0x8f   : > { %2105 = vmatprep.mubr.msk.bf16.mxu1 %vm494_vm0, %v2382_v21  ;;  %2191 = vmatprep.mubr.msk.bf16.mxu0 %vm494_vm0, %v2384_v22 }
  0x96   : > { %1033 = vmatmul.mubr.bf16.gmra.mrb[48].mxu1 %v2386_v23  ;;  %1521 = vmatmul.mubr.bf16.gmra.mrb[48].mxu0 %v2387_v24 }
  0x97   : > { %2106 = vmatprep.mubr.msk.bf16.mxu1 %vm494_vm0, %v2388_v25  ;;  %2192 = vmatprep.mubr.msk.bf16.mxu0 %vm494_vm0, %v2390_v26 }
  0x9e   : > { %1041 = vmatmul.mubr.bf16.gmra.mrb[52].mxu1 %v2392_v27  ;;  %1529 = vmatmul.mubr.bf16.gmra.mrb[52].mxu0 %v2393_v28 }
  0x9f   : > { %2107 = vmatprep.mubr.msk.bf16.mxu1 %vm494_vm0, %v2394_v29  ;;  %2193 = vmatprep.mubr.msk.bf16.mxu0 %vm494_vm0, %v2396_v30 }
  0xa6   : > { %1049 = vmatmul.mubr.bf16.gmra.mrb[56].mxu1 %v2398_v31  ;;  %1537 = vmatmul.mubr.bf16.gmra.mrb[56].mxu0 %v2399_v32 }
  0xa7   : > { %2108 = vmatprep.mubr.msk.bf16.mxu1 %vm494_vm0, %v2400_v33  ;;  %2194 = vmatprep.mubr.msk.bf16.mxu0 %vm494_vm0, %v2402_v34 }
  0xae   : > { %1057 = vmatmul.mubr.bf16.gmra.mrb[60].mxu1 %v2404_v35  ;;  %1545 = vmatmul.mubr.bf16.gmra.mrb[60].mxu0 %v2405_v36 }
  0xaf   : > { %2109 = vmatprep.mubr.msk.bf16.mxu1 %vm494_vm0, %v2406_v37  ;;  %2195 = vmatprep.mubr.msk.bf16.mxu0 %vm494_vm0, %v2408_v38 }
  0xb6   : > { %1065 = vmatmul.mubr.bf16.gmra.mrb[64].mxu1 %v2410_v39  ;;  %1553 = vmatmul.mubr.bf16.gmra.mrb[64].mxu0 %v2411_v40 }
  0xb7   : > { %2110 = vmatprep.mubr.msk.bf16.mxu1 %vm494_vm0, %v2412_v41  ;;  %2196 = vmatprep.mubr.msk.bf16.mxu0 %vm494_vm0, %v2414_v42 }
  0xbe   : > { %1073 = vmatmul.mubr.bf16.gmra.mrb[68].mxu1 %v2416_v43  ;;  %1561 = vmatmul.mubr.bf16.gmra.mrb[68].mxu0 %v2417_v44 }
  0xbf   : > { %2111 = vmatprep.mubr.msk.bf16.mxu1 %vm494_vm0, %v2418_v45  ;;  %2197 = vmatprep.mubr.msk.bf16.mxu0 %vm494_vm0, %v2420_v46 }
  0xc6   : > { %1081 = vmatmul.mubr.bf16.gmra.mrb[72].mxu1 %v2422_v47  ;;  %1569 = vmatmul.mubr.bf16.gmra.mrb[72].mxu0 %v2423_v48 }
  0xc7   : > { %2112 = vmatprep.mubr.msk.bf16.mxu1 %vm494_vm0, %v2424_v49  ;;  %2198 = vmatprep.mubr.msk.bf16.mxu0 %vm494_vm0, %v2426_v50 }
  0xce   : > { %1089 = vmatmul.mubr.bf16.gmra.mrb[76].mxu1 %v2428_v51  ;;  %1577 = vmatmul.mubr.bf16.gmra.mrb[76].mxu0 %v2429_v52 }
  0xcf   : > { %2113 = vmatprep.mubr.msk.bf16.mxu1 %vm494_vm0, %v2430_v53  ;;  %2199 = vmatprep.mubr.msk.bf16.mxu0 %vm494_vm0, %v2432_v54 }
  0xd6   : > { %1097 = vmatmul.mubr.bf16.gmra.mrb[80].mxu1 %v2434_v55  ;;  %1585 = vmatmul.mubr.bf16.gmra.mrb[80].mxu0 %v2435_v56 }
  0xd7   : > { %2114 = vmatprep.mubr.msk.bf16.mxu1 %vm494_vm0, %v2436_v57  ;;  %2200 = vmatprep.mubr.msk.bf16.mxu0 %vm494_vm0, %v2438_v58 }
  0xde   : > { %1105 = vmatmul.mubr.bf16.gmra.mrb[84].mxu1 %v2440_v59  ;;  %1593 = vmatmul.mubr.bf16.gmra.mrb[84].mxu0 %v2441_v60 }
  0xdf   : > { %2115 = vmatprep.mubr.msk.bf16.mxu1 %vm494_vm0, %v2442_v61  ;;  %2201 = vmatprep.mubr.msk.bf16.mxu0 %vm494_vm0, %v2444_v62 }
  0xe6   : > { %1113 = vmatmul.mubr.bf16.gmra.mrb[88].mxu1 %v2446_v63  ;;  %1601 = vmatmul.mubr.bf16.gmra.mrb[88].mxu0 %v2447_v0 }
  0xe7   : > { %2116 = vmatprep.mubr.msk.bf16.mxu1 %vm494_vm0, %v2448_v2  ;;  %2202 = vmatprep.mubr.msk.bf16.mxu0 %vm494_vm0, %v2450_v3 }
  0xee   : > { %1121 = vmatmul.mubr.bf16.gmra.mrb[92].mxu1 %v2452_v4  ;;  %1609 = vmatmul.mubr.bf16.gmra.mrb[92].mxu0 %v2453_v5 }
 0x109   : > { %v2941_v1 = vpop.f32.mrb[0].mxu0  ;;  %v2943_v6 = vpop.f32.mrb[0].mxu1 }
 0x10a   : > { %v579_v7 = vpop.f32.mrb[1].mxu0  ;;  %v643_v8 = vpop.f32.mrb[1].mxu1 }
 0x10b   : > { %v2945_v9 = vpop.f32.mrb[2].mxu0  ;;  %v2947_v10 = vpop.f32.mrb[2].mxu1 }
 0x10c   : > { %v582_v11 = vpop.f32.mrb[3].mxu0  ;;  %v646_v12 = vpop.f32.mrb[3].mxu1 }
 0x111   : > { %v2949_v13 = vpop.f32.mrb[4].mxu0  ;;  %v2951_v14 = vpop.f32.mrb[4].mxu1 }
 0x112   : > { %v587_v15 = vpop.f32.mrb[5].mxu0  ;;  %v651_v16 = vpop.f32.mrb[5].mxu1 }
 0x113   : > { %v2953_v17 = vpop.f32.mrb[6].mxu0  ;;  %v2955_v18 = vpop.f32.mrb[6].mxu1  ;;  %v3009_v16 = vld [vmem:[%s3118_s2] ss:$0 sm:$0xff] }
 0x114   : > { %v590_v19 = vpop.f32.mrb[7].mxu0  ;;  %v654_v20 = vpop.f32.mrb[7].mxu1 }
 0x119   : > { %v2957_v21 = vpop.f32.mrb[8].mxu0  ;;  %v2959_v22 = vpop.f32.mrb[8].mxu1 }
 0x11a   : > { %v595_v23 = vpop.f32.mrb[9].mxu0  ;;  %v659_v24 = vpop.f32.mrb[9].mxu1 }
 0x11b   : > { %v2961_v25 = vpop.f32.mrb[10].mxu0  ;;  %v2963_v26 = vpop.f32.mrb[10].mxu1 }
 0x11c   : > { %v598_v27 = vpop.f32.mrb[11].mxu0  ;;  %v662_v28 = vpop.f32.mrb[11].mxu1 }
 0x121   : > { %v2965_v29 = vpop.f32.mrb[12].mxu0  ;;  %v2967_v30 = vpop.f32.mrb[12].mxu1 }
 0x122   : > { %v603_v31 = vpop.f32.mrb[13].mxu0  ;;  %v667_v32 = vpop.f32.mrb[13].mxu1 }
 0x123   : > { %v2969_v33 = vpop.f32.mrb[14].mxu0  ;;  %v2971_v34 = vpop.f32.mrb[14].mxu1 }
 0x124   : > { %v606_v35 = vpop.f32.mrb[15].mxu0  ;;  %v670_v36 = vpop.f32.mrb[15].mxu1 }
 0x129   : > { %v2973_v37 = vpop.f32.mrb[16].mxu0  ;;  %v2975_v38 = vpop.f32.mrb[16].mxu1 }
 0x12a   : > { %v611_v39 = vpop.f32.mrb[17].mxu0  ;;  %v675_v40 = vpop.f32.mrb[17].mxu1 }
 0x12b   : > { %v2977_v41 = vpop.f32.mrb[18].mxu0  ;;  %v2979_v42 = vpop.f32.mrb[18].mxu1 }
 0x12c   : > { %v614_v43 = vpop.f32.mrb[19].mxu0  ;;  %v678_v44 = vpop.f32.mrb[19].mxu1 }
 0x131   : > { %v2981_v45 = vpop.f32.mrb[20].mxu0  ;;  %v2983_v46 = vpop.f32.mrb[20].mxu1 }
 0x132   : > { %v619_v47 = vpop.f32.mrb[21].mxu0  ;;  %v683_v48 = vpop.f32.mrb[21].mxu1 }
 0x133   : > { %v2985_v49 = vpop.f32.mrb[22].mxu0  ;;  %v2987_v50 = vpop.f32.mrb[22].mxu1 }
 0x134   : > { %v622_v51 = vpop.f32.mrb[23].mxu0  ;;  %v686_v52 = vpop.f32.mrb[23].mxu1 }
 0x139   : > { %v2989_v53 = vpop.f32.mrb[24].mxu0  ;;  %v2991_v54 = vpop.f32.mrb[24].mxu1 }
 0x13a   : > { %v627_v55 = vpop.f32.mrb[25].mxu0  ;;  %v691_v56 = vpop.f32.mrb[25].mxu1 }
 0x13b   : > { %v2993_v57 = vpop.f32.mrb[26].mxu0  ;;  %v2995_v58 = vpop.f32.mrb[26].mxu1 }
 0x13c   : > { %v630_v59 = vpop.f32.mrb[27].mxu0  ;;  %v694_v60 = vpop.f32.mrb[27].mxu1 }
 0x141   : > { %v2997_v61 = vpop.f32.mrb[28].mxu0  ;;  %v2999_v62 = vpop.f32.mrb[28].mxu1 }
 0x142   : > { %v635_v63 = vpop.f32.mrb[29].mxu0  ;;  %v699_v0 = vpop.f32.mrb[29].mxu1 }
 0x143   : > { %v3001_v2 = vpop.f32.mrb[30].mxu0  ;;  %v3003_v3 = vpop.f32.mrb[30].mxu1 }
 0x144   : > { %v638_v4 = vpop.f32.mrb[31].mxu0  ;;  %v702_v5 = vpop.f32.mrb[31].mxu1 }
 0x149   : > { %v1002_v7 = vpop.f32.mrb[32].mxu1  ;;  %v1490_v8 = vpop.f32.mrb[32].mxu0 }
 0x14a   : > { %v1003_v11 = vadd.f32 %v1002_v7, %v2941_v1  ;;  %v1004_v12 = vpop.f32.mrb[33].mxu1  ;;  %v1492_v15 = vpop.f32.mrb[33].mxu0 }
 0x14b   : > { %v1005_v19 = vpop.f32.mrb[34].mxu1  ;;  %v1493_v20 = vpop.f32.mrb[34].mxu0 }
 0x14c   : > { %v1617_v23 = vadd.f32 %v1490_v8, %v1003_v11  ;;  %v1006_v24 = vadd.f32 %v1005_v19, %v2945_v9  ;;  %v1007_v27 = vpop.f32.mrb[35].mxu1  ;;  %v1495_v28 = vpop.f32.mrb[35].mxu0 }
 0x14e   : > { %v1656_v31 = vadd.f32 %v3009_v16, %v1617_v23  ;;  %v1618_v32 = vadd.f32 %v1493_v20, %v1006_v24 }
 0x150   : > { %v2204_v35 = vmul.f32 -1.442695, %v1656_v31  ;;  %v1657_v1 = vadd.f32 %v3009_v16, %v1618_v32 }
 0x151   : > { %v1010_v36 = vpop.f32.mrb[36].mxu1  ;;  %v1498_v39 = vpop.f32.mrb[36].mxu0 }
 0x152   : > { %2454 = vpow2.f32 %v2204_v35  ;;  %v2205_v40 = vmul.f32 -1.442695, %v1657_v1  ;;  %v1011_v43 = vadd.f32 %v1010_v36, %v2949_v13  ;;  %v1012_v44 = vpop.f32.mrb[37].mxu1  ;;  %v1500_v47 = vpop.f32.mrb[37].mxu0 }
 0x153   : > { %v1013_v48 = vpop.f32.mrb[38].mxu1  ;;  %v1501_v51 = vpop.f32.mrb[38].mxu0 }
 0x154   : > { %2456 = vpow2.f32 %v2205_v40  ;;  %v1619_v9 = vadd.f32 %v1498_v39, %v1011_v43  ;;  %v1014_v52 = vadd.f32 %v1013_v48, %v2953_v17  ;;  %v1015_v55 = vpop.f32.mrb[39].mxu1  ;;  %v1503_v56 = vpop.f32.mrb[39].mxu0 }
 0x156   : > { %v1658_v59 = vadd.f32 %v3009_v16, %v1619_v9  ;;  %v1620_v60 = vadd.f32 %v1501_v51, %v1014_v52 }
 0x158   : > { %v2206_v63 = vmul.f32 -1.442695, %v1658_v59  ;;  %v1659_v0 = vadd.f32 %v3009_v16, %v1620_v60 }
 0x159   : > { %v1018_v4 = vpop.f32.mrb[40].mxu1  ;;  %v1506_v13 = vpop.f32.mrb[40].mxu0 }
 0x15a   : > { %2458 = vpow2.f32 %v2206_v63  ;;  %v2207_v5 = vmul.f32 -1.442695, %v1659_v0  ;;  %v1019_v7 = vadd.f32 %v1018_v4, %v2957_v21  ;;  %v1020_v8 = vpop.f32.mrb[41].mxu1  ;;  %v1508_v11 = vpop.f32.mrb[41].mxu0 }
 0x15b   : > { %v1021_v12 = vpop.f32.mrb[42].mxu1  ;;  %v1509_v17 = vpop.f32.mrb[42].mxu0 }
 0x15c   : > { %v2455_v15 = vpop.eup %2454  ;;  %2460 = vpow2.f32 %v2207_v5  ;;  %v1621_v19 = vadd.f32 %v1506_v13, %v1019_v7  ;;  %v1022_v20 = vadd.f32 %v1021_v12, %v2961_v25  ;;  %v1023_v23 = vpop.f32.mrb[43].mxu1 }
 0x15d   : > { %v1511_v24 = vpop.f32.mrb[43].mxu0  ;;  %v1784_v27 = vadd.f32 1.0, %v2455_v15 }
 0x15e   : > { %v2457_v28 = vpop.eup %2456  ;;  %v1660_v31 = vadd.f32 %v3009_v16, %v1621_v19  ;;  %v1622_v32 = vadd.f32 %v1509_v17, %v1022_v20 }
 0x15f   : > { %2462 = vrcp.f32 %v1784_v27  ;;  %v1785_v35 = vadd.f32 1.0, %v2457_v28 }
 0x160   : > { %v2208_v21 = vmul.f32 -1.442695, %v1660_v31  ;;  %v1661_v1 = vadd.f32 %v3009_v16, %v1622_v32 }
 0x161   : > { %2464 = vrcp.f32 %v1785_v35  ;;  %v1026_v36 = vpop.f32.mrb[44].mxu1  ;;  %v1514_v39 = vpop.f32.mrb[44].mxu0 }
 0x162   : > { %2466 = vpow2.f32 %v2208_v21  ;;  %v2209_v40 = vmul.f32 -1.442695, %v1661_v1  ;;  %v1027_v25 = vadd.f32 %v1026_v36, %v2965_v29  ;;  %v1028_v43 = vpop.f32.mrb[45].mxu1  ;;  %v1516_v44 = vpop.f32.mrb[45].mxu0 }
 0x163   : > { %v1029_v47 = vpop.f32.mrb[46].mxu1  ;;  %v1517_v48 = vpop.f32.mrb[46].mxu0 }
 0x164   : > { %v2459_v51 = vpop.eup %2458  ;;  %2468 = vpow2.f32 %v2209_v40  ;;  %v1623_v9 = vadd.f32 %v1514_v39, %v1027_v25  ;;  %v1030_v52 = vadd.f32 %v1029_v47, %v2969_v33  ;;  %v1031_v55 = vpop.f32.mrb[47].mxu1 }
 0x165   : > { %v1519_v56 = vpop.f32.mrb[47].mxu0  ;;  %v1786_v59 = vadd.f32 1.0, %v2459_v51 }
 0x166   : > { %v2461_v60 = vpop.eup %2460  ;;  %v1662_v63 = vadd.f32 %v3009_v16, %v1623_v9  ;;  %v1624_v0 = vadd.f32 %v1517_v48, %v1030_v52 }
 0x167   : > { %2470 = vrcp.f32 %v1786_v59  ;;  %v1787_v29 = vadd.f32 1.0, %v2461_v60 }
 0x168   : > { %v2210_v4 = vmul.f32 -1.442695, %v1662_v63  ;;  %v1663_v13 = vadd.f32 %v3009_v16, %v1624_v0 }
 0x169   : > { %v2463_v33 = vpop.eup %2462  ;;  %2472 = vrcp.f32 %v1787_v29  ;;  %v1034_v5 = vpop.f32.mrb[48].mxu1 }
 0x16a   : > { %v1522_v7 = vpop.f32.mrb[48].mxu0  ;;  %1880 = vst [vmem:[%s3030_s8] sm:$0xff] %v2463_v33  ;;  %2474 = vpow2.f32 %v2210_v4  ;;  %v2211_v8 = vmul.f32 -1.442695, %v1663_v13  ;;  %v1035_v11 = vadd.f32 %v1034_v5, %v2973_v37  ;;  %v1036_v12 = vpop.f32.mrb[49].mxu1 }
 0x16b   : > { %v1524_v17 = vpop.f32.mrb[49].mxu0  ;;  %v2465_v15 = vpop.eup %2464 }
 0x16c   : > { %v1037_v19 = vpop.f32.mrb[50].mxu1  ;;  %v1525_v20 = vpop.f32.mrb[50].mxu0  ;;  %1881 = vst [vmem:[%s3030_s8 + $0x8] sm:$0xff] %v2465_v15  ;;  %2476 = vpow2.f32 %v2211_v8  ;;  %v1625_v24 = vadd.f32 %v1522_v7, %v1035_v11 }
 0x16d   : > { %v2467_v23 = vpop.eup %2466  ;;  %v1038_v27 = vadd.f32 %v1037_v19, %v2977_v41  ;;  %v1039_v28 = vpop.f32.mrb[51].mxu1 }
 0x16e   : > { %v1527_v31 = vpop.f32.mrb[51].mxu0  ;;  %v1788_v32 = vadd.f32 1.0, %v2467_v23  ;;  %v2469_v35 = vpop.eup %2468  ;;  %v1664_v21 = vadd.f32 %v3009_v16, %v1625_v24 }
 0x16f   : > { %v1626_v1 = vadd.f32 %v1525_v20, %v1038_v27  ;;  %v1789_v37 = vadd.f32 1.0, %v2469_v35 }
 0x170   : > { %2478 = vrcp.f32 %v1788_v32  ;;  %v2212_v36 = vmul.f32 -1.442695, %v1664_v21 }
 0x171   : > { %v1665_v39 = vadd.f32 %v3009_v16, %v1626_v1  ;;  %v2471_v40 = vpop.eup %2470  ;;  %2480 = vrcp.f32 %v1789_v37  ;;  %v1042_v25 = vpop.f32.mrb[52].mxu1 }
 0x172   : > { %v1530_v43 = vpop.f32.mrb[52].mxu0  ;;  %1882 = vst [vmem:[%s3030_s8 + $0x10] sm:$0xff] %v2471_v40  ;;  %2482 = vpow2.f32 %v2212_v36  ;;  %v1043_v44 = vadd.f32 %v1042_v25, %v2981_v45  ;;  %v1044_v47 = vpop.f32.mrb[53].mxu1 }
 0x173   : > { %v2213_v41 = vmul.f32 -1.442695, %v1665_v39  ;;  %v1532_v48 = vpop.f32.mrb[53].mxu0  ;;  %v2473_v51 = vpop.eup %2472 }
 0x174   : > { %v1045_v9 = vpop.f32.mrb[54].mxu1  ;;  %v1533_v52 = vpop.f32.mrb[54].mxu0  ;;  %1883 = vst [vmem:[%s3030_s8 + $0x18] sm:$0xff] %v2473_v51  ;;  %v1627_v56 = vadd.f32 %v1530_v43, %v1043_v44 }
 0x175   : > { %v2475_v55 = vpop.eup %2474  ;;  %2484 = vpow2.f32 %v2213_v41  ;;  %v1046_v59 = vadd.f32 %v1045_v9, %v2985_v49  ;;  %v1047_v60 = vpop.f32.mrb[55].mxu1 }
 0x176   : > { %v1535_v63 = vpop.f32.mrb[55].mxu0  ;;  %v1790_v0 = vadd.f32 1.0, %v2475_v55  ;;  %v2477_v29 = vpop.eup %2476  ;;  %v1666_v4 = vadd.f32 %v3009_v16, %v1627_v56 }
 0x177   : > { %v1628_v13 = vadd.f32 %v1533_v52, %v1046_v59  ;;  %v1791_v45 = vadd.f32 1.0, %v2477_v29 }
 0x178   : > { %2486 = vrcp.f32 %v1790_v0  ;;  %v2214_v33 = vmul.f32 -1.442695, %v1666_v4 }
 0x179   : > { %v1667_v5 = vadd.f32 %v3009_v16, %v1628_v13  ;;  %2488 = vrcp.f32 %v1791_v45  ;;  %v1050_v8 = vpop.f32.mrb[56].mxu1  ;;  %v1538_v11 = vpop.f32.mrb[56].mxu0 }
 0x17a   : > { %v2479_v7 = vpop.eup %2478  ;;  %2490 = vpow2.f32 %v2214_v33  ;;  %v1051_v12 = vadd.f32 %v1050_v8, %v2989_v53  ;;  %v1052_v17 = vpop.f32.mrb[57].mxu1 }
 0x17b   : > { %1884 = vst [vmem:[%s3030_s8 + $0x20] sm:$0xff] %v2479_v7  ;;  %v2215_v49 = vmul.f32 -1.442695, %v1667_v5  ;;  %v1540_v15 = vpop.f32.mrb[57].mxu0  ;;  %v2481_v19 = vpop.eup %2480 }
 0x17c   : > { %v1053_v20 = vpop.f32.mrb[58].mxu1  ;;  %v1541_v23 = vpop.f32.mrb[58].mxu0  ;;  %1885 = vst [vmem:[%s3030_s8 + $0x28] sm:$0xff] %v2481_v19  ;;  %v1629_v27 = vadd.f32 %v1538_v11, %v1051_v12 }
 0x17d   : > { %v2483_v24 = vpop.eup %2482  ;;  %2492 = vpow2.f32 %v2215_v49  ;;  %v1054_v28 = vadd.f32 %v1053_v20, %v2993_v57  ;;  %v1055_v31 = vpop.f32.mrb[59].mxu1 }
 0x17e   : > { %v1543_v32 = vpop.f32.mrb[59].mxu0  ;;  %v1792_v35 = vadd.f32 1.0, %v2483_v24  ;;  %v1668_v1 = vadd.f32 %v3009_v16, %v1629_v27 }
 0x17f   : > { %v2485_v21 = vpop.eup %2484  ;;  %v1630_v37 = vadd.f32 %v1541_v23, %v1054_v28 }
 0x180   : > { %2494 = vrcp.f32 %v1792_v35  ;;  %v1793_v53 = vadd.f32 1.0, %v2485_v21  ;;  %v2216_v36 = vmul.f32 -1.442695, %v1668_v1 }
 0x181   : > { %v1669_v39 = vadd.f32 %v3009_v16, %v1630_v37  ;;  %v1058_v25 = vpop.f32.mrb[60].mxu1  ;;  %v1546_v43 = vpop.f32.mrb[60].mxu0 }
 0x182   : > { %v2487_v40 = vpop.eup %2486  ;;  %2496 = vrcp.f32 %v1793_v53  ;;  %v1059_v41 = vadd.f32 %v1058_v25, %v2997_v61  ;;  %v1060_v44 = vpop.f32.mrb[61].mxu1 }
 0x183   : > { %1886 = vst [vmem:[%s3030_s8 + $0x30] sm:$0xff] %v2487_v40  ;;  %2498 = vpow2.f32 %v2216_v36  ;;  %v2217_v57 = vmul.f32 -1.442695, %v1669_v39  ;;  %v1548_v47 = vpop.f32.mrb[61].mxu0  ;;  %v2489_v48 = vpop.eup %2488 }
 0x184   : > { %v1061_v51 = vpop.f32.mrb[62].mxu1  ;;  %v1549_v9 = vpop.f32.mrb[62].mxu0  ;;  %1887 = vst [vmem:[%s3030_s8 + $0x38] sm:$0xff] %v2489_v48  ;;  %v1631_v55 = vadd.f32 %v1546_v43, %v1059_v41 }
 0x185   : > { %v2491_v52 = vpop.eup %2490  ;;  %2500 = vpow2.f32 %v2217_v57  ;;  %v1062_v56 = vadd.f32 %v1061_v51, %v3001_v2  ;;  %v1063_v59 = vpop.f32.mrb[63].mxu1 }
 0x186   : > { %v1551_v60 = vpop.f32.mrb[63].mxu0  ;;  %v1794_v63 = vadd.f32 1.0, %v2491_v52  ;;  %v1670_v29 = vadd.f32 %v3009_v16, %v1631_v55 }
 0x187   : > { %v2493_v0 = vpop.eup %2492  ;;  %v1632_v4 = vadd.f32 %v1549_v9, %v1062_v56 }
 0x188   : > { %2502 = vrcp.f32 %v1794_v63  ;;  %v1795_v61 = vadd.f32 1.0, %v2493_v0  ;;  %v2218_v13 = vmul.f32 -1.442695, %v1670_v29 }
 0x189   : > { %v1671_v45 = vadd.f32 %v3009_v16, %v1632_v4  ;;  %v1066_v5 = vpop.f32.mrb[64].mxu1  ;;  %v1554_v7 = vpop.f32.mrb[64].mxu0 }
 0x18a   : > { %v2495_v33 = vpop.eup %2494  ;;  %2504 = vrcp.f32 %v1795_v61  ;;  %v1067_v8 = vadd.f32 %v1066_v5, %v2943_v6  ;;  %v1068_v11 = vpop.f32.mrb[65].mxu1 }
 0x18b   : > { %1888 = vst [vmem:[%s3030_s8 + $0x40] sm:$0xff] %v2495_v33  ;;  %2506 = vpow2.f32 %v2218_v13  ;;  %v2219_v2 = vmul.f32 -1.442695, %v1671_v45  ;;  %v1556_v49 = vpop.f32.mrb[65].mxu0  ;;  %v1069_v17 = vpop.f32.mrb[66].mxu1 }
 0x18c   : > { %v2497_v12 = vpop.eup %2496  ;;  %v1557_v15 = vpop.f32.mrb[66].mxu0  ;;  %v1633_v20 = vadd.f32 %v1554_v7, %v1067_v8  ;;  %v1070_v23 = vadd.f32 %v1069_v17, %v2947_v10 }
 0x18d   : > { %v2499_v19 = vpop.eup %2498  ;;  %1889 = vst [vmem:[%s3030_s8 + $0x48] sm:$0xff] %v2497_v12  ;;  %2508 = vpow2.f32 %v2219_v2  ;;  %v1071_v24 = vpop.f32.mrb[67].mxu1 }
 0x18e   : > { %v1559_v27 = vpop.f32.mrb[67].mxu0  ;;  %v1796_v28 = vadd.f32 1.0, %v2499_v19  ;;  %v1672_v32 = vadd.f32 %v3009_v16, %v1633_v20  ;;  %v1634_v35 = vadd.f32 %v1557_v15, %v1070_v23 }
 0x18f   : > { %v2501_v31 = vpop.eup %2500 }
 0x190   : > { %2510 = vrcp.f32 %v1796_v28  ;;  %v1797_v6 = vadd.f32 1.0, %v2501_v31  ;;  %v2220_v21 = vmul.f32 -1.442695, %v1672_v32  ;;  %v1673_v1 = vadd.f32 %v3009_v16, %v1634_v35 }
 0x191   : > { %v1074_v53 = vpop.f32.mrb[68].mxu1  ;;  %v1562_v36 = vpop.f32.mrb[68].mxu0 }
 0x192   : > { %v2503_v37 = vpop.eup %2502  ;;  %2512 = vrcp.f32 %v1797_v6  ;;  %v2221_v10 = vmul.f32 -1.442695, %v1673_v1  ;;  %v1075_v39 = vadd.f32 %v1074_v53, %v2951_v14  ;;  %v1076_v40 = vpop.f32.mrb[69].mxu1 }
 0x193   : > { %1890 = vst [vmem:[%s3030_s8 + $0x50] sm:$0xff] %v2503_v37  ;;  %2514 = vpow2.f32 %v2220_v21  ;;  %v1564_v25 = vpop.f32.mrb[69].mxu0  ;;  %v1077_v57 = vpop.f32.mrb[70].mxu1 }
 0x194   : > { %v2505_v43 = vpop.eup %2504  ;;  %v1565_v41 = vpop.f32.mrb[70].mxu0  ;;  %2516 = vpow2.f32 %v2221_v10  ;;  %v1635_v47 = vadd.f32 %v1562_v36, %v1075_v39  ;;  %v1078_v48 = vadd.f32 %v1077_v57, %v2955_v18 }
 0x195   : > { %v2507_v44 = vpop.eup %2506  ;;  %1891 = vst [vmem:[%s3030_s8 + $0x58] sm:$0xff] %v2505_v43  ;;  %v1079_v51 = vpop.f32.mrb[71].mxu1 }
 0x196   : > { %v1567_v9 = vpop.f32.mrb[71].mxu0  ;;  %v1798_v52 = vadd.f32 1.0, %v2507_v44  ;;  %v1674_v56 = vadd.f32 %v3009_v16, %v1635_v47  ;;  %v1636_v59 = vadd.f32 %v1565_v41, %v1078_v48 }
 0x197   : > { %v2509_v55 = vpop.eup %2508 }
 0x198   : > { %2518 = vrcp.f32 %v1798_v52  ;;  %v1799_v14 = vadd.f32 1.0, %v2509_v55  ;;  %v2222_v60 = vmul.f32 -1.442695, %v1674_v56  ;;  %v1675_v63 = vadd.f32 %v3009_v16, %v1636_v59 }
 0x199   : > { %v1082_v29 = vpop.f32.mrb[72].mxu1  ;;  %v1570_v4 = vpop.f32.mrb[72].mxu0 }
 0x19a   : > { %v2511_v0 = vpop.eup %2510  ;;  %2520 = vrcp.f32 %v1799_v14  ;;  %v2223_v18 = vmul.f32 -1.442695, %v1675_v63  ;;  %v1083_v61 = vadd.f32 %v1082_v29, %v2959_v22  ;;  %v1084_v13 = vpop.f32.mrb[73].mxu1 }
 0x19b   : > { %1892 = vst [vmem:[%s3030_s8 + $0x60] sm:$0xff] %v2511_v0  ;;  %2522 = vpow2.f32 %v2222_v60  ;;  %v1572_v45 = vpop.f32.mrb[73].mxu0  ;;  %v1085_v5 = vpop.f32.mrb[74].mxu1 }
 0x19c   : > { %v2513_v33 = vpop.eup %2512  ;;  %v1573_v7 = vpop.f32.mrb[74].mxu0  ;;  %2524 = vpow2.f32 %v2223_v18  ;;  %v1637_v8 = vadd.f32 %v1570_v4, %v1083_v61  ;;  %v1086_v11 = vadd.f32 %v1085_v5, %v2963_v26 }
 0x19d   : > { %v2515_v2 = vpop.eup %2514  ;;  %1893 = vst [vmem:[%s3030_s8 + $0x68] sm:$0xff] %v2513_v33  ;;  %v1087_v49 = vpop.f32.mrb[75].mxu1 }
 0x19e   : > { %v1575_v12 = vpop.f32.mrb[75].mxu0  ;;  %v1800_v17 = vadd.f32 1.0, %v2515_v2  ;;  %v2517_v15 = vpop.eup %2516  ;;  %v1676_v19 = vadd.f32 %v3009_v16, %v1637_v8  ;;  %v1638_v20 = vadd.f32 %v1573_v7, %v1086_v11 }
 0x19f   : > { %v1801_v22 = vadd.f32 1.0, %v2517_v15 }
 0x1a0   : > { %2526 = vrcp.f32 %v1800_v17  ;;  %v2224_v23 = vmul.f32 -1.442695, %v1676_v19  ;;  %v1677_v24 = vadd.f32 %v3009_v16, %v1638_v20 }
 0x1a1   : > { %2528 = vrcp.f32 %v1801_v22  ;;  %v1090_v28 = vpop.f32.mrb[76].mxu1  ;;  %v1578_v31 = vpop.f32.mrb[76].mxu0 }
 0x1a2   : > { %v2519_v27 = vpop.eup %2518  ;;  %2530 = vpow2.f32 %v2224_v23  ;;  %v2225_v26 = vmul.f32 -1.442695, %v1677_v24  ;;  %v1091_v32 = vadd.f32 %v1090_v28, %v2967_v30  ;;  %v1092_v35 = vpop.f32.mrb[77].mxu1 }
 0x1a3   : > { %1894 = vst [vmem:[%s3030_s8 + $0x70] sm:$0xff] %v2519_v27  ;;  %v1580_v6 = vpop.f32.mrb[77].mxu0  ;;  %v1093_v1 = vpop.f32.mrb[78].mxu1 }
 0x1a4   : > { %v2521_v21 = vpop.eup %2520  ;;  %v1581_v37 = vpop.f32.mrb[78].mxu0  ;;  %2532 = vpow2.f32 %v2225_v26  ;;  %v1639_v36 = vadd.f32 %v1578_v31, %v1091_v32  ;;  %v1094_v10 = vadd.f32 %v1093_v1, %v2971_v34 }
 0x1a5   : > { %v2523_v53 = vpop.eup %2522  ;;  %1895 = vst [vmem:[%s3030_s8 + $0x78] sm:$0xff] %v2521_v21  ;;  %v1095_v39 = vpop.f32.mrb[79].mxu1 }
 0x1a6   : > { %v1583_v40 = vpop.f32.mrb[79].mxu0  ;;  %v1802_v25 = vadd.f32 1.0, %v2523_v53  ;;  %v2525_v43 = vpop.eup %2524  ;;  %v1678_v57 = vadd.f32 %v3009_v16, %v1639_v36  ;;  %v1640_v41 = vadd.f32 %v1581_v37, %v1094_v10 }
 0x1a7   : > { %v1803_v30 = vadd.f32 1.0, %v2525_v43 }
 0x1a8   : > { %2534 = vrcp.f32 %v1802_v25  ;;  %v2226_v44 = vmul.f32 -1.442695, %v1678_v57  ;;  %v1679_v47 = vadd.f32 %v3009_v16, %v1640_v41 }
 0x1a9   : > { %2536 = vrcp.f32 %v1803_v30  ;;  %v1098_v51 = vpop.f32.mrb[80].mxu1  ;;  %v1586_v9 = vpop.f32.mrb[80].mxu0 }
 0x1aa   : > { %v2527_v48 = vpop.eup %2526  ;;  %2538 = vpow2.f32 %v2226_v44  ;;  %v2227_v34 = vmul.f32 -1.442695, %v1679_v47  ;;  %v1099_v52 = vadd.f32 %v1098_v51, %v2975_v38  ;;  %v1100_v55 = vpop.f32.mrb[81].mxu1 }
 0x1ab   : > { %1896 = vst [vmem:[%s3030_s8 + $0x80] sm:$0xff] %v2527_v48  ;;  %v1588_v56 = vpop.f32.mrb[81].mxu0  ;;  %v2529_v59 = vpop.eup %2528 }
 0x1ac   : > { %v1101_v14 = vpop.f32.mrb[82].mxu1  ;;  %v1589_v60 = vpop.f32.mrb[82].mxu0  ;;  %1897 = vst [vmem:[%s3030_s8 + $0x88] sm:$0xff] %v2529_v59  ;;  %2540 = vpow2.f32 %v2227_v34  ;;  %v1641_v0 = vadd.f32 %v1586_v9, %v1099_v52 }
 0x1ad   : > { %v2531_v63 = vpop.eup %2530  ;;  %v1102_v29 = vadd.f32 %v1101_v14, %v2979_v42  ;;  %v1103_v4 = vpop.f32.mrb[83].mxu1 }
 0x1ae   : > { %v1591_v18 = vpop.f32.mrb[83].mxu0  ;;  %v1804_v61 = vadd.f32 1.0, %v2531_v63  ;;  %v2533_v13 = vpop.eup %2532  ;;  %v1680_v45 = vadd.f32 %v3009_v16, %v1641_v0 }
 0x1af   : > { %v1642_v33 = vadd.f32 %v1589_v60, %v1102_v29  ;;  %v1805_v38 = vadd.f32 1.0, %v2533_v13 }
 0x1b0   : > { %2542 = vrcp.f32 %v1804_v61  ;;  %v2228_v5 = vmul.f32 -1.442695, %v1680_v45 }
 0x1b1   : > { %v1681_v7 = vadd.f32 %v3009_v16, %v1642_v33  ;;  %2544 = vrcp.f32 %v1805_v38  ;;  %v1106_v8 = vpop.f32.mrb[84].mxu1  ;;  %v1594_v11 = vpop.f32.mrb[84].mxu0 }
 0x1b2   : > { %v2535_v2 = vpop.eup %2534  ;;  %2546 = vpow2.f32 %v2228_v5  ;;  %v1107_v49 = vadd.f32 %v1106_v8, %v2983_v46  ;;  %v1108_v12 = vpop.f32.mrb[85].mxu1 }
 0x1b3   : > { %1898 = vst [vmem:[%s3030_s8 + $0x90] sm:$0xff] %v2535_v2  ;;  %v2229_v42 = vmul.f32 -1.442695, %v1681_v7  ;;  %v1596_v17 = vpop.f32.mrb[85].mxu0  ;;  %v2537_v15 = vpop.eup %2536 }
 0x1b4   : > { %v1109_v19 = vpop.f32.mrb[86].mxu1  ;;  %v1597_v20 = vpop.f32.mrb[86].mxu0  ;;  %1899 = vst [vmem:[%s3030_s8 + $0x98] sm:$0xff] %v2537_v15  ;;  %v1643_v23 = vadd.f32 %v1594_v11, %v1107_v49 }
 0x1b5   : > { %v2539_v22 = vpop.eup %2538  ;;  %2548 = vpow2.f32 %v2229_v42  ;;  %v1110_v24 = vadd.f32 %v1109_v19, %v2987_v50  ;;  %v1111_v27 = vpop.f32.mrb[87].mxu1 }
 0x1b6   : > { %v1599_v28 = vpop.f32.mrb[87].mxu0  ;;  %v1806_v31 = vadd.f32 1.0, %v2539_v22  ;;  %v2541_v26 = vpop.eup %2540  ;;  %v1682_v32 = vadd.f32 %v3009_v16, %v1643_v23 }
 0x1b7   : > { %v1644_v35 = vadd.f32 %v1597_v20, %v1110_v24  ;;  %v1807_v46 = vadd.f32 1.0, %v2541_v26 }
 0x1b8   : > { %2550 = vrcp.f32 %v1806_v31  ;;  %v2230_v6 = vmul.f32 -1.442695, %v1682_v32 }
 0x1b9   : > { %v1683_v21 = vadd.f32 %v3009_v16, %v1644_v35  ;;  %2552 = vrcp.f32 %v1807_v46  ;;  %v1114_v37 = vpop.f32.mrb[88].mxu1  ;;  %v1602_v53 = vpop.f32.mrb[88].mxu0 }
 0x1ba   : > { %v2543_v1 = vpop.eup %2542  ;;  %2554 = vpow2.f32 %v2230_v6  ;;  %v1115_v36 = vadd.f32 %v1114_v37, %v2991_v54  ;;  %v1116_v10 = vpop.f32.mrb[89].mxu1 }
 0x1bb   : > { %1900 = vst [vmem:[%s3030_s8 + $0xa0] sm:$0xff] %v2543_v1  ;;  %v2231_v50 = vmul.f32 -1.442695, %v1683_v21  ;;  %v1604_v39 = vpop.f32.mrb[89].mxu0  ;;  %v2545_v40 = vpop.eup %2544 }
 0x1bc   : > { %v1117_v25 = vpop.f32.mrb[90].mxu1  ;;  %v1605_v43 = vpop.f32.mrb[90].mxu0  ;;  %1901 = vst [vmem:[%s3030_s8 + $0xa8] sm:$0xff] %v2545_v40  ;;  %v1645_v41 = vadd.f32 %v1602_v53, %v1115_v36 }
 0x1bd   : > { %v2547_v57 = vpop.eup %2546  ;;  %2556 = vpow2.f32 %v2231_v50  ;;  %v1118_v30 = vadd.f32 %v1117_v25, %v2995_v58  ;;  %v1119_v44 = vpop.f32.mrb[91].mxu1 }
 0x1be   : > { %v1607_v47 = vpop.f32.mrb[91].mxu0  ;;  %v1808_v48 = vadd.f32 1.0, %v2547_v57  ;;  %v1684_v9 = vadd.f32 %v3009_v16, %v1645_v41 }
 0x1bf   : > { %v2549_v51 = vpop.eup %2548  ;;  %v1646_v34 = vadd.f32 %v1605_v43, %v1118_v30 }
 0x1c0   : > { %2558 = vrcp.f32 %v1808_v48  ;;  %v1809_v54 = vadd.f32 1.0, %v2549_v51  ;;  %v2232_v52 = vmul.f32 -1.442695, %v1684_v9 }
 0x1c1   : > { %v1685_v55 = vadd.f32 %v3009_v16, %v1646_v34  ;;  %v1122_v59 = vpop.f32.mrb[92].mxu1  ;;  %v1610_v14 = vpop.f32.mrb[92].mxu0 }
 0x1c2   : > { %v2551_v56 = vpop.eup %2550  ;;  %2560 = vrcp.f32 %v1809_v54  ;;  %v1123_v60 = vadd.f32 %v1122_v59, %v2999_v62  ;;  %v1124_v63 = vpop.f32.mrb[93].mxu1 }
 0x1c3   : > { %1902 = vst [vmem:[%s3030_s8 + $0xb0] sm:$0xff] %v2551_v56  ;;  %2562 = vpow2.f32 %v2232_v52  ;;  %v2233_v58 = vmul.f32 -1.442695, %v1685_v55  ;;  %v1612_v0 = vpop.f32.mrb[93].mxu0  ;;  %v2553_v29 = vpop.eup %2552 }
 0x1c4   : > { %v1125_v4 = vpop.f32.mrb[94].mxu1  ;;  %v1613_v18 = vpop.f32.mrb[94].mxu0  ;;  %1903 = vst [vmem:[%s3030_s8 + $0xb8] sm:$0xff] %v2553_v29  ;;  %v1647_v13 = vadd.f32 %v1610_v14, %v1123_v60 }
 0x1c5   : > { %v2555_v61 = vpop.eup %2554  ;;  %2564 = vpow2.f32 %v2233_v58  ;;  %v1126_v45 = vadd.f32 %v1125_v4, %v3003_v3  ;;  %v1127_v33 = vpop.f32.mrb[95].mxu1 }
 0x1c6   : > { %v1615_v38 = vpop.f32.mrb[95].mxu0  ;;  %v1810_v5 = vadd.f32 1.0, %v2555_v61  ;;  %v1686_v2 = vadd.f32 %v3009_v16, %v1647_v13 }
 0x1c7   : > { %v2557_v7 = vpop.eup %2556  ;;  %v1648_v62 = vadd.f32 %v1613_v18, %v1126_v45 }
 0x1c8   : > { %2566 = vrcp.f32 %v1810_v5  ;;  %v1811_v8 = vadd.f32 1.0, %v2557_v7  ;;  %v2234_v11 = vmul.f32 -1.442695, %v1686_v2 }
 0x1c9   : > { %v1687_v42 = vadd.f32 %v3009_v16, %v1648_v62 }
 0x1ca   : > { %v2559_v49 = vpop.eup %2558  ;;  %2568 = vrcp.f32 %v1811_v8 }
 0x1cb   : > { %1904 = vst [vmem:[%s3030_s8 + $0xc0] sm:$0xff] %v2559_v49  ;;  %2570 = vpow2.f32 %v2234_v11  ;;  %v2235_v3 = vmul.f32 -1.442695, %v1687_v42 }
 0x1cc   : > { %v2561_v12 = vpop.eup %2560 }
 0x1cd   : > { %v2563_v17 = vpop.eup %2562  ;;  %1905 = vst [vmem:[%s3030_s8 + $0xc8] sm:$0xff] %v2561_v12  ;;  %2572 = vpow2.f32 %v2235_v3 }
 0x1ce   : > { %v1812_v15 = vadd.f32 1.0, %v2563_v17 }
 0x1cf   : > { %v2565_v19 = vpop.eup %2564 }
 0x1d0   : > { %2574 = vrcp.f32 %v1812_v15  ;;  %v1813_v20 = vadd.f32 1.0, %v2565_v19 }
 0x1d2   : > { %v2567_v22 = vpop.eup %2566  ;;  %2576 = vrcp.f32 %v1813_v20 }
 0x1d3   : > { %1906 = vst [vmem:[%s3030_s8 + $0xd0] sm:$0xff] %v2567_v22 }
 0x1d4   : > { %v2569_v16 = vpop.eup %2568 }
 0x1d5   : > { %v2571_v23 = vpop.eup %2570  ;;  %1907 = vst [vmem:[%s3030_s8 + $0xd8] sm:$0xff] %v2569_v16 }
 0x1d6   : > { %v1814_v24 = vadd.f32 1.0, %v2571_v23 }
 0x1d7   : > { %v2573_v27 = vpop.eup %2572 }
 0x1d8   : > { %2578 = vrcp.f32 %v1814_v24  ;;  %v1815_v28 = vadd.f32 1.0, %v2573_v27 }
 0x1da   : > { %v2575_v31 = vpop.eup %2574  ;;  %2580 = vrcp.f32 %v1815_v28 }
 0x1db   : > { %1908 = vst [vmem:[%s3030_s8 + $0xe0] sm:$0xff] %v2575_v31 }
 0x1dc   : > { %v2577_v26 = vpop.eup %2576 }
 0x1dd   : > { %1909 = vst [vmem:[%s3030_s8 + $0xe8] sm:$0xff] %v2577_v26 }
 0x1e2   : > { %v2579_v32 = vpop.eup %2578 }
 0x1e3   : > { %1910 = vst [vmem:[%s3030_s8 + $0xf0] sm:$0xff] %v2579_v32 }
 0x1e4   : > { %v2581_v35 = vpop.eup %2580 }
 0x1e5   : > { %1911 = vst [vmem:[%s3030_s8 + $0xf8] sm:$0xff] %v2581_v35 }
 0x1e6 PF: > { %s13_s12 = sadd.s32 1, %s2588_s12  }
 0x1e7   : > { %p10_p4 = scmp.ge.s32.totalorder %s13_s12, 6  }
 0x1e9   :  { %12 = sbr.rel (!%p10_p4) target bundleno = 1 (0x1), region = 64 }

</bundles_post_ra>
